<compile_context>
chip_gen: v5e
topology: v5e:2x2
jax: 0.10.0
libtpu: 0.0.40
codegen_flags: <defaults>
</compile_context>

<pallas_src>
import numpy as np
import jax
import jax.numpy as jnp
from jax import lax
from jax.experimental import pallas as pl
from jax.experimental.pallas import tpu as pltpu

EPS = 1e-5          # PyTorch GroupNorm default eps
CMAX = 16           # every channel dim is zero-padded to 16 inside the kernel
MAX_TAPS = 9        # 3x3 conv taps (1x1 convs use tap 0 only)

# (c_in, c_out, kernel, padding) for the 8 conv blocks of ModelCL (gnorm).
LAYER_CFGS = [
    (1, 8, 3, 0), (8, 12, 3, 0), (12, 8, 1, 0),     # block1
    (8, 12, 3, 0), (12, 16, 3, 0), (16, 12, 1, 0),  # block2
    (12, 16, 3, 1), (16, 16, 3, 1),                 # block3
]


# ---------------------------------------------------------------------------
# Static schedule (geometry) + host-precomputed constants (masks / selections)
# ---------------------------------------------------------------------------
def build_plan(h0, w0):
    plan, masks, sels = [], [], []
    # valid extent, flat row/col strides, allocated flat length
    H, W, sr, sc, L = h0, w0, w0, 1, h0 * w0

    def valid_mask(hv, wv, ln):
        m = np.zeros((ln,), np.float32)
        for y in range(hv):
            for x in range(wv):
                q = y * sr + x * sc
                assert q < ln
                m[q] = 1.0
        return m

    def add_conv(layer):
        nonlocal H, W, L
        _, cout, k, _ = LAYER_CFGS[layer]
        taps = [i * sr + j * sc for i in range(k) for j in range(k)]
        l_out = L - (k - 1) * (sr + sc)
        h_out, w_out = H - k + 1, W - k + 1
        assert l_out >= (h_out - 1) * sr + (w_out - 1) * sc + 1
        masks.append(valid_mask(h_out, w_out, l_out))
        plan.append(dict(kind="conv", layer=layer, taps=taps, l_out=l_out,
                         mask=len(masks) - 1, nvalid=h_out * w_out))
        H, W, L = h_out, w_out, l_out

    def add_maxpool():
        nonlocal H, W, sr, sc, L
        l_out = L - (sr + sc)
        plan.append(dict(kind="maxpool", offs=(0, sc, sr, sr + sc), l_out=l_out))
        H, W, sr, sc, L = H // 2, W // 2, 2 * sr, 2 * sc, l_out

    def add_pad_select(pad):
        # Compact + re-stride the current HxW valid region into a zero-padded
        # (H+2p)x(W+2p) frame (row stride W+2p) via a 0/1 selection matmul.
        nonlocal H, W, sr, sc, L
        hn, wn = H + 2 * pad, W + 2 * pad
        ln = hn * wn
        sel = np.zeros((L, ln), np.float32)
        for y in range(H):
            for x in range(W):
                sel[y * sr + x * sc, (y + pad) * wn + (x + pad)] = 1.0
        sels.append(sel)
        plan.append(dict(kind="select", sel=len(sels) - 1))
        H, W, sr, sc, L = hn, wn, wn, 1, ln

    for l in (0, 1, 2):
        add_conv(l)                      # block1
    add_maxpool()
    for l in (3, 4, 5):
        add_conv(l)                      # block2
    add_maxpool()
    add_pad_select(1); add_conv(6)       # block3 conv (pad=1) as valid conv on padded frame
    add_pad_select(1); add_conv(7)
    masks.append(valid_mask(H, W, L))    # GAP mask over the final 4x4 map
    plan.append(dict(kind="gap", mask=len(masks) - 1, nvalid=H * W))

    lmax = max(m.shape[0] for m in masks)
    mask_pack = np.zeros((len(masks), 1, lmax), np.float32)
    for i, m in enumerate(masks):
        mask_pack[i, 0, :m.shape[0]] = m
    assert len(sels) == 2
    return plan, mask_pack, sels


PLAN, _MASK_PACK_NP, _SEL_NPS = build_plan(28, 28)
_GAP_NVALID = [op for op in PLAN if op["kind"] == "gap"][0]["nvalid"]


# ---------------------------------------------------------------------------
# Fused kernel (fully unrolled per sample)
# ---------------------------------------------------------------------------
def make_kernel(plan):
    def kernel(x_ref, w_ref, gb_ref, gmat_ref, mask_ref, sel0_ref, sel1_ref,
               wf_ref, o_ref):
        act = x_ref[0]                                     # (CMAX, H0*W0) f32
        pooled = None
        for op in plan:
            kind = op["kind"]
            if kind == "conv":
                l, l_out, taps = op["layer"], op["l_out"], op["taps"]
                if len(taps) == 1:
                    # 1x1 conv: single small matmul, no stacking needed.
                    acc = jnp.dot(w_ref[l][:, :CMAX], act,
                                  preferred_element_type=jnp.float32)
                else:
                    # 3x3 conv as ONE K-stacked MXU matmul:
                    # rhs rows [t*CMAX + c] = channel c shifted by tap t.
                    rhs = jnp.concatenate(
                        [act[:, off:off + l_out] for off in taps], axis=0)
                    acc = jnp.dot(w_ref[l], rhs,
                                  preferred_element_type=jnp.float32)
                # GroupNorm over valid spatial positions only
                msk = mask_ref[op["mask"]][:, :l_out]                 # (1, L)
                am = acc * msk
                s1 = jnp.sum(am, axis=1, keepdims=True)               # (C, 1)
                s2 = jnp.sum(acc * am, axis=1, keepdims=True)         # (C, 1)
                g = gmat_ref[l]                                       # (C, C)
                mean = jnp.dot(g, s1, preferred_element_type=jnp.float32)
                ex2 = jnp.dot(g, s2, preferred_element_type=jnp.float32)
                scale = lax.rsqrt(jnp.maximum(ex2 - mean * mean, 0.0) + EPS) \
                    * gb_ref[2 * l]                                   # gamma * inv_std
                shift = gb_ref[2 * l + 1] - mean * scale              # beta - mean*scale
                act = jnp.maximum(acc * scale + shift, 0.0)           # GN + ReLU
            elif kind == "maxpool":
                o0, o1, o2, o3 = op["offs"]
                lo = op["l_out"]
                act = jnp.maximum(
                    jnp.maximum(act[:, o0:o0 + lo], act[:, o1:o1 + lo]),
                    jnp.maximum(act[:, o2:o2 + lo], act[:, o3:o3 + lo]))
            elif kind == "select":
                sel_ref = (sel0_ref, sel1_ref)[op["sel"]]
                act = jnp.dot(act, sel_ref[...],
                              preferred_element_type=jnp.float32)
            else:  # gap (the 1/16 average is folded into wf_ref on the host)
                msk = mask_ref[op["mask"]][:, :act.shape[1]]
                pooled = jnp.sum(act * msk, axis=1, keepdims=True)    # (C, 1)
        logits = jnp.dot(wf_ref[...], pooled,
                         preferred_element_type=jnp.float32)          # (nc, 1)
        o_ref[0] = logits.astype(o_ref.dtype)
    return kernel


# ---------------------------------------------------------------------------
# Parameter packing (host-side, once) and forward wrapper
# ---------------------------------------------------------------------------
def pack_params(blocks, w_final):
    conv_ops = [op for op in PLAN if op["kind"] == "conv"]
    nl = len(blocks)
    # Per layer: tap-stacked weight (cout, 9*cin) so a 3x3 conv is one matmul.
    wstack = np.zeros((nl, CMAX, MAX_TAPS * CMAX), np.float32)
    gbpack = np.zeros((nl * 2, CMAX, 1), np.float32)
    gmatpack = np.zeros((nl, CMAX, CMAX), np.float32)
    for l, (p, op) in enumerate(zip(blocks, conv_ops)):
        assert op["layer"] == l
        w = np.asarray(p["w"])                          # (k, k, cin, cout) HWIO
        k, _, cin, cout = w.shape
        for i in range(k):
            for j in range(k):
                t = i * k + j
                wstack[l, :cout, t * CMAX:t * CMAX + cin] = w[i, j].T
        gbpack[2 * l, :cout, 0] = np.asarray(p["gamma"])
        gbpack[2 * l + 1, :cout, 0] = np.asarray(p["beta"])
        gsize = cout // p["groups"]
        gid = np.arange(cout) // gsize
        same = (gid[:, None] == gid[None, :]).astype(np.float32)
        gmatpack[l, :cout, :cout] = same / float(op["nvalid"] * gsize)
    # Fold the GAP's 1/16 into the final 1x1-conv weight.
    wft = np.asarray(w_final).T.astype(np.float32) / float(_GAP_NVALID)
    return (jnp.asarray(wstack), jnp.asarray(gbpack), jnp.asarray(gmatpack),
            jnp.asarray(_MASK_PACK_NP), jnp.asarray(_SEL_NPS[0]),
            jnp.asarray(_SEL_NPS[1]), jnp.asarray(wft))


def model_forward(x_nchw, packed):
    wstack, gbpack, gmatpack, maskpack, sel0, sel1, wft = packed
    n, c0, h, w = x_nchw.shape
    nc = wft.shape[0]
    # Flatten spatial, zero-pad channels to CMAX (tiny host-side glue).
    x = x_nchw.reshape(n, c0, h * w).astype(jnp.float32)
    x = jnp.pad(x, ((0, 0), (0, CMAX - c0), (0, 0)))

    def const_spec(a):
        # Constant block index -> fetched into VMEM once, resident across grid.
        return pl.BlockSpec(a.shape, lambda b, _nd=a.ndim: (0,) * _nd)

    out = pl.pallas_call(
        make_kernel(PLAN),
        out_shape=jax.ShapeDtypeStruct((n, nc, 1), jnp.float32),
        grid=(n,),
        in_specs=[
            pl.BlockSpec((1, CMAX, h * w), lambda b: (b, 0, 0)),
            const_spec(wstack), const_spec(gbpack), const_spec(gmatpack),
            const_spec(maskpack), const_spec(sel0), const_spec(sel1),
            const_spec(wft),
        ],
        out_specs=pl.BlockSpec((1, nc, 1), lambda b: (b, 0, 0)),
        compiler_params=pltpu.CompilerParams(
            dimension_semantics=("parallel",)),
    )(x, wstack, gbpack, gmatpack, maskpack, sel0, sel1, wft)
    return out.reshape(n, nc)


# ---------------------------------------------------------------------------
# Deterministic synthetic params + pure-JAX reference (correctness check only)
# ---------------------------------------------------------------------------
def init_params(key, num_classes):
    blocks = []
    for cin, cout, k, pad in LAYER_CFGS:
        key, kw_, kg, kb = jax.random.split(key, 4)
        fan_in = cin * k * k
        w = jax.random.normal(kw_, (k, k, cin, cout), jnp.float32) * (2.0 / fan_in) ** 0.5
        gamma = 1.0 + 0.1 * jax.random.normal(kg, (cout,), jnp.float32)
        beta = 0.1 * jax.random.normal(kb, (cout,), jnp.float32)
        blocks.append(dict(w=w, gamma=gamma, beta=beta, pad=pad, groups=cout // 2))
    key, kf = jax.random.split(key)
    w_final = jax.random.normal(kf, (16, num_classes), jnp.float32) * 0.25
    return blocks, w_final


def reference_forward(x_nchw, blocks, w_final):
    x = jnp.transpose(x_nchw, (0, 2, 3, 1)).astype(jnp.float32)

    def conv_block(x, p):
        y = lax.conv_general_dilated(
            x, p["w"], window_strides=(1, 1),
            padding=[(p["pad"], p["pad"]), (p["pad"], p["pad"])],
            dimension_numbers=("NHWC", "HWIO", "NHWC"))
        n, h, w, c = y.shape
        g = p["groups"]
        gs = c // g
        yg = y.reshape(n, h, w, g, gs)
        mean = jnp.mean(yg, axis=(1, 2, 4), keepdims=True)
        var = jnp.mean((yg - mean) ** 2, axis=(1, 2, 4), keepdims=True)
        yn = ((yg - mean) / jnp.sqrt(var + EPS)).reshape(n, h, w, c)
        yn = yn * p["gamma"] + p["beta"]
        return jnp.maximum(yn, 0.0)

    def maxpool(x):
        return lax.reduce_window(x, -jnp.inf, lax.max,
                                 (1, 2, 2, 1), (1, 2, 2, 1), "VALID")

    for p in blocks[0:3]:
        x = conv_block(x, p)
    x = maxpool(x)
    for p in blocks[3:6]:
        x = conv_block(x, p)
    x = maxpool(x)
    for p in blocks[6:8]:
        x = conv_block(x, p)
    pooled = jnp.mean(x, axis=(1, 2))
    return pooled @ w_final


if __name__ == "__main__":
    num_classes = 10
    key = jax.random.PRNGKey(0)
    key, kx, kp = jax.random.split(key, 3)
    # 28x28 single-channel input (MNIST-like), as the architecture implies:
    # 28 -> block1 -> 24 -> pool -> 12 -> block2 -> 8 -> pool -> 4 -> block3 -> 4 -> gap -> 1
    x = jax.random.normal(kx, (2, 1, 28, 28), jnp.float32)   # NCHW like PyTorch
    blocks, w_final = init_params(kp, num_classes)
    packed = pack_params(blocks, w_final)

    fwd = jax.jit(lambda inp: model_forward(inp, packed))
    out = jax.block_until_ready(fwd(x))
    assert out.shape == (2, num_classes), out.shape

    ref = jax.block_until_ready(reference_forward(x, blocks, w_final))
    max_err = float(jnp.max(jnp.abs(out - ref)))
    assert jnp.allclose(out, ref, atol=2e-3, rtol=2e-3), max_err

    print("KERNEL_OK")
</pallas_src>

<mosaic_0001>
module attributes {stable_mosaic.version = 11 : i64} {
  func.func @kernel(%arg0: i32, %arg1: memref<1x16x784xf32, #tpu.memory_space<vmem>>, %arg2: memref<8x16x144xf32, #tpu.memory_space<vmem>>, %arg3: memref<16x16x1xf32, #tpu.memory_space<vmem>>, %arg4: memref<8x16x16xf32, #tpu.memory_space<vmem>>, %arg5: memref<9x1x726xf32, #tpu.memory_space<vmem>>, %arg6: memref<349x36xf32, #tpu.memory_space<vmem>>, %arg7: memref<22x36xf32, #tpu.memory_space<vmem>>, %arg8: memref<10x16xf32, #tpu.memory_space<vmem>>, %arg9: memref<1x10x1xf32, #tpu.memory_space<vmem>>) attributes {dimension_semantics = [#tpu.dimension_semantics<parallel>], iteration_bounds = array<i64: 2>, scalar_prefetch = 0 : i64, scratch_operands = 0 : i64, tpu.core_type = #tpu.core_type<tc>, window_params = [{transform_indices = @transform_0, window_bounds = array<i64: 1, 16, 784>}, {pipeline_mode = #tpu.pipeline_mode<synchronous>, transform_indices = @transform_1, window_bounds = array<i64: 8, 16, 144>}, {pipeline_mode = #tpu.pipeline_mode<synchronous>, transform_indices = @transform_2, window_bounds = array<i64: 16, 16, 1>}, {pipeline_mode = #tpu.pipeline_mode<synchronous>, transform_indices = @transform_3, window_bounds = array<i64: 8, 16, 16>}, {pipeline_mode = #tpu.pipeline_mode<synchronous>, transform_indices = @transform_4, window_bounds = array<i64: 9, 1, 726>}, {pipeline_mode = #tpu.pipeline_mode<synchronous>, transform_indices = @transform_5, window_bounds = array<i64: 349, 36>}, {pipeline_mode = #tpu.pipeline_mode<synchronous>, transform_indices = @transform_6, window_bounds = array<i64: 22, 36>}, {pipeline_mode = #tpu.pipeline_mode<synchronous>, transform_indices = @transform_7, window_bounds = array<i64: 10, 16>}, {transform_indices = @transform_8, window_bounds = array<i64: 1, 10, 1>}]} {
    %c0 = arith.constant 0 : index
    %c0_0 = arith.constant 0 : index
    %c0_1 = arith.constant 0 : index
    %0 = vector.load %arg1[%c0, %c0_0, %c0_1] : memref<1x16x784xf32, #tpu.memory_space<vmem>>, vector<1x16x784xf32>
    %1 = vector.shape_cast %0 : vector<1x16x784xf32> to vector<16x784xf32>
    %2 = vector.extract_strided_slice %1 {offsets = [0, 0], sizes = [16, 726], strides = [1, 1]} : vector<16x784xf32> to vector<16x726xf32>
    %3 = vector.extract_strided_slice %1 {offsets = [0, 1], sizes = [16, 726], strides = [1, 1]} : vector<16x784xf32> to vector<16x726xf32>
    %4 = vector.extract_strided_slice %1 {offsets = [0, 2], sizes = [16, 726], strides = [1, 1]} : vector<16x784xf32> to vector<16x726xf32>
    %5 = vector.extract_strided_slice %1 {offsets = [0, 28], sizes = [16, 726], strides = [1, 1]} : vector<16x784xf32> to vector<16x726xf32>
    %6 = vector.extract_strided_slice %1 {offsets = [0, 29], sizes = [16, 726], strides = [1, 1]} : vector<16x784xf32> to vector<16x726xf32>
    %7 = vector.extract_strided_slice %1 {offsets = [0, 30], sizes = [16, 726], strides = [1, 1]} : vector<16x784xf32> to vector<16x726xf32>
    %8 = vector.extract_strided_slice %1 {offsets = [0, 56], sizes = [16, 726], strides = [1, 1]} : vector<16x784xf32> to vector<16x726xf32>
    %9 = vector.extract_strided_slice %1 {offsets = [0, 57], sizes = [16, 726], strides = [1, 1]} : vector<16x784xf32> to vector<16x726xf32>
    %10 = vector.extract_strided_slice %1 {offsets = [0, 58], sizes = [16, 726], strides = [1, 1]} : vector<16x784xf32> to vector<16x726xf32>
    %11 = tpu.concatenate %2, %3, %4, %5, %6, %7, %8, %9, %10 in 0 : vector<16x726xf32>, vector<16x726xf32>, vector<16x726xf32>, vector<16x726xf32>, vector<16x726xf32>, vector<16x726xf32>, vector<16x726xf32>, vector<16x726xf32>, vector<16x726xf32> -> vector<144x726xf32>
    %c0_2 = arith.constant 0 : index
    %c0_3 = arith.constant 0 : index
    %c0_4 = arith.constant 0 : index
    %12 = vector.load %arg2[%c0_2, %c0_3, %c0_4] : memref<8x16x144xf32, #tpu.memory_space<vmem>>, vector<1x16x144xf32>
    %13 = vector.shape_cast %12 : vector<1x16x144xf32> to vector<16x144xf32>
    %cst = arith.constant dense<0.000000e+00> : vector<16x726xf32>
    %14 = tpu.matmul %13, %11, %cst {dimension_numbers = #tpu.dot_dimension_numbers<[1], [0], [0], [1], [0, 0, 1, 1], [], []>} : vector<16x144xf32>, vector<144x726xf32>, vector<16x726xf32> -> vector<16x726xf32>
    %c0_5 = arith.constant 0 : index
    %c0_6 = arith.constant 0 : index
    %c0_7 = arith.constant 0 : index
    %15 = vector.load %arg5[%c0_5, %c0_6, %c0_7] : memref<9x1x726xf32, #tpu.memory_space<vmem>>, vector<1x1x726xf32>
    %16 = vector.shape_cast %15 : vector<1x1x726xf32> to vector<1x726xf32>
    %17 = vector.broadcast %16 : vector<1x726xf32> to vector<16x726xf32>
    %18 = arith.mulf %14, %17 : vector<16x726xf32>
    %cst_8 = arith.constant dense<0.000000e+00> : vector<16xf32>
    %19 = vector.multi_reduction <add>, %18, %cst_8 [1] : vector<16x726xf32> to vector<16xf32>
    %20 = vector.shape_cast %19 : vector<16xf32> to vector<16x1xf32>
    %21 = arith.mulf %14, %18 : vector<16x726xf32>
    %cst_9 = arith.constant dense<0.000000e+00> : vector<16xf32>
    %22 = vector.multi_reduction <add>, %21, %cst_9 [1] : vector<16x726xf32> to vector<16xf32>
    %23 = vector.shape_cast %22 : vector<16xf32> to vector<16x1xf32>
    %c0_10 = arith.constant 0 : index
    %c0_11 = arith.constant 0 : index
    %c0_12 = arith.constant 0 : index
    %24 = vector.load %arg4[%c0_10, %c0_11, %c0_12] : memref<8x16x16xf32, #tpu.memory_space<vmem>>, vector<1x16x16xf32>
    %25 = vector.shape_cast %24 : vector<1x16x16xf32> to vector<16x16xf32>
    %cst_13 = arith.constant dense<0.000000e+00> : vector<16x1xf32>
    %26 = tpu.matmul %25, %20, %cst_13 {dimension_numbers = #tpu.dot_dimension_numbers<[1], [0], [0], [1], [0, 0, 1, 1], [], []>} : vector<16x16xf32>, vector<16x1xf32>, vector<16x1xf32> -> vector<16x1xf32>
    %cst_14 = arith.constant dense<0.000000e+00> : vector<16x1xf32>
    %27 = tpu.matmul %25, %23, %cst_14 {dimension_numbers = #tpu.dot_dimension_numbers<[1], [0], [0], [1], [0, 0, 1, 1], [], []>} : vector<16x16xf32>, vector<16x1xf32>, vector<16x1xf32> -> vector<16x1xf32>
    %28 = arith.mulf %26, %26 : vector<16x1xf32>
    %29 = arith.subf %27, %28 : vector<16x1xf32>
    %cst_15 = arith.constant 0.000000e+00 : f32
    %30 = vector.broadcast %cst_15 : f32 to vector<16x1xf32>
    %31 = arith.maximumf %29, %30 : vector<16x1xf32>
    %cst_16 = arith.constant 9.99999974E-6 : f32
    %32 = vector.broadcast %cst_16 : f32 to vector<16x1xf32>
    %33 = arith.addf %31, %32 : vector<16x1xf32>
    %34 = math.rsqrt %33 : vector<16x1xf32>
    %c0_17 = arith.constant 0 : index
    %c0_18 = arith.constant 0 : index
    %c0_19 = arith.constant 0 : index
    %35 = vector.load %arg3[%c0_17, %c0_18, %c0_19] : memref<16x16x1xf32, #tpu.memory_space<vmem>>, vector<1x16x1xf32>
    %36 = vector.shape_cast %35 : vector<1x16x1xf32> to vector<16x1xf32>
    %37 = arith.mulf %34, %36 : vector<16x1xf32>
    %c1 = arith.constant 1 : index
    %c0_20 = arith.constant 0 : index
    %c0_21 = arith.constant 0 : index
    %38 = vector.load %arg3[%c1, %c0_20, %c0_21] : memref<16x16x1xf32, #tpu.memory_space<vmem>>, vector<1x16x1xf32>
    %39 = vector.shape_cast %38 : vector<1x16x1xf32> to vector<16x1xf32>
    %40 = arith.mulf %26, %37 : vector<16x1xf32>
    %41 = arith.subf %39, %40 : vector<16x1xf32>
    %42 = vector.broadcast %37 : vector<16x1xf32> to vector<16x726xf32>
    %43 = arith.mulf %14, %42 : vector<16x726xf32>
    %44 = vector.broadcast %41 : vector<16x1xf32> to vector<16x726xf32>
    %45 = arith.addf %43, %44 : vector<16x726xf32>
    %cst_22 = arith.constant 0.000000e+00 : f32
    %46 = vector.broadcast %cst_22 : f32 to vector<16x726xf32>
    %47 = arith.maximumf %45, %46 : vector<16x726xf32>
    %48 = vector.extract_strided_slice %47 {offsets = [0, 0], sizes = [16, 668], strides = [1, 1]} : vector<16x726xf32> to vector<16x668xf32>
    %49 = vector.extract_strided_slice %47 {offsets = [0, 1], sizes = [16, 668], strides = [1, 1]} : vector<16x726xf32> to vector<16x668xf32>
    %50 = vector.extract_strided_slice %47 {offsets = [0, 2], sizes = [16, 668], strides = [1, 1]} : vector<16x726xf32> to vector<16x668xf32>
    %51 = vector.extract_strided_slice %47 {offsets = [0, 28], sizes = [16, 668], strides = [1, 1]} : vector<16x726xf32> to vector<16x668xf32>
    %52 = vector.extract_strided_slice %47 {offsets = [0, 29], sizes = [16, 668], strides = [1, 1]} : vector<16x726xf32> to vector<16x668xf32>
    %53 = vector.extract_strided_slice %47 {offsets = [0, 30], sizes = [16, 668], strides = [1, 1]} : vector<16x726xf32> to vector<16x668xf32>
    %54 = vector.extract_strided_slice %47 {offsets = [0, 56], sizes = [16, 668], strides = [1, 1]} : vector<16x726xf32> to vector<16x668xf32>
    %55 = vector.extract_strided_slice %47 {offsets = [0, 57], sizes = [16, 668], strides = [1, 1]} : vector<16x726xf32> to vector<16x668xf32>
    %56 = vector.extract_strided_slice %47 {offsets = [0, 58], sizes = [16, 668], strides = [1, 1]} : vector<16x726xf32> to vector<16x668xf32>
    %57 = tpu.concatenate %48, %49, %50, %51, %52, %53, %54, %55, %56 in 0 : vector<16x668xf32>, vector<16x668xf32>, vector<16x668xf32>, vector<16x668xf32>, vector<16x668xf32>, vector<16x668xf32>, vector<16x668xf32>, vector<16x668xf32>, vector<16x668xf32> -> vector<144x668xf32>
    %c1_23 = arith.constant 1 : index
    %c0_24 = arith.constant 0 : index
    %c0_25 = arith.constant 0 : index
    %58 = vector.load %arg2[%c1_23, %c0_24, %c0_25] : memref<8x16x144xf32, #tpu.memory_space<vmem>>, vector<1x16x144xf32>
    %59 = vector.shape_cast %58 : vector<1x16x144xf32> to vector<16x144xf32>
    %cst_26 = arith.constant dense<0.000000e+00> : vector<16x668xf32>
    %60 = tpu.matmul %59, %57, %cst_26 {dimension_numbers = #tpu.dot_dimension_numbers<[1], [0], [0], [1], [0, 0, 1, 1], [], []>} : vector<16x144xf32>, vector<144x668xf32>, vector<16x668xf32> -> vector<16x668xf32>
    %c1_27 = arith.constant 1 : index
    %c0_28 = arith.constant 0 : index
    %c0_29 = arith.constant 0 : index
    %61 = vector.load %arg5[%c1_27, %c0_28, %c0_29] : memref<9x1x726xf32, #tpu.memory_space<vmem>>, vector<1x1x726xf32>
    %62 = vector.shape_cast %61 : vector<1x1x726xf32> to vector<1x726xf32>
    %63 = vector.extract_strided_slice %62 {offsets = [0, 0], sizes = [1, 668], strides = [1, 1]} : vector<1x726xf32> to vector<1x668xf32>
    %64 = vector.broadcast %63 : vector<1x668xf32> to vector<16x668xf32>
    %65 = arith.mulf %60, %64 : vector<16x668xf32>
    %cst_30 = arith.constant dense<0.000000e+00> : vector<16xf32>
    %66 = vector.multi_reduction <add>, %65, %cst_30 [1] : vector<16x668xf32> to vector<16xf32>
    %67 = vector.shape_cast %66 : vector<16xf32> to vector<16x1xf32>
    %68 = arith.mulf %60, %65 : vector<16x668xf32>
    %cst_31 = arith.constant dense<0.000000e+00> : vector<16xf32>
    %69 = vector.multi_reduction <add>, %68, %cst_31 [1] : vector<16x668xf32> to vector<16xf32>
    %70 = vector.shape_cast %69 : vector<16xf32> to vector<16x1xf32>
    %c1_32 = arith.constant 1 : index
    %c0_33 = arith.constant 0 : index
    %c0_34 = arith.constant 0 : index
    %71 = vector.load %arg4[%c1_32, %c0_33, %c0_34] : memref<8x16x16xf32, #tpu.memory_space<vmem>>, vector<1x16x16xf32>
    %72 = vector.shape_cast %71 : vector<1x16x16xf32> to vector<16x16xf32>
    %cst_35 = arith.constant dense<0.000000e+00> : vector<16x1xf32>
    %73 = tpu.matmul %72, %67, %cst_35 {dimension_numbers = #tpu.dot_dimension_numbers<[1], [0], [0], [1], [0, 0, 1, 1], [], []>} : vector<16x16xf32>, vector<16x1xf32>, vector<16x1xf32> -> vector<16x1xf32>
    %cst_36 = arith.constant dense<0.000000e+00> : vector<16x1xf32>
    %74 = tpu.matmul %72, %70, %cst_36 {dimension_numbers = #tpu.dot_dimension_numbers<[1], [0], [0], [1], [0, 0, 1, 1], [], []>} : vector<16x16xf32>, vector<16x1xf32>, vector<16x1xf32> -> vector<16x1xf32>
    %75 = arith.mulf %73, %73 : vector<16x1xf32>
    %76 = arith.subf %74, %75 : vector<16x1xf32>
    %cst_37 = arith.constant 0.000000e+00 : f32
    %77 = vector.broadcast %cst_37 : f32 to vector<16x1xf32>
    %78 = arith.maximumf %76, %77 : vector<16x1xf32>
    %cst_38 = arith.constant 9.99999974E-6 : f32
    %79 = vector.broadcast %cst_38 : f32 to vector<16x1xf32>
    %80 = arith.addf %78, %79 : vector<16x1xf32>
    %81 = math.rsqrt %80 : vector<16x1xf32>
    %c2 = arith.constant 2 : index
    %c0_39 = arith.constant 0 : index
    %c0_40 = arith.constant 0 : index
    %82 = vector.load %arg3[%c2, %c0_39, %c0_40] : memref<16x16x1xf32, #tpu.memory_space<vmem>>, vector<1x16x1xf32>
    %83 = vector.shape_cast %82 : vector<1x16x1xf32> to vector<16x1xf32>
    %84 = arith.mulf %81, %83 : vector<16x1xf32>
    %c3 = arith.constant 3 : index
    %c0_41 = arith.constant 0 : index
    %c0_42 = arith.constant 0 : index
    %85 = vector.load %arg3[%c3, %c0_41, %c0_42] : memref<16x16x1xf32, #tpu.memory_space<vmem>>, vector<1x16x1xf32>
    %86 = vector.shape_cast %85 : vector<1x16x1xf32> to vector<16x1xf32>
    %87 = arith.mulf %73, %84 : vector<16x1xf32>
    %88 = arith.subf %86, %87 : vector<16x1xf32>
    %89 = vector.broadcast %84 : vector<16x1xf32> to vector<16x668xf32>
    %90 = arith.mulf %60, %89 : vector<16x668xf32>
    %91 = vector.broadcast %88 : vector<16x1xf32> to vector<16x668xf32>
    %92 = arith.addf %90, %91 : vector<16x668xf32>
    %cst_43 = arith.constant 0.000000e+00 : f32
    %93 = vector.broadcast %cst_43 : f32 to vector<16x668xf32>
    %94 = arith.maximumf %92, %93 : vector<16x668xf32>
    %c2_44 = arith.constant 2 : index
    %c0_45 = arith.constant 0 : index
    %c0_46 = arith.constant 0 : index
    %95 = vector.load %arg2[%c2_44, %c0_45, %c0_46] : memref<8x16x144xf32, #tpu.memory_space<vmem>>, vector<1x16x144xf32>
    %96 = vector.shape_cast %95 : vector<1x16x144xf32> to vector<16x144xf32>
    %97 = vector.extract_strided_slice %96 {offsets = [0, 0], sizes = [16, 16], strides = [1, 1]} : vector<16x144xf32> to vector<16x16xf32>
    %cst_47 = arith.constant dense<0.000000e+00> : vector<16x668xf32>
    %98 = tpu.matmul %97, %94, %cst_47 {dimension_numbers = #tpu.dot_dimension_numbers<[1], [0], [0], [1], [0, 0, 1, 1], [], []>} : vector<16x16xf32>, vector<16x668xf32>, vector<16x668xf32> -> vector<16x668xf32>
    %c2_48 = arith.constant 2 : index
    %c0_49 = arith.constant 0 : index
    %c0_50 = arith.constant 0 : index
    %99 = vector.load %arg5[%c2_48, %c0_49, %c0_50] : memref<9x1x726xf32, #tpu.memory_space<vmem>>, vector<1x1x726xf32>
    %100 = vector.shape_cast %99 : vector<1x1x726xf32> to vector<1x726xf32>
    %101 = vector.extract_strided_slice %100 {offsets = [0, 0], sizes = [1, 668], strides = [1, 1]} : vector<1x726xf32> to vector<1x668xf32>
    %102 = vector.broadcast %101 : vector<1x668xf32> to vector<16x668xf32>
    %103 = arith.mulf %98, %102 : vector<16x668xf32>
    %cst_51 = arith.constant dense<0.000000e+00> : vector<16xf32>
    %104 = vector.multi_reduction <add>, %103, %cst_51 [1] : vector<16x668xf32> to vector<16xf32>
    %105 = vector.shape_cast %104 : vector<16xf32> to vector<16x1xf32>
    %106 = arith.mulf %98, %103 : vector<16x668xf32>
    %cst_52 = arith.constant dense<0.000000e+00> : vector<16xf32>
    %107 = vector.multi_reduction <add>, %106, %cst_52 [1] : vector<16x668xf32> to vector<16xf32>
    %108 = vector.shape_cast %107 : vector<16xf32> to vector<16x1xf32>
    %c2_53 = arith.constant 2 : index
    %c0_54 = arith.constant 0 : index
    %c0_55 = arith.constant 0 : index
    %109 = vector.load %arg4[%c2_53, %c0_54, %c0_55] : memref<8x16x16xf32, #tpu.memory_space<vmem>>, vector<1x16x16xf32>
    %110 = vector.shape_cast %109 : vector<1x16x16xf32> to vector<16x16xf32>
    %cst_56 = arith.constant dense<0.000000e+00> : vector<16x1xf32>
    %111 = tpu.matmul %110, %105, %cst_56 {dimension_numbers = #tpu.dot_dimension_numbers<[1], [0], [0], [1], [0, 0, 1, 1], [], []>} : vector<16x16xf32>, vector<16x1xf32>, vector<16x1xf32> -> vector<16x1xf32>
    %cst_57 = arith.constant dense<0.000000e+00> : vector<16x1xf32>
    %112 = tpu.matmul %110, %108, %cst_57 {dimension_numbers = #tpu.dot_dimension_numbers<[1], [0], [0], [1], [0, 0, 1, 1], [], []>} : vector<16x16xf32>, vector<16x1xf32>, vector<16x1xf32> -> vector<16x1xf32>
    %113 = arith.mulf %111, %111 : vector<16x1xf32>
    %114 = arith.subf %112, %113 : vector<16x1xf32>
    %cst_58 = arith.constant 0.000000e+00 : f32
    %115 = vector.broadcast %cst_58 : f32 to vector<16x1xf32>
    %116 = arith.maximumf %114, %115 : vector<16x1xf32>
    %cst_59 = arith.constant 9.99999974E-6 : f32
    %117 = vector.broadcast %cst_59 : f32 to vector<16x1xf32>
    %118 = arith.addf %116, %117 : vector<16x1xf32>
    %119 = math.rsqrt %118 : vector<16x1xf32>
    %c4 = arith.constant 4 : index
    %c0_60 = arith.constant 0 : index
    %c0_61 = arith.constant 0 : index
    %120 = vector.load %arg3[%c4, %c0_60, %c0_61] : memref<16x16x1xf32, #tpu.memory_space<vmem>>, vector<1x16x1xf32>
    %121 = vector.shape_cast %120 : vector<1x16x1xf32> to vector<16x1xf32>
    %122 = arith.mulf %119, %121 : vector<16x1xf32>
    %c5 = arith.constant 5 : index
    %c0_62 = arith.constant 0 : index
    %c0_63 = arith.constant 0 : index
    %123 = vector.load %arg3[%c5, %c0_62, %c0_63] : memref<16x16x1xf32, #tpu.memory_space<vmem>>, vector<1x16x1xf32>
    %124 = vector.shape_cast %123 : vector<1x16x1xf32> to vector<16x1xf32>
    %125 = arith.mulf %111, %122 : vector<16x1xf32>
    %126 = arith.subf %124, %125 : vector<16x1xf32>
    %127 = vector.broadcast %122 : vector<16x1xf32> to vector<16x668xf32>
    %128 = arith.mulf %98, %127 : vector<16x668xf32>
    %129 = vector.broadcast %126 : vector<16x1xf32> to vector<16x668xf32>
    %130 = arith.addf %128, %129 : vector<16x668xf32>
    %cst_64 = arith.constant 0.000000e+00 : f32
    %131 = vector.broadcast %cst_64 : f32 to vector<16x668xf32>
    %132 = arith.maximumf %130, %131 : vector<16x668xf32>
    %133 = vector.extract_strided_slice %132 {offsets = [0, 0], sizes = [16, 639], strides = [1, 1]} : vector<16x668xf32> to vector<16x639xf32>
    %134 = vector.extract_strided_slice %132 {offsets = [0, 1], sizes = [16, 639], strides = [1, 1]} : vector<16x668xf32> to vector<16x639xf32>
    %135 = arith.maximumf %133, %134 : vector<16x639xf32>
    %136 = vector.extract_strided_slice %132 {offsets = [0, 28], sizes = [16, 639], strides = [1, 1]} : vector<16x668xf32> to vector<16x639xf32>
    %137 = vector.extract_strided_slice %132 {offsets = [0, 29], sizes = [16, 639], strides = [1, 1]} : vector<16x668xf32> to vector<16x639xf32>
    %138 = arith.maximumf %136, %137 : vector<16x639xf32>
    %139 = arith.maximumf %135, %138 : vector<16x639xf32>
    %140 = vector.extract_strided_slice %139 {offsets = [0, 0], sizes = [16, 523], strides = [1, 1]} : vector<16x639xf32> to vector<16x523xf32>
    %141 = vector.extract_strided_slice %139 {offsets = [0, 2], sizes = [16, 523], strides = [1, 1]} : vector<16x639xf32> to vector<16x523xf32>
    %142 = vector.extract_strided_slice %139 {offsets = [0, 4], sizes = [16, 523], strides = [1, 1]} : vector<16x639xf32> to vector<16x523xf32>
    %143 = vector.extract_strided_slice %139 {offsets = [0, 56], sizes = [16, 523], strides = [1, 1]} : vector<16x639xf32> to vector<16x523xf32>
    %144 = vector.extract_strided_slice %139 {offsets = [0, 58], sizes = [16, 523], strides = [1, 1]} : vector<16x639xf32> to vector<16x523xf32>
    %145 = vector.extract_strided_slice %139 {offsets = [0, 60], sizes = [16, 523], strides = [1, 1]} : vector<16x639xf32> to vector<16x523xf32>
    %146 = vector.extract_strided_slice %139 {offsets = [0, 112], sizes = [16, 523], strides = [1, 1]} : vector<16x639xf32> to vector<16x523xf32>
    %147 = vector.extract_strided_slice %139 {offsets = [0, 114], sizes = [16, 523], strides = [1, 1]} : vector<16x639xf32> to vector<16x523xf32>
    %148 = vector.extract_strided_slice %139 {offsets = [0, 116], sizes = [16, 523], strides = [1, 1]} : vector<16x639xf32> to vector<16x523xf32>
    %149 = tpu.concatenate %140, %141, %142, %143, %144, %145, %146, %147, %148 in 0 : vector<16x523xf32>, vector<16x523xf32>, vector<16x523xf32>, vector<16x523xf32>, vector<16x523xf32>, vector<16x523xf32>, vector<16x523xf32>, vector<16x523xf32>, vector<16x523xf32> -> vector<144x523xf32>
    %c3_65 = arith.constant 3 : index
    %c0_66 = arith.constant 0 : index
    %c0_67 = arith.constant 0 : index
    %150 = vector.load %arg2[%c3_65, %c0_66, %c0_67] : memref<8x16x144xf32, #tpu.memory_space<vmem>>, vector<1x16x144xf32>
    %151 = vector.shape_cast %150 : vector<1x16x144xf32> to vector<16x144xf32>
    %cst_68 = arith.constant dense<0.000000e+00> : vector<16x523xf32>
    %152 = tpu.matmul %151, %149, %cst_68 {dimension_numbers = #tpu.dot_dimension_numbers<[1], [0], [0], [1], [0, 0, 1, 1], [], []>} : vector<16x144xf32>, vector<144x523xf32>, vector<16x523xf32> -> vector<16x523xf32>
    %c3_69 = arith.constant 3 : index
    %c0_70 = arith.constant 0 : index
    %c0_71 = arith.constant 0 : index
    %153 = vector.load %arg5[%c3_69, %c0_70, %c0_71] : memref<9x1x726xf32, #tpu.memory_space<vmem>>, vector<1x1x726xf32>
    %154 = vector.shape_cast %153 : vector<1x1x726xf32> to vector<1x726xf32>
    %155 = vector.extract_strided_slice %154 {offsets = [0, 0], sizes = [1, 523], strides = [1, 1]} : vector<1x726xf32> to vector<1x523xf32>
    %156 = vector.broadcast %155 : vector<1x523xf32> to vector<16x523xf32>
    %157 = arith.mulf %152, %156 : vector<16x523xf32>
    %cst_72 = arith.constant dense<0.000000e+00> : vector<16xf32>
    %158 = vector.multi_reduction <add>, %157, %cst_72 [1] : vector<16x523xf32> to vector<16xf32>
    %159 = vector.shape_cast %158 : vector<16xf32> to vector<16x1xf32>
    %160 = arith.mulf %152, %157 : vector<16x523xf32>
    %cst_73 = arith.constant dense<0.000000e+00> : vector<16xf32>
    %161 = vector.multi_reduction <add>, %160, %cst_73 [1] : vector<16x523xf32> to vector<16xf32>
    %162 = vector.shape_cast %161 : vector<16xf32> to vector<16x1xf32>
    %c3_74 = arith.constant 3 : index
    %c0_75 = arith.constant 0 : index
    %c0_76 = arith.constant 0 : index
    %163 = vector.load %arg4[%c3_74, %c0_75, %c0_76] : memref<8x16x16xf32, #tpu.memory_space<vmem>>, vector<1x16x16xf32>
    %164 = vector.shape_cast %163 : vector<1x16x16xf32> to vector<16x16xf32>
    %cst_77 = arith.constant dense<0.000000e+00> : vector<16x1xf32>
    %165 = tpu.matmul %164, %159, %cst_77 {dimension_numbers = #tpu.dot_dimension_numbers<[1], [0], [0], [1], [0, 0, 1, 1], [], []>} : vector<16x16xf32>, vector<16x1xf32>, vector<16x1xf32> -> vector<16x1xf32>
    %cst_78 = arith.constant dense<0.000000e+00> : vector<16x1xf32>
    %166 = tpu.matmul %164, %162, %cst_78 {dimension_numbers = #tpu.dot_dimension_numbers<[1], [0], [0], [1], [0, 0, 1, 1], [], []>} : vector<16x16xf32>, vector<16x1xf32>, vector<16x1xf32> -> vector<16x1xf32>
    %167 = arith.mulf %165, %165 : vector<16x1xf32>
    %168 = arith.subf %166, %167 : vector<16x1xf32>
    %cst_79 = arith.constant 0.000000e+00 : f32
    %169 = vector.broadcast %cst_79 : f32 to vector<16x1xf32>
    %170 = arith.maximumf %168, %169 : vector<16x1xf32>
    %cst_80 = arith.constant 9.99999974E-6 : f32
    %171 = vector.broadcast %cst_80 : f32 to vector<16x1xf32>
    %172 = arith.addf %170, %171 : vector<16x1xf32>
    %173 = math.rsqrt %172 : vector<16x1xf32>
    %c6 = arith.constant 6 : index
    %c0_81 = arith.constant 0 : index
    %c0_82 = arith.constant 0 : index
    %174 = vector.load %arg3[%c6, %c0_81, %c0_82] : memref<16x16x1xf32, #tpu.memory_space<vmem>>, vector<1x16x1xf32>
    %175 = vector.shape_cast %174 : vector<1x16x1xf32> to vector<16x1xf32>
    %176 = arith.mulf %173, %175 : vector<16x1xf32>
    %c7 = arith.constant 7 : index
    %c0_83 = arith.constant 0 : index
    %c0_84 = arith.constant 0 : index
    %177 = vector.load %arg3[%c7, %c0_83, %c0_84] : memref<16x16x1xf32, #tpu.memory_space<vmem>>, vector<1x16x1xf32>
    %178 = vector.shape_cast %177 : vector<1x16x1xf32> to vector<16x1xf32>
    %179 = arith.mulf %165, %176 : vector<16x1xf32>
    %180 = arith.subf %178, %179 : vector<16x1xf32>
    %181 = vector.broadcast %176 : vector<16x1xf32> to vector<16x523xf32>
    %182 = arith.mulf %152, %181 : vector<16x523xf32>
    %183 = vector.broadcast %180 : vector<16x1xf32> to vector<16x523xf32>
    %184 = arith.addf %182, %183 : vector<16x523xf32>
    %cst_85 = arith.constant 0.000000e+00 : f32
    %185 = vector.broadcast %cst_85 : f32 to vector<16x523xf32>
    %186 = arith.maximumf %184, %185 : vector<16x523xf32>
    %187 = vector.extract_strided_slice %186 {offsets = [0, 0], sizes = [16, 407], strides = [1, 1]} : vector<16x523xf32> to vector<16x407xf32>
    %188 = vector.extract_strided_slice %186 {offsets = [0, 2], sizes = [16, 407], strides = [1, 1]} : vector<16x523xf32> to vector<16x407xf32>
    %189 = vector.extract_strided_slice %186 {offsets = [0, 4], sizes = [16, 407], strides = [1, 1]} : vector<16x523xf32> to vector<16x407xf32>
    %190 = vector.extract_strided_slice %186 {offsets = [0, 56], sizes = [16, 407], strides = [1, 1]} : vector<16x523xf32> to vector<16x407xf32>
    %191 = vector.extract_strided_slice %186 {offsets = [0, 58], sizes = [16, 407], strides = [1, 1]} : vector<16x523xf32> to vector<16x407xf32>
    %192 = vector.extract_strided_slice %186 {offsets = [0, 60], sizes = [16, 407], strides = [1, 1]} : vector<16x523xf32> to vector<16x407xf32>
    %193 = vector.extract_strided_slice %186 {offsets = [0, 112], sizes = [16, 407], strides = [1, 1]} : vector<16x523xf32> to vector<16x407xf32>
    %194 = vector.extract_strided_slice %186 {offsets = [0, 114], sizes = [16, 407], strides = [1, 1]} : vector<16x523xf32> to vector<16x407xf32>
    %195 = vector.extract_strided_slice %186 {offsets = [0, 116], sizes = [16, 407], strides = [1, 1]} : vector<16x523xf32> to vector<16x407xf32>
    %196 = tpu.concatenate %187, %188, %189, %190, %191, %192, %193, %194, %195 in 0 : vector<16x407xf32>, vector<16x407xf32>, vector<16x407xf32>, vector<16x407xf32>, vector<16x407xf32>, vector<16x407xf32>, vector<16x407xf32>, vector<16x407xf32>, vector<16x407xf32> -> vector<144x407xf32>
    %c4_86 = arith.constant 4 : index
    %c0_87 = arith.constant 0 : index
    %c0_88 = arith.constant 0 : index
    %197 = vector.load %arg2[%c4_86, %c0_87, %c0_88] : memref<8x16x144xf32, #tpu.memory_space<vmem>>, vector<1x16x144xf32>
    %198 = vector.shape_cast %197 : vector<1x16x144xf32> to vector<16x144xf32>
    %cst_89 = arith.constant dense<0.000000e+00> : vector<16x407xf32>
    %199 = tpu.matmul %198, %196, %cst_89 {dimension_numbers = #tpu.dot_dimension_numbers<[1], [0], [0], [1], [0, 0, 1, 1], [], []>} : vector<16x144xf32>, vector<144x407xf32>, vector<16x407xf32> -> vector<16x407xf32>
    %c4_90 = arith.constant 4 : index
    %c0_91 = arith.constant 0 : index
    %c0_92 = arith.constant 0 : index
    %200 = vector.load %arg5[%c4_90, %c0_91, %c0_92] : memref<9x1x726xf32, #tpu.memory_space<vmem>>, vector<1x1x726xf32>
    %201 = vector.shape_cast %200 : vector<1x1x726xf32> to vector<1x726xf32>
    %202 = vector.extract_strided_slice %201 {offsets = [0, 0], sizes = [1, 407], strides = [1, 1]} : vector<1x726xf32> to vector<1x407xf32>
    %203 = vector.broadcast %202 : vector<1x407xf32> to vector<16x407xf32>
    %204 = arith.mulf %199, %203 : vector<16x407xf32>
    %cst_93 = arith.constant dense<0.000000e+00> : vector<16xf32>
    %205 = vector.multi_reduction <add>, %204, %cst_93 [1] : vector<16x407xf32> to vector<16xf32>
    %206 = vector.shape_cast %205 : vector<16xf32> to vector<16x1xf32>
    %207 = arith.mulf %199, %204 : vector<16x407xf32>
    %cst_94 = arith.constant dense<0.000000e+00> : vector<16xf32>
    %208 = vector.multi_reduction <add>, %207, %cst_94 [1] : vector<16x407xf32> to vector<16xf32>
    %209 = vector.shape_cast %208 : vector<16xf32> to vector<16x1xf32>
    %c4_95 = arith.constant 4 : index
    %c0_96 = arith.constant 0 : index
    %c0_97 = arith.constant 0 : index
    %210 = vector.load %arg4[%c4_95, %c0_96, %c0_97] : memref<8x16x16xf32, #tpu.memory_space<vmem>>, vector<1x16x16xf32>
    %211 = vector.shape_cast %210 : vector<1x16x16xf32> to vector<16x16xf32>
    %cst_98 = arith.constant dense<0.000000e+00> : vector<16x1xf32>
    %212 = tpu.matmul %211, %206, %cst_98 {dimension_numbers = #tpu.dot_dimension_numbers<[1], [0], [0], [1], [0, 0, 1, 1], [], []>} : vector<16x16xf32>, vector<16x1xf32>, vector<16x1xf32> -> vector<16x1xf32>
    %cst_99 = arith.constant dense<0.000000e+00> : vector<16x1xf32>
    %213 = tpu.matmul %211, %209, %cst_99 {dimension_numbers = #tpu.dot_dimension_numbers<[1], [0], [0], [1], [0, 0, 1, 1], [], []>} : vector<16x16xf32>, vector<16x1xf32>, vector<16x1xf32> -> vector<16x1xf32>
    %214 = arith.mulf %212, %212 : vector<16x1xf32>
    %215 = arith.subf %213, %214 : vector<16x1xf32>
    %cst_100 = arith.constant 0.000000e+00 : f32
    %216 = vector.broadcast %cst_100 : f32 to vector<16x1xf32>
    %217 = arith.maximumf %215, %216 : vector<16x1xf32>
    %cst_101 = arith.constant 9.99999974E-6 : f32
    %218 = vector.broadcast %cst_101 : f32 to vector<16x1xf32>
    %219 = arith.addf %217, %218 : vector<16x1xf32>
    %220 = math.rsqrt %219 : vector<16x1xf32>
    %c8 = arith.constant 8 : index
    %c0_102 = arith.constant 0 : index
    %c0_103 = arith.constant 0 : index
    %221 = vector.load %arg3[%c8, %c0_102, %c0_103] : memref<16x16x1xf32, #tpu.memory_space<vmem>>, vector<1x16x1xf32>
    %222 = vector.shape_cast %221 : vector<1x16x1xf32> to vector<16x1xf32>
    %223 = arith.mulf %220, %222 : vector<16x1xf32>
    %c9 = arith.constant 9 : index
    %c0_104 = arith.constant 0 : index
    %c0_105 = arith.constant 0 : index
    %224 = vector.load %arg3[%c9, %c0_104, %c0_105] : memref<16x16x1xf32, #tpu.memory_space<vmem>>, vector<1x16x1xf32>
    %225 = vector.shape_cast %224 : vector<1x16x1xf32> to vector<16x1xf32>
    %226 = arith.mulf %212, %223 : vector<16x1xf32>
    %227 = arith.subf %225, %226 : vector<16x1xf32>
    %228 = vector.broadcast %223 : vector<16x1xf32> to vector<16x407xf32>
    %229 = arith.mulf %199, %228 : vector<16x407xf32>
    %230 = vector.broadcast %227 : vector<16x1xf32> to vector<16x407xf32>
    %231 = arith.addf %229, %230 : vector<16x407xf32>
    %cst_106 = arith.constant 0.000000e+00 : f32
    %232 = vector.broadcast %cst_106 : f32 to vector<16x407xf32>
    %233 = arith.maximumf %231, %232 : vector<16x407xf32>
    %c5_107 = arith.constant 5 : index
    %c0_108 = arith.constant 0 : index
    %c0_109 = arith.constant 0 : index
    %234 = vector.load %arg2[%c5_107, %c0_108, %c0_109] : memref<8x16x144xf32, #tpu.memory_space<vmem>>, vector<1x16x144xf32>
    %235 = vector.shape_cast %234 : vector<1x16x144xf32> to vector<16x144xf32>
    %236 = vector.extract_strided_slice %235 {offsets = [0, 0], sizes = [16, 16], strides = [1, 1]} : vector<16x144xf32> to vector<16x16xf32>
    %cst_110 = arith.constant dense<0.000000e+00> : vector<16x407xf32>
    %237 = tpu.matmul %236, %233, %cst_110 {dimension_numbers = #tpu.dot_dimension_numbers<[1], [0], [0], [1], [0, 0, 1, 1], [], []>} : vector<16x16xf32>, vector<16x407xf32>, vector<16x407xf32> -> vector<16x407xf32>
    %c5_111 = arith.constant 5 : index
    %c0_112 = arith.constant 0 : index
    %c0_113 = arith.constant 0 : index
    %238 = vector.load %arg5[%c5_111, %c0_112, %c0_113] : memref<9x1x726xf32, #tpu.memory_space<vmem>>, vector<1x1x726xf32>
    %239 = vector.shape_cast %238 : vector<1x1x726xf32> to vector<1x726xf32>
    %240 = vector.extract_strided_slice %239 {offsets = [0, 0], sizes = [1, 407], strides = [1, 1]} : vector<1x726xf32> to vector<1x407xf32>
    %241 = vector.broadcast %240 : vector<1x407xf32> to vector<16x407xf32>
    %242 = arith.mulf %237, %241 : vector<16x407xf32>
    %cst_114 = arith.constant dense<0.000000e+00> : vector<16xf32>
    %243 = vector.multi_reduction <add>, %242, %cst_114 [1] : vector<16x407xf32> to vector<16xf32>
    %244 = vector.shape_cast %243 : vector<16xf32> to vector<16x1xf32>
    %245 = arith.mulf %237, %242 : vector<16x407xf32>
    %cst_115 = arith.constant dense<0.000000e+00> : vector<16xf32>
    %246 = vector.multi_reduction <add>, %245, %cst_115 [1] : vector<16x407xf32> to vector<16xf32>
    %247 = vector.shape_cast %246 : vector<16xf32> to vector<16x1xf32>
    %c5_116 = arith.constant 5 : index
    %c0_117 = arith.constant 0 : index
    %c0_118 = arith.constant 0 : index
    %248 = vector.load %arg4[%c5_116, %c0_117, %c0_118] : memref<8x16x16xf32, #tpu.memory_space<vmem>>, vector<1x16x16xf32>
    %249 = vector.shape_cast %248 : vector<1x16x16xf32> to vector<16x16xf32>
    %cst_119 = arith.constant dense<0.000000e+00> : vector<16x1xf32>
    %250 = tpu.matmul %249, %244, %cst_119 {dimension_numbers = #tpu.dot_dimension_numbers<[1], [0], [0], [1], [0, 0, 1, 1], [], []>} : vector<16x16xf32>, vector<16x1xf32>, vector<16x1xf32> -> vector<16x1xf32>
    %cst_120 = arith.constant dense<0.000000e+00> : vector<16x1xf32>
    %251 = tpu.matmul %249, %247, %cst_120 {dimension_numbers = #tpu.dot_dimension_numbers<[1], [0], [0], [1], [0, 0, 1, 1], [], []>} : vector<16x16xf32>, vector<16x1xf32>, vector<16x1xf32> -> vector<16x1xf32>
    %252 = arith.mulf %250, %250 : vector<16x1xf32>
    %253 = arith.subf %251, %252 : vector<16x1xf32>
    %cst_121 = arith.constant 0.000000e+00 : f32
    %254 = vector.broadcast %cst_121 : f32 to vector<16x1xf32>
    %255 = arith.maximumf %253, %254 : vector<16x1xf32>
    %cst_122 = arith.constant 9.99999974E-6 : f32
    %256 = vector.broadcast %cst_122 : f32 to vector<16x1xf32>
    %257 = arith.addf %255, %256 : vector<16x1xf32>
    %258 = math.rsqrt %257 : vector<16x1xf32>
    %c10 = arith.constant 10 : index
    %c0_123 = arith.constant 0 : index
    %c0_124 = arith.constant 0 : index
    %259 = vector.load %arg3[%c10, %c0_123, %c0_124] : memref<16x16x1xf32, #tpu.memory_space<vmem>>, vector<1x16x1xf32>
    %260 = vector.shape_cast %259 : vector<1x16x1xf32> to vector<16x1xf32>
    %261 = arith.mulf %258, %260 : vector<16x1xf32>
    %c11 = arith.constant 11 : index
    %c0_125 = arith.constant 0 : index
    %c0_126 = arith.constant 0 : index
    %262 = vector.load %arg3[%c11, %c0_125, %c0_126] : memref<16x16x1xf32, #tpu.memory_space<vmem>>, vector<1x16x1xf32>
    %263 = vector.shape_cast %262 : vector<1x16x1xf32> to vector<16x1xf32>
    %264 = arith.mulf %250, %261 : vector<16x1xf32>
    %265 = arith.subf %263, %264 : vector<16x1xf32>
    %266 = vector.broadcast %261 : vector<16x1xf32> to vector<16x407xf32>
    %267 = arith.mulf %237, %266 : vector<16x407xf32>
    %268 = vector.broadcast %265 : vector<16x1xf32> to vector<16x407xf32>
    %269 = arith.addf %267, %268 : vector<16x407xf32>
    %cst_127 = arith.constant 0.000000e+00 : f32
    %270 = vector.broadcast %cst_127 : f32 to vector<16x407xf32>
    %271 = arith.maximumf %269, %270 : vector<16x407xf32>
    %272 = vector.extract_strided_slice %271 {offsets = [0, 0], sizes = [16, 349], strides = [1, 1]} : vector<16x407xf32> to vector<16x349xf32>
    %273 = vector.extract_strided_slice %271 {offsets = [0, 2], sizes = [16, 349], strides = [1, 1]} : vector<16x407xf32> to vector<16x349xf32>
    %274 = arith.maximumf %272, %273 : vector<16x349xf32>
    %275 = vector.extract_strided_slice %271 {offsets = [0, 56], sizes = [16, 349], strides = [1, 1]} : vector<16x407xf32> to vector<16x349xf32>
    %276 = vector.extract_strided_slice %271 {offsets = [0, 58], sizes = [16, 349], strides = [1, 1]} : vector<16x407xf32> to vector<16x349xf32>
    %277 = arith.maximumf %275, %276 : vector<16x349xf32>
    %278 = arith.maximumf %274, %277 : vector<16x349xf32>
    %c0_128 = arith.constant 0 : index
    %c0_129 = arith.constant 0 : index
    %279 = vector.load %arg6[%c0_128, %c0_129] : memref<349x36xf32, #tpu.memory_space<vmem>>, vector<349x36xf32>
    %cst_130 = arith.constant dense<0.000000e+00> : vector<16x36xf32>
    %280 = tpu.matmul %278, %279, %cst_130 {dimension_numbers = #tpu.dot_dimension_numbers<[1], [0], [0], [1], [0, 0, 1, 1], [], []>} : vector<16x349xf32>, vector<349x36xf32>, vector<16x36xf32> -> vector<16x36xf32>
    %281 = vector.extract_strided_slice %280 {offsets = [0, 0], sizes = [16, 22], strides = [1, 1]} : vector<16x36xf32> to vector<16x22xf32>
    %282 = vector.extract_strided_slice %280 {offsets = [0, 1], sizes = [16, 22], strides = [1, 1]} : vector<16x36xf32> to vector<16x22xf32>
    %283 = vector.extract_strided_slice %280 {offsets = [0, 2], sizes = [16, 22], strides = [1, 1]} : vector<16x36xf32> to vector<16x22xf32>
    %284 = vector.extract_strided_slice %280 {offsets = [0, 6], sizes = [16, 22], strides = [1, 1]} : vector<16x36xf32> to vector<16x22xf32>
    %285 = vector.extract_strided_slice %280 {offsets = [0, 7], sizes = [16, 22], strides = [1, 1]} : vector<16x36xf32> to vector<16x22xf32>
    %286 = vector.extract_strided_slice %280 {offsets = [0, 8], sizes = [16, 22], strides = [1, 1]} : vector<16x36xf32> to vector<16x22xf32>
    %287 = vector.extract_strided_slice %280 {offsets = [0, 12], sizes = [16, 22], strides = [1, 1]} : vector<16x36xf32> to vector<16x22xf32>
    %288 = vector.extract_strided_slice %280 {offsets = [0, 13], sizes = [16, 22], strides = [1, 1]} : vector<16x36xf32> to vector<16x22xf32>
    %289 = vector.extract_strided_slice %280 {offsets = [0, 14], sizes = [16, 22], strides = [1, 1]} : vector<16x36xf32> to vector<16x22xf32>
    %290 = tpu.concatenate %281, %282, %283, %284, %285, %286, %287, %288, %289 in 0 : vector<16x22xf32>, vector<16x22xf32>, vector<16x22xf32>, vector<16x22xf32>, vector<16x22xf32>, vector<16x22xf32>, vector<16x22xf32>, vector<16x22xf32>, vector<16x22xf32> -> vector<144x22xf32>
    %c6_131 = arith.constant 6 : index
    %c0_132 = arith.constant 0 : index
    %c0_133 = arith.constant 0 : index
    %291 = vector.load %arg2[%c6_131, %c0_132, %c0_133] : memref<8x16x144xf32, #tpu.memory_space<vmem>>, vector<1x16x144xf32>
    %292 = vector.shape_cast %291 : vector<1x16x144xf32> to vector<16x144xf32>
    %cst_134 = arith.constant dense<0.000000e+00> : vector<16x22xf32>
    %293 = tpu.matmul %292, %290, %cst_134 {dimension_numbers = #tpu.dot_dimension_numbers<[1], [0], [0], [1], [0, 0, 1, 1], [], []>} : vector<16x144xf32>, vector<144x22xf32>, vector<16x22xf32> -> vector<16x22xf32>
    %c6_135 = arith.constant 6 : index
    %c0_136 = arith.constant 0 : index
    %c0_137 = arith.constant 0 : index
    %294 = vector.load %arg5[%c6_135, %c0_136, %c0_137] : memref<9x1x726xf32, #tpu.memory_space<vmem>>, vector<1x1x726xf32>
    %295 = vector.shape_cast %294 : vector<1x1x726xf32> to vector<1x726xf32>
    %296 = vector.extract_strided_slice %295 {offsets = [0, 0], sizes = [1, 22], strides = [1, 1]} : vector<1x726xf32> to vector<1x22xf32>
    %297 = vector.broadcast %296 : vector<1x22xf32> to vector<16x22xf32>
    %298 = arith.mulf %293, %297 : vector<16x22xf32>
    %cst_138 = arith.constant dense<0.000000e+00> : vector<16xf32>
    %299 = vector.multi_reduction <add>, %298, %cst_138 [1] : vector<16x22xf32> to vector<16xf32>
    %300 = vector.shape_cast %299 : vector<16xf32> to vector<16x1xf32>
    %301 = arith.mulf %293, %298 : vector<16x22xf32>
    %cst_139 = arith.constant dense<0.000000e+00> : vector<16xf32>
    %302 = vector.multi_reduction <add>, %301, %cst_139 [1] : vector<16x22xf32> to vector<16xf32>
    %303 = vector.shape_cast %302 : vector<16xf32> to vector<16x1xf32>
    %c6_140 = arith.constant 6 : index
    %c0_141 = arith.constant 0 : index
    %c0_142 = arith.constant 0 : index
    %304 = vector.load %arg4[%c6_140, %c0_141, %c0_142] : memref<8x16x16xf32, #tpu.memory_space<vmem>>, vector<1x16x16xf32>
    %305 = vector.shape_cast %304 : vector<1x16x16xf32> to vector<16x16xf32>
    %cst_143 = arith.constant dense<0.000000e+00> : vector<16x1xf32>
    %306 = tpu.matmul %305, %300, %cst_143 {dimension_numbers = #tpu.dot_dimension_numbers<[1], [0], [0], [1], [0, 0, 1, 1], [], []>} : vector<16x16xf32>, vector<16x1xf32>, vector<16x1xf32> -> vector<16x1xf32>
    %cst_144 = arith.constant dense<0.000000e+00> : vector<16x1xf32>
    %307 = tpu.matmul %305, %303, %cst_144 {dimension_numbers = #tpu.dot_dimension_numbers<[1], [0], [0], [1], [0, 0, 1, 1], [], []>} : vector<16x16xf32>, vector<16x1xf32>, vector<16x1xf32> -> vector<16x1xf32>
    %308 = arith.mulf %306, %306 : vector<16x1xf32>
    %309 = arith.subf %307, %308 : vector<16x1xf32>
    %cst_145 = arith.constant 0.000000e+00 : f32
    %310 = vector.broadcast %cst_145 : f32 to vector<16x1xf32>
    %311 = arith.maximumf %309, %310 : vector<16x1xf32>
    %cst_146 = arith.constant 9.99999974E-6 : f32
    %312 = vector.broadcast %cst_146 : f32 to vector<16x1xf32>
    %313 = arith.addf %311, %312 : vector<16x1xf32>
    %314 = math.rsqrt %313 : vector<16x1xf32>
    %c12 = arith.constant 12 : index
    %c0_147 = arith.constant 0 : index
    %c0_148 = arith.constant 0 : index
    %315 = vector.load %arg3[%c12, %c0_147, %c0_148] : memref<16x16x1xf32, #tpu.memory_space<vmem>>, vector<1x16x1xf32>
    %316 = vector.shape_cast %315 : vector<1x16x1xf32> to vector<16x1xf32>
    %317 = arith.mulf %314, %316 : vector<16x1xf32>
    %c13 = arith.constant 13 : index
    %c0_149 = arith.constant 0 : index
    %c0_150 = arith.constant 0 : index
    %318 = vector.load %arg3[%c13, %c0_149, %c0_150] : memref<16x16x1xf32, #tpu.memory_space<vmem>>, vector<1x16x1xf32>
    %319 = vector.shape_cast %318 : vector<1x16x1xf32> to vector<16x1xf32>
    %320 = arith.mulf %306, %317 : vector<16x1xf32>
    %321 = arith.subf %319, %320 : vector<16x1xf32>
    %322 = vector.broadcast %317 : vector<16x1xf32> to vector<16x22xf32>
    %323 = arith.mulf %293, %322 : vector<16x22xf32>
    %324 = vector.broadcast %321 : vector<16x1xf32> to vector<16x22xf32>
    %325 = arith.addf %323, %324 : vector<16x22xf32>
    %cst_151 = arith.constant 0.000000e+00 : f32
    %326 = vector.broadcast %cst_151 : f32 to vector<16x22xf32>
    %327 = arith.maximumf %325, %326 : vector<16x22xf32>
    %c0_152 = arith.constant 0 : index
    %c0_153 = arith.constant 0 : index
    %328 = vector.load %arg7[%c0_152, %c0_153] : memref<22x36xf32, #tpu.memory_space<vmem>>, vector<22x36xf32>
    %cst_154 = arith.constant dense<0.000000e+00> : vector<16x36xf32>
    %329 = tpu.matmul %327, %328, %cst_154 {dimension_numbers = #tpu.dot_dimension_numbers<[1], [0], [0], [1], [0, 0, 1, 1], [], []>} : vector<16x22xf32>, vector<22x36xf32>, vector<16x36xf32> -> vector<16x36xf32>
    %330 = vector.extract_strided_slice %329 {offsets = [0, 0], sizes = [16, 22], strides = [1, 1]} : vector<16x36xf32> to vector<16x22xf32>
    %331 = vector.extract_strided_slice %329 {offsets = [0, 1], sizes = [16, 22], strides = [1, 1]} : vector<16x36xf32> to vector<16x22xf32>
    %332 = vector.extract_strided_slice %329 {offsets = [0, 2], sizes = [16, 22], strides = [1, 1]} : vector<16x36xf32> to vector<16x22xf32>
    %333 = vector.extract_strided_slice %329 {offsets = [0, 6], sizes = [16, 22], strides = [1, 1]} : vector<16x36xf32> to vector<16x22xf32>
    %334 = vector.extract_strided_slice %329 {offsets = [0, 7], sizes = [16, 22], strides = [1, 1]} : vector<16x36xf32> to vector<16x22xf32>
    %335 = vector.extract_strided_slice %329 {offsets = [0, 8], sizes = [16, 22], strides = [1, 1]} : vector<16x36xf32> to vector<16x22xf32>
    %336 = vector.extract_strided_slice %329 {offsets = [0, 12], sizes = [16, 22], strides = [1, 1]} : vector<16x36xf32> to vector<16x22xf32>
    %337 = vector.extract_strided_slice %329 {offsets = [0, 13], sizes = [16, 22], strides = [1, 1]} : vector<16x36xf32> to vector<16x22xf32>
    %338 = vector.extract_strided_slice %329 {offsets = [0, 14], sizes = [16, 22], strides = [1, 1]} : vector<16x36xf32> to vector<16x22xf32>
    %339 = tpu.concatenate %330, %331, %332, %333, %334, %335, %336, %337, %338 in 0 : vector<16x22xf32>, vector<16x22xf32>, vector<16x22xf32>, vector<16x22xf32>, vector<16x22xf32>, vector<16x22xf32>, vector<16x22xf32>, vector<16x22xf32>, vector<16x22xf32> -> vector<144x22xf32>
    %c7_155 = arith.constant 7 : index
    %c0_156 = arith.constant 0 : index
    %c0_157 = arith.constant 0 : index
    %340 = vector.load %arg2[%c7_155, %c0_156, %c0_157] : memref<8x16x144xf32, #tpu.memory_space<vmem>>, vector<1x16x144xf32>
    %341 = vector.shape_cast %340 : vector<1x16x144xf32> to vector<16x144xf32>
    %cst_158 = arith.constant dense<0.000000e+00> : vector<16x22xf32>
    %342 = tpu.matmul %341, %339, %cst_158 {dimension_numbers = #tpu.dot_dimension_numbers<[1], [0], [0], [1], [0, 0, 1, 1], [], []>} : vector<16x144xf32>, vector<144x22xf32>, vector<16x22xf32> -> vector<16x22xf32>
    %c7_159 = arith.constant 7 : index
    %c0_160 = arith.constant 0 : index
    %c0_161 = arith.constant 0 : index
    %343 = vector.load %arg5[%c7_159, %c0_160, %c0_161] : memref<9x1x726xf32, #tpu.memory_space<vmem>>, vector<1x1x726xf32>
    %344 = vector.shape_cast %343 : vector<1x1x726xf32> to vector<1x726xf32>
    %345 = vector.extract_strided_slice %344 {offsets = [0, 0], sizes = [1, 22], strides = [1, 1]} : vector<1x726xf32> to vector<1x22xf32>
    %346 = vector.broadcast %345 : vector<1x22xf32> to vector<16x22xf32>
    %347 = arith.mulf %342, %346 : vector<16x22xf32>
    %cst_162 = arith.constant dense<0.000000e+00> : vector<16xf32>
    %348 = vector.multi_reduction <add>, %347, %cst_162 [1] : vector<16x22xf32> to vector<16xf32>
    %349 = vector.shape_cast %348 : vector<16xf32> to vector<16x1xf32>
    %350 = arith.mulf %342, %347 : vector<16x22xf32>
    %cst_163 = arith.constant dense<0.000000e+00> : vector<16xf32>
    %351 = vector.multi_reduction <add>, %350, %cst_163 [1] : vector<16x22xf32> to vector<16xf32>
    %352 = vector.shape_cast %351 : vector<16xf32> to vector<16x1xf32>
    %c7_164 = arith.constant 7 : index
    %c0_165 = arith.constant 0 : index
    %c0_166 = arith.constant 0 : index
    %353 = vector.load %arg4[%c7_164, %c0_165, %c0_166] : memref<8x16x16xf32, #tpu.memory_space<vmem>>, vector<1x16x16xf32>
    %354 = vector.shape_cast %353 : vector<1x16x16xf32> to vector<16x16xf32>
    %cst_167 = arith.constant dense<0.000000e+00> : vector<16x1xf32>
    %355 = tpu.matmul %354, %349, %cst_167 {dimension_numbers = #tpu.dot_dimension_numbers<[1], [0], [0], [1], [0, 0, 1, 1], [], []>} : vector<16x16xf32>, vector<16x1xf32>, vector<16x1xf32> -> vector<16x1xf32>
    %cst_168 = arith.constant dense<0.000000e+00> : vector<16x1xf32>
    %356 = tpu.matmul %354, %352, %cst_168 {dimension_numbers = #tpu.dot_dimension_numbers<[1], [0], [0], [1], [0, 0, 1, 1], [], []>} : vector<16x16xf32>, vector<16x1xf32>, vector<16x1xf32> -> vector<16x1xf32>
    %357 = arith.mulf %355, %355 : vector<16x1xf32>
    %358 = arith.subf %356, %357 : vector<16x1xf32>
    %cst_169 = arith.constant 0.000000e+00 : f32
    %359 = vector.broadcast %cst_169 : f32 to vector<16x1xf32>
    %360 = arith.maximumf %358, %359 : vector<16x1xf32>
    %cst_170 = arith.constant 9.99999974E-6 : f32
    %361 = vector.broadcast %cst_170 : f32 to vector<16x1xf32>
    %362 = arith.addf %360, %361 : vector<16x1xf32>
    %363 = math.rsqrt %362 : vector<16x1xf32>
    %c14 = arith.constant 14 : index
    %c0_171 = arith.constant 0 : index
    %c0_172 = arith.constant 0 : index
    %364 = vector.load %arg3[%c14, %c0_171, %c0_172] : memref<16x16x1xf32, #tpu.memory_space<vmem>>, vector<1x16x1xf32>
    %365 = vector.shape_cast %364 : vector<1x16x1xf32> to vector<16x1xf32>
    %366 = arith.mulf %363, %365 : vector<16x1xf32>
    %c15 = arith.constant 15 : index
    %c0_173 = arith.constant 0 : index
    %c0_174 = arith.constant 0 : index
    %367 = vector.load %arg3[%c15, %c0_173, %c0_174] : memref<16x16x1xf32, #tpu.memory_space<vmem>>, vector<1x16x1xf32>
    %368 = vector.shape_cast %367 : vector<1x16x1xf32> to vector<16x1xf32>
    %369 = arith.mulf %355, %366 : vector<16x1xf32>
    %370 = arith.subf %368, %369 : vector<16x1xf32>
    %371 = vector.broadcast %366 : vector<16x1xf32> to vector<16x22xf32>
    %372 = arith.mulf %342, %371 : vector<16x22xf32>
    %373 = vector.broadcast %370 : vector<16x1xf32> to vector<16x22xf32>
    %374 = arith.addf %372, %373 : vector<16x22xf32>
    %cst_175 = arith.constant 0.000000e+00 : f32
    %375 = vector.broadcast %cst_175 : f32 to vector<16x22xf32>
    %376 = arith.maximumf %374, %375 : vector<16x22xf32>
    %c8_176 = arith.constant 8 : index
    %c0_177 = arith.constant 0 : index
    %c0_178 = arith.constant 0 : index
    %377 = vector.load %arg5[%c8_176, %c0_177, %c0_178] : memref<9x1x726xf32, #tpu.memory_space<vmem>>, vector<1x1x726xf32>
    %378 = vector.shape_cast %377 : vector<1x1x726xf32> to vector<1x726xf32>
    %379 = vector.extract_strided_slice %378 {offsets = [0, 0], sizes = [1, 22], strides = [1, 1]} : vector<1x726xf32> to vector<1x22xf32>
    %380 = vector.broadcast %379 : vector<1x22xf32> to vector<16x22xf32>
    %381 = arith.mulf %376, %380 : vector<16x22xf32>
    %cst_179 = arith.constant dense<0.000000e+00> : vector<16xf32>
    %382 = vector.multi_reduction <add>, %381, %cst_179 [1] : vector<16x22xf32> to vector<16xf32>
    %383 = vector.shape_cast %382 : vector<16xf32> to vector<16x1xf32>
    %c0_180 = arith.constant 0 : index
    %c0_181 = arith.constant 0 : index
    %384 = vector.load %arg8[%c0_180, %c0_181] : memref<10x16xf32, #tpu.memory_space<vmem>>, vector<10x16xf32>
    %cst_182 = arith.constant dense<0.000000e+00> : vector<10x1xf32>
    %385 = tpu.matmul %384, %383, %cst_182 {dimension_numbers = #tpu.dot_dimension_numbers<[1], [0], [0], [1], [0, 0, 1, 1], [], []>} : vector<10x16xf32>, vector<16x1xf32>, vector<10x1xf32> -> vector<10x1xf32>
    %c0_183 = arith.constant 0 : index
    %c0_184 = arith.constant 0 : index
    %c0_185 = arith.constant 0 : index
    %386 = vector.load %arg9[%c0_183, %c0_184, %c0_185] : memref<1x10x1xf32, #tpu.memory_space<vmem>>, vector<1x10x1xf32>
    %387 = vector.shape_cast %386 : vector<1x10x1xf32> to vector<10x1xf32>
    %388 = vector.shape_cast %385 : vector<10x1xf32> to vector<1x10x1xf32>
    tpu.vector_store %arg9[%c0_183, %c0_184, %c0_185], %388 {strides = array<i32>} : memref<1x10x1xf32, #tpu.memory_space<vmem>>, vector<1x10x1xf32>,
    return
  }
  func.func @transform_0(%arg0: i32) -> (i32, i32, i32) {
    %c0_i32 = arith.constant 0 : i32
    %c0_i32_0 = arith.constant 0 : i32
    %c0_i32_1 = arith.constant 0 : i32
    return %arg0, %c0_i32, %c0_i32_0 : i32, i32, i32
  }
  func.func @transform_1(%arg0: i32) -> (i32, i32, i32) {
    %c0_i32 = arith.constant 0 : i32
    %c0_i32_0 = arith.constant 0 : i32
    %c0_i32_1 = arith.constant 0 : i32
    %c0_i32_2 = arith.constant 0 : i32
    return %c0_i32, %c0_i32_0, %c0_i32_1 : i32, i32, i32
  }
  func.func @transform_2(%arg0: i32) -> (i32, i32, i32) {
    %c0_i32 = arith.constant 0 : i32
    %c0_i32_0 = arith.constant 0 : i32
    %c0_i32_1 = arith.constant 0 : i32
    %c0_i32_2 = arith.constant 0 : i32
    return %c0_i32, %c0_i32_0, %c0_i32_1 : i32, i32, i32
  }
  func.func @transform_3(%arg0: i32) -> (i32, i32, i32) {
    %c0_i32 = arith.constant 0 : i32
    %c0_i32_0 = arith.constant 0 : i32
    %c0_i32_1 = arith.constant 0 : i32
    %c0_i32_2 = arith.constant 0 : i32
    return %c0_i32, %c0_i32_0, %c0_i32_1 : i32, i32, i32
  }
  func.func @transform_4(%arg0: i32) -> (i32, i32, i32) {
    %c0_i32 = arith.constant 0 : i32
    %c0_i32_0 = arith.constant 0 : i32
    %c0_i32_1 = arith.constant 0 : i32
    %c0_i32_2 = arith.constant 0 : i32
    return %c0_i32, %c0_i32_0, %c0_i32_1 : i32, i32, i32
  }
  func.func @transform_5(%arg0: i32) -> (i32, i32) {
    %c0_i32 = arith.constant 0 : i32
    %c0_i32_0 = arith.constant 0 : i32
    %c0_i32_1 = arith.constant 0 : i32
    return %c0_i32, %c0_i32_0 : i32, i32
  }
  func.func @transform_6(%arg0: i32) -> (i32, i32) {
    %c0_i32 = arith.constant 0 : i32
    %c0_i32_0 = arith.constant 0 : i32
    %c0_i32_1 = arith.constant 0 : i32
    return %c0_i32, %c0_i32_0 : i32, i32
  }
  func.func @transform_7(%arg0: i32) -> (i32, i32) {
    %c0_i32 = arith.constant 0 : i32
    %c0_i32_0 = arith.constant 0 : i32
    %c0_i32_1 = arith.constant 0 : i32
    return %c0_i32, %c0_i32_0 : i32, i32
  }
  func.func @transform_8(%arg0: i32) -> (i32, i32, i32) {
    %c0_i32 = arith.constant 0 : i32
    %c0_i32_0 = arith.constant 0 : i32
    %c0_i32_1 = arith.constant 0 : i32
    return %arg0, %c0_i32, %c0_i32_0 : i32, i32, i32
  }
}

</mosaic_0001>

<bundles_post_ra>
// kernel: _lambda_.1
= control target key start
LH: loop header
LB: loop body
LE: loop exit
PB: predicated region body
PF: predicated region fallthrough
CT: control target
= control target key end

     0   :  { %13 = vsyncpa [#allocation3], 0  ;;  %s9421_s0 = inlined_call_operand.vmem [shape: f32[2,16,784], index: 0, kind: input, shape index: {}]   ;;  %s9422_s1 = inlined_call_operand.hbm [shape: f32[8,16,144], index: 1, kind: input, shape index: {}]   ;;  %s9423_s2 = inlined_call_operand.hbm [shape: f32[16,16,1], index: 2, kind: input, shape index: {}]   ;;  %s9424_s3 = inlined_call_operand.hbm [shape: f32[8,16,16], index: 3, kind: input, shape index: {}]   ;;  %s9425_s4 = inlined_call_operand.vmem [shape: f32[9,1,726], index: 4, kind: input, shape index: {}]   ;;  %s9426_s5 = inlined_call_operand.vmem [shape: f32[349,36], index: 5, kind: input, shape index: {}]   ;;  %s9427_s6 = inlined_call_operand.vmem [shape: f32[22,36], index: 6, kind: input, shape index: {}]   ;;  %s9428_s7 = inlined_call_operand.hbm [shape: f32[10,16], index: 7, kind: input, shape index: {}]   ;;  %s9429_s8 = inlined_call_operand.vmem [shape: f32[2,10,1], index: 8, kind: output, shape index: {}]  }
   0x1   :  { %14 = vsyncpa [#allocation5], 0 }
   0x2   :  { %15 = vsyncpa [#allocation8], 0  ;;  %s6792_s27 = smov 0  }
   0x3 LB: > { %s250_s30 = sshll.u32 %s9423_s2, 4  ;;  %s6801_s9 = sadd.s32 4294967295, %s6717_s27   ;;  %s6717_s27 = sphi %s6792_s27, %s21_s27   ;;  %s251_s30 = int_to_ptr.hbm [resolvable:$true] %s250_s30 }
   0x4   : > { %p5309_p0 = scmp.ge.s32.totalorder %s6717_s27, 1  ;;  %p225_p1 = scmp.lt.s32.totalorder %s6717_s27, 3 }
   0x5   : > { %p5470_p2 = scmp.eq.s32.totalorder %s6801_s9, 0  ;;  %s6719_s11 = smov [#allocation4]  }
   0x6   : > { %p6806_p3 = pnand %p5309_p0, %p225_p1  ;;  %s252_s12 = sshll.u32 %s6719_s11, 4  ;;  %s253_s12 = int_to_ptr.vmem [resolvable:$true] %s252_s12 }
   0x7   : > { %s236_s15 = sshll.u32 %s9422_s1, 4  ;;  %s6720_s17 = smov [#allocation2]   ;;  %s237_s15 = int_to_ptr.hbm [resolvable:$true] %s236_s15 }
   0x8   : > { %p5457_p4 = pneg %p6806_p3  ;;  %s238_s18 = sshll.u32 %s6720_s17, 4  ;;  %s239_s18 = int_to_ptr.vmem [resolvable:$true] %s238_s18 }
   0x9   : > { %s6721_s19 = smov 128   ;;  %s6722_s20 = smov 8  }
   0xa   : > { %p6817_p5 = pnand %p5470_p2, %p5457_p4  ;;  %s264_s23 = sshll.u32 %s9424_s3, 4  ;;  %s265_s23 = int_to_ptr.hbm [resolvable:$true] %s264_s23 }
   0xb   : > { %s6723_s24 = smov 256   ;;  %s6724_s25 = smov 16  }
   0xc   : > { %5463 = dma.hbm_to_vmem [thread:$0]  (!%p6817_p5), %s251_s30, 4096, %s253_s12, [#allocation5], %s6721_s19, %s6721_s19, %s6722_s20  }
   0xd   : > { %5460 = dma.hbm_to_vmem [thread:$0]  (!%p6817_p5), %s237_s15, 4096, %s239_s18, [#allocation3], %s6723_s24, %s6723_s24, %s6724_s25  }
   0xe   : > { %s6725_s26 = smov [#allocation6]   ;;  %s287_s13 = sshll.u32 %s9428_s7, 4  ;;  %s288_s13 = int_to_ptr.hbm [resolvable:$true] %s287_s13 }
   0xf   : > { %s266_s28 = sshll.u32 %s6725_s26, 4  ;;  %s6726_s30 = smov [#allocation7]   ;;  %s267_s28 = int_to_ptr.vmem [resolvable:$true] %s266_s28 }
  0x10   : > { %5466 = dma.hbm_to_vmem [thread:$0]  (!%p6817_p5), %s265_s23, 2048, %s267_s28, [#allocation5], %s6721_s19, %s6721_s19, %s6722_s20  }
  0x11   : > { %s289_s12 = sshll.u32 %s6726_s30, 4  ;;  %313 = sbr.rel (%p6806_p3) target bundleno = 6800 (0x1a90), region = 52  ;;  %s290_s12 = int_to_ptr.vmem [resolvable:$true] %s289_s12 }
  0x12   : > { %5469 = dma.hbm_to_vmem [thread:$0]  (!%p6817_p5), %s288_s13, 256, %s290_s12, [#allocation8], %s6721_s19, %s6721_s19, %s6722_s20  }
  0x16   : > { %6704 = dma.done.wait (%p5470_p2), [#allocation3], 4096  }
  0x17   : > { %6706 = vsyncadd (%p5470_p2), [#allocation3], 4294963200 }
  0x18   : > { %6708 = dma.done.wait (%p5470_p2), [#allocation5], 6144  }
  0x19   : > { %6710 = vsyncadd (%p5470_p2), [#allocation5], 4294961152 }
  0x1a   : > { %6712 = dma.done.wait (%p5470_p2), [#allocation8], 256  }
  0x1b   : > { %6714 = vsyncadd (%p5470_p2), [#allocation8], 4294967040  ;;  %p363_p6 = scmp.lt.s32.totalorder %s6801_s9, 1  ;;  %s6727_s17 = smov 72   ;;  %vm717_vm0 = vcmask 580608   ;;  %vm664_vm1 = vcmask 588800  }
  0x1c   : > { %s6728_s18 = smov 71   ;;  %s6729_s19 = smov 98   ;;  %vm770_vm2 = vcmask 572416   ;;  %vm611_vm3 = vcmask 801792   ;;  %vm564_vm4 = vcmask 809984   ;;  %vm517_vm5 = vcmask 818176  }
  0x1d   : > { %s9479_s9 = smov (!%p363_p6, %s6801_s9), 1  ;;  %s6730_s20 = smov 70   ;;  %vm470_vm6 = vcmask 1031168   ;;  %vm799_vm7 = vcmask 130048   ;;  %vm423_vm8 = vcmask 1039360   ;;  %vm1112_vm9 = vcmask 703488  }
  0x1e   : > { %s5440_s10 = smul.u32 112, %s9479_s9  ;;  %s6731_s21 = smov 99  }
  0x1f   : > { %s6732_s22 = smov 100   ;;  %s6733_s23 = smov 126  }
  0x20   : > { %s6857_s16 = scalar_lea.vmem %s9421_s0, %s5440_s10  ;;  %s6734_s24 = smov 127  }
  0x21   : > { %v6860_v0 = vld [vmem:[%s6857_s16 + $0x38] sm:$0xff]  ;;  %v6863_v1 = vld [vmem:[%s6857_s16 + $0x40] sm:$0xff]  ;;  %v6871_v4 = vld [vmem:[%s6857_s16 + $0x8] sm:$0xff]  ;;  %s6736_s30 = smov 16   ;;  %s6737_s12 = smov 14  }
  0x22   : > { %v6866_v2 = vld [vmem:[%s6857_s16] sm:$0xff]  ;;  %v5534_v3 = vpack.i.bf16 %v6863_v1, %v6860_v0  ;;  %v6879_v6 = vld [vmem:[%s6857_s16 + $0x48] sm:$0xff]  ;;  %v6882_v7 = vld [vmem:[%s6857_s16 + $0x50] sm:$0xff]  ;;  %s6738_s10 = smov 12   ;;  %s6739_s14 = smov 68  }
  0x23   : > { %v5524_v5 = vpack.i.bf16 %v6871_v4, %v6866_v2  ;;  %v6885_v8 = vld [vmem:[%s6857_s16 + $0x10] sm:$0xff]  ;;  %v6888_v9 = vld [vmem:[%s6857_s16 + $0x18] sm:$0xff]  ;;  %v5539_v10 = vpack.i.bf16 %v6882_v7, %v6879_v6  ;;  %v6921_v13 = vld [vmem:[%s6857_s16 + $0x20] sm:$0xff]  ;;  %s6740_s15 = smov 124   ;;  %s6743_s25 = smov 115  }
  0x24   : > { %5535 = vrot.lane.b32.xlu2 %v5534_v3, %s6727_s17  ;;  %5515 = vrot.lane.b32.xlu0 %v5534_v3, %s6728_s18  ;;  %v5529_v11 = vpack.i.bf16 %v6888_v9, %v6885_v8  ;;  %v5624_v12 = vpack.i.bf16 %v6885_v8, %v6879_v6  ;;  %v6924_v14 = vld [vmem:[%s6857_s16 + $0x58] sm:$0xff]  ;;  %v6935_v16 = vld [vmem:[%s6857_s16 + $0x28] sm:$0xff]  ;;  %v5709_v24 = vpack.i.bf16 %v6888_v9, %v6882_v7  ;;  %s6744_s26 = smov 122   ;;  %s6745_s28 = smov 121  }
  0x25   : > { %5525 = vrot.lane.b32.xlu1 %v5524_v5, %s6728_s18  ;;  %v6928_v15 = vpack.i.bf16 %v6921_v13, %v6924_v14  ;;  %v6938_v17 = vld [vmem:[%s6857_s16 + $0x60] sm:$0xff]  ;;  %v379_v19 = vld [vmem:[%s6857_s16 + $0x30] sm:$0xff]  ;;  %v386_v20 = vld [vmem:[%s6857_s16 + $0x68] sm:$0xff]  ;;  %v5749_v37 = vpack.i.bf16 %v6935_v16, %v6921_v13  ;;  %s6746_s29 = smov 114  }
  0x26   : > { %v5664_v18 = vpack.i.bf16 %v6935_v16, %v6938_v17  ;;  %v5694_v22 = vpack.i.bf16 %v379_v19, %v386_v20  ;;  %v5739_v33 = vpack.i.bf16 %v6938_v17, %v6924_v14 }
  0x2c   : > { %5540 = vrot.lane.b32.xlu2 %v5539_v10, %s6727_s17  ;;  %5520 = vrot.lane.b32.xlu0 %v5539_v10, %s6728_s18 }
  0x2d   : > { %5530 = vrot.lane.b32.xlu1 %v5529_v11, %s6728_s18 }
  0x34   : > { %5555 = vrot.lane.b32.xlu2 %v5534_v3, %s6729_s19  ;;  %5545 = vrot.lane.b32.xlu0 %v5524_v5, %s6727_s17 }
  0x35   : > { %5550 = vrot.lane.b32.xlu1 %v5529_v11, %s6727_s17 }
  0x3c   : > { %5570 = vrot.lane.b32.xlu2 %v5529_v11, %s6729_s19  ;;  %5560 = vrot.lane.b32.xlu0 %v5539_v10, %s6729_s19 }
  0x3d   : > { %5565 = vrot.lane.b32.xlu1 %v5524_v5, %s6729_s19 }
  0x44   : > { %5585 = vrot.lane.b32.xlu2 %v5534_v3, %s6730_s20  ;;  %5575 = vrot.lane.b32.xlu0 %v5534_v3, %s6731_s21 }
  0x45   : > { %5580 = vrot.lane.b32.xlu1 %v5539_v10, %s6731_s21 }
  0x4c   : > { %5600 = vrot.lane.b32.xlu2 %v5524_v5, %s6730_s20  ;;  %5590 = vrot.lane.b32.xlu0 %v5524_v5, %s6731_s21 }
  0x4d   : > { %5595 = vrot.lane.b32.xlu1 %v5529_v11, %s6731_s21 }
  0x54   : > { %5615 = vrot.lane.b32.xlu2 %v5524_v5, %s6732_s22  ;;  %5605 = vrot.lane.b32.xlu0 %v5534_v3, %s6732_s22 }
  0x55   : > { %5610 = vrot.lane.b32.xlu1 %v5539_v10, %s6732_s22 }
  0x5c   : > { %5630 = vrot.lane.b32.xlu2 %v5534_v3, %s6733_s23  ;;  %5620 = vrot.lane.b32.xlu0 %v5529_v11, %s6732_s22 }
  0x5d   : > { %5625 = vrot.lane.b32.xlu1 %v5624_v12, %s6730_s20 }
  0x64   : > { %5645 = vrot.lane.b32.xlu2 %v5529_v11, %s6733_s23  ;;  %5635 = vrot.lane.b32.xlu0 %v5539_v10, %s6733_s23 }
  0x65   : > { %5640 = vrot.lane.b32.xlu1 %v5524_v5, %s6733_s23 }
  0x6c   : > { %5660 = vrot.lane.b32.xlu2 %v5539_v10, %s6734_s24  ;;  %5650 = vrot.lane.b32.xlu0 %v6928_v15, %s6728_s18 }
  0x6d   : > { %5655 = vrot.lane.b32.xlu1 %v5534_v3, %s6734_s24 }
  0x74   : > { %5675 = vrot.lane.b32.xlu2 %v5529_v11, %s6734_s24  ;;  %5665 = vrot.lane.b32.xlu0 %v5664_v18, %s6728_s18 }
  0x75   : > { %5670 = vrot.lane.b32.xlu1 %v5524_v5, %s6734_s24 }
  0x7c   : > { %5690 = vrot.lane.b32.xlu2 %v6928_v15, %s6729_s19  ;;  %5680 = vrot.lane.b32.xlu0 %v6928_v15, %s6727_s17 }
  0x7d   : > { %5685 = vrot.lane.b32.xlu1 %v5664_v18, %s6727_s17 }
  0x7e   : > { %v5536_v21 = vpop.permute.xlu2 %5535 }
  0x7f   : > { %v5538_v34 = vunpack.i.h.bf16 %v5536_v21  ;;  %v5537_v35 = vunpack.i.l.bf16 %v5536_v21 }
  0x81   : > { %v671_v39 = vsel %vm664_vm1, %v5537_v35, %v5538_v34 }
  0x84   : > { %5705 = vrot.lane.b32.xlu2 %v6928_v15, %s6731_s21  ;;  %5695 = vrot.lane.b32.xlu0 %v5694_v22, %s6728_s18 }
  0x85   : > { %5700 = vrot.lane.b32.xlu1 %v5664_v18, %s6729_s19 }
  0x86   : > { %v6956_v23 = vpop.permute.xlu2 %5540 }
  0x87   : > { %v5542_v47 = vunpack.i.l.bf16 %v6956_v23  ;;  %v5543_v3 = vunpack.i.h.bf16 %v6956_v23 }
  0x89   : > { %v672_v53 = vsel %vm664_vm1, %v5538_v34, %v5542_v47 }
  0x8c   : > { %5720 = vrot.lane.b32.xlu2 %v5664_v18, %s6731_s21  ;;  %5710 = vrot.lane.b32.xlu0 %v5709_v24, %s6730_s20  ;;  %v673_v24 = vsel %vm664_vm1, %v5542_v47, %v5543_v3 }
  0x8d   : > { %5715 = vrot.lane.b32.xlu1 %v5694_v22, %s6727_s17 }
  0x8e   : > { %v6963_v25 = vpop.permute.xlu2 %5555 }
  0x8f   : > { %v5558_v51 = vunpack.i.h.bf16 %v6963_v25  ;;  %v5557_v52 = vunpack.i.l.bf16 %v6963_v25 }
  0x91   : > { %v617_v11 = vsel %vm611_vm3, %v5557_v52, %v5558_v51 }
  0x94   : > { %5735 = vrot.lane.b32.xlu2 %v6928_v15, %s6733_s23  ;;  %5725 = vrot.lane.b32.xlu0 %v6928_v15, %s6732_s22 }
  0x95   : > { %5730 = vrot.lane.b32.xlu1 %v5664_v18, %s6732_s22 }
  0x96   : > { %v5516_v26 = vpop.permute.xlu0 %5515  ;;  %v6970_v27 = vpop.permute.xlu2 %5570 }
  0x97   : > { %v5518_v28 = vunpack.i.h.bf16 %v5516_v26  ;;  %v5517_v29 = vunpack.i.l.bf16 %v5516_v26  ;;  %v5526_v30 = vpop.permute.xlu1 %5525  ;;  %v5573_v20 = vunpack.i.h.bf16 %v6970_v27  ;;  %v5572_v21 = vunpack.i.l.bf16 %v6970_v27 }
  0x98   : > { %v5528_v31 = vunpack.i.h.bf16 %v5526_v30  ;;  %v5527_v32 = vunpack.i.l.bf16 %v5526_v30 }
  0x99   : > { %v724_v36 = vsel %vm717_vm0, %v5517_v29, %v5518_v28 }
  0x9a   : > { %806 = vmatpush.msra.mxu0 %v724_v36  ;;  %v718_v38 = vsel %vm717_vm0, %v5527_v32, %v5528_v31  ;;  %v614_v36 = vsel %vm611_vm3, %v5572_v21, %v5573_v20 }
  0x9c   : > { %5740 = vrot.lane.b32.xlu0 %v5739_v33, %s6730_s20  ;;  %807 = vmatpush.msra.mxu0 %v718_v38 }
  0x9d   : > { %5745 = vrot.lane.b32.xlu1 %v5664_v18, %s6733_s23  ;;  %5750 = vrot.lane.b32.xlu2 %v5749_v37, %s6730_s20 }
  0x9e   : > { %v6982_v40 = vpop.permute.xlu0 %5520  ;;  %v6984_v41 = vpop.permute.xlu2 %5585  ;;  %808 = vmatpush.msra.mxu0 %v671_v39 }
  0x9f   : > { %v5522_v42 = vunpack.i.l.bf16 %v6982_v40  ;;  %v5588_v43 = vunpack.i.h.bf16 %v6984_v41  ;;  %v5587_v44 = vunpack.i.l.bf16 %v6984_v41  ;;  %v6989_v45 = vpop.permute.xlu1 %5530  ;;  %v5523_v54 = vunpack.i.h.bf16 %v6982_v40 }
  0xa0   : > { %v5532_v46 = vunpack.i.l.bf16 %v6989_v45  ;;  %v5533_v55 = vunpack.i.h.bf16 %v6989_v45 }
  0xa1   : > { %v725_v48 = vsel %vm717_vm0, %v5518_v28, %v5522_v42  ;;  %v777_v49 = vsel %vm770_vm2, %v5587_v44, %v5588_v43 }
  0xa2   : > { %852 = vmatpush.msra.mxu2 %v725_v48  ;;  %v719_v50 = vsel %vm717_vm0, %v5528_v31, %v5532_v46  ;;  %843 = vmatpush.msra.mxu1 %v777_v49  ;;  %v720_v19 = vsel %vm717_vm0, %v5532_v46, %v5533_v55 }
  0xa4   : > { %5755 = vrot.lane.b32.xlu0 %v6928_v15, %s6734_s24  ;;  %853 = vmatpush.msra.mxu2 %v719_v50 }
  0xa5   : > { %5760 = vrot.lane.b32.xlu1 %v5664_v18, %s6734_s24  ;;  %5765 = vrot.lane.b32.xlu2 %v5694_v22, %s6730_s20  ;;  %v726_v18 = vsel %vm717_vm0, %v5522_v42, %v5523_v54 }
  0xa6   : > { %v7007_v56 = vpop.permute.xlu2 %5600  ;;  %v5546_v57 = vpop.permute.xlu0 %5545  ;;  %854 = vmatpush.msra.mxu2 %v672_v53 }
  0xa7   : > { %v5603_v58 = vunpack.i.h.bf16 %v7007_v56  ;;  %v5602_v59 = vunpack.i.l.bf16 %v7007_v56  ;;  %v5548_v60 = vunpack.i.h.bf16 %v5546_v57  ;;  %v5547_v61 = vunpack.i.l.bf16 %v5546_v57  ;;  %v7011_v62 = vpop.permute.xlu1 %5550 }
  0xa8   : > { %v5552_v63 = vunpack.i.l.bf16 %v7011_v62  ;;  %v5553_v12 = vunpack.i.h.bf16 %v7011_v62 }
  0xa9   : > { %v665_v5 = vsel %vm664_vm1, %v5547_v61, %v5548_v60  ;;  %v771_v10 = vsel %vm770_vm2, %v5602_v59, %v5603_v58 }
  0xaa   : > { %809 = vmatpush.msra.mxu0 %v665_v5  ;;  %844 = vmatpush.msra.mxu1 %v771_v10  ;;  %v666_v15 = vsel %vm664_vm1, %v5548_v60, %v5552_v63  ;;  %v667_v25 = vsel %vm664_vm1, %v5552_v63, %v5553_v12 }
  0xab   : > { %855 = vmatpush.msra.mxu2 %v666_v15 }
  0xac   : > { %898 = vmatpush.msrb.mxu1 %v726_v18  ;;  %810 = vmatpush.msra.mxu0 %v617_v11 }
  0xae   : > { %899 = vmatpush.msrb.mxu1 %v720_v19  ;;  %v7030_v22 = vpop.permute.xlu0 %5560  ;;  %v7038_v26 = vpop.permute.xlu2 %5615 }
  0xaf   : > { %v5563_v28 = vunpack.i.h.bf16 %v7030_v22  ;;  %v5562_v29 = vunpack.i.l.bf16 %v7030_v22  ;;  %v5566_v30 = vpop.permute.xlu1 %5565  ;;  %v5618_v15 = vunpack.i.h.bf16 %v7038_v26  ;;  %v5617_v18 = vunpack.i.l.bf16 %v7038_v26 }
  0xb0   : > { %900 = vmatpush.msrb.mxu1 %v673_v24  ;;  %v5568_v31 = vunpack.i.h.bf16 %v5566_v30  ;;  %v5567_v32 = vunpack.i.l.bf16 %v5566_v30 }
  0xb1   : > { %v618_v33 = vsel %vm611_vm3, %v5558_v51, %v5562_v29  ;;  %v619_v34 = vsel %vm611_vm3, %v5562_v29, %v5563_v28 }
  0xb2   : > { %901 = vmatpush.msrb.mxu1 %v667_v25  ;;  %856 = vmatpush.msra.mxu2 %v618_v33  ;;  %v613_v35 = vsel %vm611_vm3, %v5568_v31, %v5572_v21  ;;  %v612_v37 = vsel %vm611_vm3, %v5567_v32, %v5568_v31 }
  0xb3   : > { %811 = vmatpush.msra.mxu0 %v612_v37 }
  0xb4   : > { %902 = vmatpush.msrb.mxu1 %v619_v34  ;;  %857 = vmatpush.msra.mxu2 %v613_v35  ;;  %v518_v34 = vsel %vm517_vm5, %v5617_v18, %v5618_v15 }
  0xb6   : > { %903 = vmatpush.msrb.mxu1 %v614_v36  ;;  %v5576_v38 = vpop.permute.xlu0 %5575  ;;  %v7055_v48 = vpop.permute.xlu2 %5630 }
  0xb7   : > { %v5578_v39 = vunpack.i.h.bf16 %v5576_v38  ;;  %v5577_v42 = vunpack.i.l.bf16 %v5576_v38  ;;  %v7051_v44 = vpop.permute.xlu1 %5580  ;;  %v5633_v21 = vunpack.i.h.bf16 %v7055_v48  ;;  %v5632_v24 = vunpack.i.l.bf16 %v7055_v48 }
  0xb8   : > { %v5583_v46 = vunpack.i.h.bf16 %v7051_v44  ;;  %v5582_v47 = vunpack.i.l.bf16 %v7051_v44 }
  0xb9   : > { %v570_v49 = vsel %vm564_vm4, %v5577_v42, %v5578_v39  ;;  %v476_v36 = vsel %vm470_vm6, %v5632_v24, %v5633_v21 }
  0xba   : > { %812 = vmatpush.msra.mxu0 %v570_v49  ;;  %v571_v50 = vsel %vm564_vm4, %v5578_v39, %v5582_v47  ;;  %v572_v51 = vsel %vm564_vm4, %v5582_v47, %v5583_v46 }
  0xbb   : > { %858 = vmatpush.msra.mxu2 %v571_v50  ;;  %904 = vmatpush.msrb.mxu1 %v572_v51 }
  0xbe   : > { %v5591_v52 = vpop.permute.xlu0 %5590  ;;  %v7071_v11 = vpop.permute.xlu2 %5645 }
  0xbf   : > { %v5593_v53 = vunpack.i.h.bf16 %v5591_v52  ;;  %v5592_v57 = vunpack.i.l.bf16 %v5591_v52  ;;  %v7062_v59 = vpop.permute.xlu1 %5595 }
  0xc0   : > { %v5598_v60 = vunpack.i.h.bf16 %v7062_v59  ;;  %v5597_v61 = vunpack.i.l.bf16 %v7062_v59 }
  0xc1   : > { %v565_v63 = vsel %vm564_vm4, %v5592_v57, %v5593_v53  ;;  %v7112_v57 = vld [vmem:[#allocation2 + $0x8] sm:$0xff] }
  0xc2   : > { %813 = vmatpush.msra.mxu0 %v565_v63  ;;  %v566_v5 = vsel %vm564_vm4, %v5593_v53, %v5597_v61  ;;  %v567_v10 = vsel %vm564_vm4, %v5597_v61, %v5598_v60  ;;  %v9433_v61 = vunpack.i.h.bf16 %v7071_v11  ;;  %v5647_v63 = vunpack.i.l.bf16 %v7071_v11  ;;  %5323 = vmatmul.msk.f32.vlgmr.msra.gmra.mxu1 %vm799_vm7, %v7112_v57 }
  0xc3   : > { %859 = vmatpush.msra.mxu2 %v566_v5  ;;  %905 = vmatpush.msrb.mxu1 %v567_v10 }
  0xc6   : > { %v5606_v19 = vpop.permute.xlu0 %5605  ;;  %v7088_v37 = vpop.permute.xlu2 %5660 }
  0xc7   : > { %v5608_v25 = vunpack.i.h.bf16 %v5606_v19  ;;  %v5607_v29 = vunpack.i.l.bf16 %v5606_v19  ;;  %v7077_v30 = vpop.permute.xlu1 %5610  ;;  %v5662_v56 = vunpack.i.l.bf16 %v7088_v37 }
  0xc8   : > { %v5613_v31 = vunpack.i.h.bf16 %v7077_v30  ;;  %v5612_v32 = vunpack.i.l.bf16 %v7077_v30 }
  0xc9   : > { %v523_v33 = vsel %vm517_vm5, %v5607_v29, %v5608_v25 }
  0xca   : > { %814 = vmatpush.msra.mxu0 %v523_v33  ;;  %v524_v26 = vsel %vm517_vm5, %v5608_v25, %v5612_v32  ;;  %v525_v35 = vsel %vm517_vm5, %v5612_v32, %v5613_v31  ;;  %v473_v32 = vsel %vm470_vm6, %v5647_v63, %v9433_v61 }
  0xcb   : > { %860 = vmatpush.msra.mxu2 %v524_v26  ;;  %906 = vmatpush.msrb.mxu1 %v525_v35 }
  0xcc   : > { %815 = vmatpush.msra.mxu0 %v518_v34 }
  0xce   : > { %v7090_v38 = vpop.permute.xlu0 %5620  ;;  %816 = vmatpush.msra.mxu0 %v476_v36  ;;  %v7145_v36 = vld [vmem:[#allocation2 + $0x18] sm:$0xff] }
  0xcf   : > { %v5623_v39 = vunpack.i.h.bf16 %v7090_v38  ;;  %v5622_v42 = vunpack.i.l.bf16 %v7090_v38  ;;  %v7094_v47 = vpop.permute.xlu1 %5625  ;;  %5324 = vmatmul.msk.f32.gmra.mxu1 %vm799_vm7, %v7145_v36 }
  0xd0   : > { %v5628_v48 = vunpack.i.h.bf16 %v7094_v47  ;;  %v5627_v49 = vunpack.i.l.bf16 %v7094_v47 }
  0xd1   : > { %v519_v50 = vsel %vm517_vm5, %v5618_v15, %v5622_v42  ;;  %v520_v51 = vsel %vm517_vm5, %v5622_v42, %v5623_v39 }
  0xd2   : > { %861 = vmatpush.msra.mxu2 %v519_v50  ;;  %v778_v52 = vsel %vm770_vm2, %v5588_v43, %v5627_v49  ;;  %907 = vmatpush.msrb.mxu1 %v520_v51  ;;  %v772_v53 = vsel %vm770_vm2, %v5603_v58, %v5628_v48  ;;  %v9431_v43 = vunpack.i.h.bf16 %v7088_v37  ;;  %v7124_v58 = vpop.permute.xlu2 %5675 }
  0xd3   : > { %889 = vmatpush.msra.mxu3 %v778_v52  ;;  %v9430_v24 = vunpack.i.h.bf16 %v7124_v58  ;;  %v5677_v26 = vunpack.i.l.bf16 %v7124_v58 }
  0xd5   : > { %890 = vmatpush.msra.mxu3 %v772_v53  ;;  %v426_v35 = vsel %vm423_vm8, %v5677_v26, %v9430_v24 }
  0xd6   : > { %v7118_v41 = vpop.permute.xlu0 %5635  ;;  %5325 = vmatmul.msk.f32.vlgmr.msra.gmra.mxu3 %vm799_vm7, %v7112_v57 }
  0xd7   : > { %v5638_v5 = vunpack.i.h.bf16 %v7118_v41  ;;  %v5637_v10 = vunpack.i.l.bf16 %v7118_v41  ;;  %v5641_v15 = vpop.permute.xlu1 %5640 }
  0xd8   : > { %v5643_v18 = vunpack.i.h.bf16 %v5641_v15  ;;  %v5642_v19 = vunpack.i.l.bf16 %v5641_v15 }
  0xd9   : > { %v477_v25 = vsel %vm470_vm6, %v5633_v21, %v5637_v10  ;;  %v478_v29 = vsel %vm470_vm6, %v5637_v10, %v5638_v5  ;;  %v431_v21 = vsel %vm423_vm8, %v5662_v56, %v9431_v43 }
  0xda   : > { %862 = vmatpush.msra.mxu2 %v477_v25  ;;  %908 = vmatpush.msrb.mxu1 %v478_v29  ;;  %v472_v33 = vsel %vm470_vm6, %v5643_v18, %v5647_v63  ;;  %v471_v34 = vsel %vm470_vm6, %v5642_v19, %v5643_v18  ;;  %v7153_v53 = vpop.permute.xlu2 %5690  ;;  %v7161_v18 = vld [vmem:[#allocation2] sm:$0xff] }
  0xdb   : > { %817 = vmatpush.msra.mxu0 %v471_v34 }
  0xdc   : > { %863 = vmatpush.msra.mxu2 %v472_v33  ;;  %909 = vmatpush.msrb.mxu1 %v473_v32 }
  0xde   : > { %v7147_v42 = vpop.permute.xlu0 %5650  ;;  %910 = vmatpush.msrb.mxu1 %v431_v21  ;;  %5326 = vmatmul.msk.f32.gmra.mxu3 %vm799_vm7, %v7145_v36 }
  0xdf   : > { %v5656_v50 = vpop.permute.xlu1 %5655 }
  0xe0   : > { %v5658_v51 = vunpack.i.h.bf16 %v5656_v50  ;;  %v5657_v52 = vunpack.i.l.bf16 %v5656_v50  ;;  %911 = vmatpush.msrb.mxu1 %v426_v35 }
  0xe2   : > { %v430_v63 = vsel %vm423_vm8, %v5658_v51, %v5662_v56  ;;  %v429_v10 = vsel %vm423_vm8, %v5657_v52, %v5658_v51  ;;  %912 = vmatpush.msrb.mxu1 %v6879_v6  ;;  %v7166_v33 = vpop.permute.xlu2 %5705 }
  0xe3   : > { %864 = vmatpush.msra.mxu2 %v430_v63  ;;  %818 = vmatpush.msra.mxu0 %v429_v10  ;;  %v5708_v43 = vunpack.i.h.bf16 %v7166_v33 }
  0xe4   : > { %913 = vmatpush.msrb.mxu1 %v6885_v8  ;;  %v5652_v8 = vunpack.i.l.bf16 %v7147_v42 }
  0xe5   : > { %914 = vmatmul.f32.vlgmr.msrb.gmra.mxu1 %v7161_v18  ;;  %v568_v44 = vsel %vm564_vm4, %v5598_v60, %v5708_v43 }
  0xe6   : > { %v7159_v15 = vpop.permute.xlu0 %5665 }
  0xe7   : > { %v5671_v19 = vpop.permute.xlu1 %5670  ;;  %v5667_v6 = vunpack.i.l.bf16 %v7159_v15  ;;  %v5668_v34 = vunpack.i.h.bf16 %v7159_v15 }
  0xe8   : > { %v5673_v25 = vunpack.i.h.bf16 %v5671_v19  ;;  %v5672_v29 = vunpack.i.l.bf16 %v5671_v19 }
  0xe9   : > { %v728_v51 = vsel %vm717_vm0, %v5652_v8, %v5667_v6 }
  0xea   : > { %v425_v32 = vsel %vm423_vm8, %v5673_v25, %v5677_v26  ;;  %v424_v56 = vsel %vm423_vm8, %v5672_v29, %v5673_v25  ;;  %v5653_v26 = vunpack.i.h.bf16 %v7147_v42  ;;  %v7198_v63 = vpop.permute.xlu2 %5720  ;;  %v5692_v29 = vunpack.i.l.bf16 %v7153_v53 }
  0xeb   : > { %865 = vmatpush.msra.mxu2 %v425_v32  ;;  %819 = vmatpush.msra.mxu0 %v424_v56 }
  0xec   : > { %v721_v47 = vsel %vm717_vm0, %v5533_v55, %v5653_v26  ;;  %v620_v23 = vsel %vm611_vm3, %v5563_v28, %v5692_v29 }
  0xed   : > { %866 = vmatpush.msra.mxu2 %v6863_v1  ;;  %820 = vmatpush.msra.mxu0 %v6860_v0  ;;  %v7186_v0 = vld [vmem:[#allocation2 + $0x10] sm:$0xff] }
  0xee   : > { %v7173_v21 = vpop.permute.xlu0 %5680  ;;  %917 = vmatmul.f32.gmra.mxu1 %v7186_v0 }
  0xef   : > { %v5682_v35 = vunpack.i.l.bf16 %v7173_v21  ;;  %v7177_v50 = vpop.permute.xlu1 %5685  ;;  %867 = vmatpush.msra.mxu2 %v6871_v4  ;;  %821 = vmatpush.msra.mxu0 %v6866_v2  ;;  %v5683_v42 = vunpack.i.h.bf16 %v7173_v21  ;;  %v722_v4 = vsel %vm717_vm0, %v5653_v26, %v5668_v34  ;;  %v5693_v21 = vunpack.i.h.bf16 %v7153_v53 }
  0xf0   : > { %v9435_v1 = vunpack.i.l.bf16 %v7177_v50  ;;  %822 = vmatmul.f32.vlgmr.msra.gmra.mxu0 %v7161_v18  ;;  %v9432_v52 = vunpack.i.h.bf16 %v7177_v50  ;;  %868 = vmatmul.f32.vlgmr.msra.gmra.mxu2 %v7161_v18 }
  0xf1   : > { %990 = vmatpush.msrb.mxu2 %v728_v51  ;;  %v9436_v51 = vunpack.i.l.bf16 %v7198_v63  ;;  %v668_v45 = vsel %vm664_vm1, %v5553_v12, %v5683_v42 }
  0xf2   : > { %v675_v2 = vsel %vm664_vm1, %v5682_v35, %v9435_v1  ;;  %v669_v10 = vsel %vm664_vm1, %v5683_v42, %v9432_v52  ;;  %v7228_v61 = vpop.permute.xlu2 %5735 }
  0xf3   : > { %991 = vmatpush.msrb.mxu2 %v722_v4  ;;  %v5738_v27 = vunpack.i.h.bf16 %v7228_v61 }
  0xf5   : > { %992 = vmatpush.msrb.mxu2 %v675_v2  ;;  %v5707_v2 = vunpack.i.l.bf16 %v7166_v33 }
  0xf6   : > { %v7203_v19 = vpop.permute.xlu0 %5695 }
  0xf7   : > { %993 = vmatpush.msrb.mxu2 %v669_v10  ;;  %v7205_v25 = vpop.permute.xlu1 %5700  ;;  %v5723_v10 = vunpack.i.h.bf16 %v7198_v63  ;;  %v574_v53 = vsel %vm564_vm4, %v5707_v2, %v9436_v51 }
  0xf8   : > { %v9437_v32 = vunpack.i.h.bf16 %v7205_v25  ;;  %v9434_v56 = vunpack.i.l.bf16 %v7205_v25  ;;  %825 = vmatmul.f32.gmra.mxu0 %v7186_v0  ;;  %871 = vmatmul.f32.gmra.mxu2 %v7186_v0 }
  0xfa   : > { %v621_v4 = vsel %vm611_vm3, %v5692_v29, %v9434_v56  ;;  %v616_v24 = vsel %vm611_vm3, %v5693_v21, %v9437_v32  ;;  %v5697_v29 = vunpack.i.l.bf16 %v7203_v19 }
  0xfb   : > { %994 = vmatpush.msrb.mxu2 %v621_v4 }
  0xfc   : > { %v729_v59 = vsel %vm717_vm0, %v5667_v6, %v5697_v29 }
  0xfd   : > { %995 = vmatpush.msrb.mxu2 %v616_v24  ;;  %v569_v24 = vsel %vm564_vm4, %v5708_v43, %v5723_v10 }
  0xfe   : > { %v7223_v52 = vpop.permute.xlu0 %5710 }
  0xff   : > { %v5713_v4 = vunpack.i.h.bf16 %v7223_v52  ;;  %v5712_v56 = vunpack.i.l.bf16 %v7223_v52  ;;  %v7232_v1 = vpop.permute.xlu1 %5715  ;;  %996 = vmatpush.msrb.mxu2 %v574_v53  ;;  %v727_v52 = vsel %vm717_vm0, %v5523_v54, %v5652_v8  ;;  %v674_v54 = vsel %vm664_vm1, %v5543_v3, %v5682_v35 }
 0x101   : > { %997 = vmatpush.msrb.mxu2 %v569_v24  ;;  %v779_v51 = vsel %vm770_vm2, %v5627_v49, %v5712_v56  ;;  %v773_v32 = vsel %vm770_vm2, %v5628_v48, %v5713_v4  ;;  %v7252_v24 = vpop.permute.xlu2 %5750 }
 0x102   : > { %935 = vmatpush.msrb.mxu3 %v779_v51  ;;  %v5753_v3 = vunpack.i.h.bf16 %v7252_v24  ;;  %v5752_v62 = vunpack.i.l.bf16 %v7252_v24  ;;  %v573_v24 = vsel %vm564_vm4, %v5583_v46, %v5707_v2  ;;  %v5717_v2 = vunpack.i.l.bf16 %v7232_v1 }
 0x104   : > { %936 = vmatpush.msrb.mxu3 %v773_v32  ;;  %v774_v46 = vsel %vm770_vm2, %v5713_v4, %v5752_v62 }
 0x105   : > { %5327 = vmatmul.msk.f32.vlgmr.msrb.gmra.mxu3 %vm799_vm7, %v7112_v57 }
 0x106   : > { %944 = vmatpush.msra.mxu3 %v727_v52  ;;  %v7250_v53 = vpop.permute.xlu0 %5725 }
 0x107   : > { %v5727_v49 = vunpack.i.l.bf16 %v7250_v53  ;;  %v7255_v51 = vpop.permute.xlu1 %5730  ;;  %v5728_v48 = vunpack.i.h.bf16 %v7250_v53  ;;  %v615_v53 = vsel %vm611_vm3, %v5573_v20, %v5693_v21 }
 0x108   : > { %v5733_v32 = vunpack.i.h.bf16 %v7255_v51  ;;  %v5732_v40 = vunpack.i.l.bf16 %v7255_v51  ;;  %945 = vmatpush.msra.mxu3 %v721_v47  ;;  %v5737_v47 = vunpack.i.l.bf16 %v7228_v61 }
 0x109   : > { %v5766_v12 = vpop.permute.xlu2 %5765  ;;  %v526_v33 = vsel %vm517_vm5, %v5613_v31, %v5727_v49  ;;  %v521_v30 = vsel %vm517_vm5, %v5623_v39, %v5728_v48  ;;  %v9455_v39 = vunpack.i.l.bf16 %v7177_v50 }
 0x10a   : > { %946 = vmatpush.msra.mxu3 %v674_v54  ;;  %v527_v8 = vsel %vm517_vm5, %v5727_v49, %v5732_v40  ;;  %v522_v55 = vsel %vm517_vm5, %v5728_v48, %v5733_v32  ;;  %v5767_v20 = vunpack.i.l.bf16 %v5766_v12  ;;  %v5768_v61 = vunpack.i.h.bf16 %v5766_v12 }
 0x10b   : > { %998 = vmatpush.msrb.mxu2 %v527_v8  ;;  %v479_v38 = vsel %vm470_vm6, %v5638_v5, %v5737_v47  ;;  %v676_v15 = vsel %vm664_vm1, %v9455_v39, %v5717_v2  ;;  %v9457_v12 = vunpack.i.h.bf16 %v7177_v50  ;;  %v9458_v5 = vunpack.i.h.bf16 %v7088_v37 }
 0x10c   : > { %947 = vmatpush.msra.mxu3 %v668_v45  ;;  %v775_v45 = vsel %vm770_vm2, %v5752_v62, %v5753_v3  ;;  %v9456_v62 = vunpack.i.h.bf16 %v7071_v11  ;;  %v9460_v11 = vunpack.i.h.bf16 %v7124_v58  ;;  %v9462_v37 = vunpack.i.l.bf16 %v7198_v63 }
 0x10d   : > { %999 = vmatpush.msrb.mxu2 %v522_v55  ;;  %5328 = vmatmul.msk.f32.gmra.mxu3 %vm799_vm7, %v7145_v36  ;;  %v5698_v55 = vunpack.i.h.bf16 %v7203_v19  ;;  %v5718_v19 = vunpack.i.h.bf16 %v7232_v1  ;;  %v776_v1 = vsel %vm770_vm2, %v5753_v3, %v5768_v61 }
 0x10e   : > { %948 = vmatpush.msra.mxu3 %v620_v23  ;;  %v5741_v26 = vpop.permute.xlu0 %5740  ;;  %v474_v3 = vsel %vm470_vm6, %v9456_v62, %v5738_v27 }
 0x10f   : > { %v5743_v35 = vunpack.i.h.bf16 %v5741_v26  ;;  %v5742_v42 = vunpack.i.l.bf16 %v5741_v26  ;;  %v7282_v52 = vpop.permute.xlu1 %5745  ;;  %v723_v31 = vsel %vm717_vm0, %v5668_v34, %v5698_v55  ;;  %v670_v41 = vsel %vm664_vm1, %v9457_v12, %v5718_v19 }
 0x110   : > { %v5748_v22 = vunpack.i.h.bf16 %v7282_v52  ;;  %v5747_v28 = vunpack.i.l.bf16 %v7282_v52  ;;  %949 = vmatpush.msra.mxu3 %v615_v53  ;;  %v9461_v53 = vunpack.i.h.bf16 %v7205_v25 }
 0x111   : > { %v780_v54 = vsel %vm770_vm2, %v5712_v56, %v5742_v42  ;;  %v781_v8 = vsel %vm770_vm2, %v5742_v42, %v5743_v35  ;;  %v782_v60 = vsel %vm770_vm2, %v5743_v35, %v5767_v20  ;;  %v9459_v42 = vunpack.i.l.bf16 %v7205_v25 }
 0x112   : > { %950 = vmatpush.msra.mxu3 %v573_v24  ;;  %981 = vmatpush.msrb.mxu0 %v780_v54  ;;  %v480_v21 = vsel %vm470_vm6, %v5737_v47, %v5747_v28  ;;  %v475_v56 = vsel %vm470_vm6, %v5738_v27, %v5748_v22 }
 0x113   : > { %1000 = vmatpush.msrb.mxu2 %v480_v21  ;;  %1027 = vmatpush.msra.mxu1 %v781_v8 }
 0x114   : > { %951 = vmatpush.msra.mxu3 %v568_v44  ;;  %982 = vmatpush.msrb.mxu0 %v774_v46 }
 0x115   : > { %1001 = vmatpush.msrb.mxu2 %v475_v56  ;;  %1028 = vmatpush.msra.mxu1 %v775_v45 }
 0x116   : > { %952 = vmatpush.msra.mxu3 %v526_v33  ;;  %1036 = vmatpush.msra.mxu0 %v729_v59  ;;  %v5756_v43 = vpop.permute.xlu0 %5755 }
 0x117   : > { %1073 = vmatpush.msrb.mxu1 %v782_v60  ;;  %v5757_v4 = vunpack.i.l.bf16 %v5756_v43  ;;  %v5761_v23 = vpop.permute.xlu1 %5760  ;;  %5329 = vmatmul.msk.f32.vlgmr.msrb.gmra.mxu0 %vm799_vm7, %v7112_v57  ;;  %v5758_v6 = vunpack.i.h.bf16 %v5756_v43 }
 0x118   : > { %v5763_v49 = vunpack.i.h.bf16 %v5761_v23  ;;  %v5762_v26 = vunpack.i.l.bf16 %v5761_v23  ;;  %953 = vmatpush.msra.mxu3 %v521_v30  ;;  %1037 = vmatpush.msra.mxu0 %v723_v31 }
 0x119   : > { %1074 = vmatpush.msrb.mxu1 %v776_v1  ;;  %v432_v35 = vsel %vm423_vm8, %v9458_v5, %v5757_v4  ;;  %v427_v50 = vsel %vm423_vm8, %v9460_v11, %v5758_v6 }
 0x11a   : > { %954 = vmatpush.msra.mxu3 %v479_v38  ;;  %1038 = vmatpush.msra.mxu0 %v676_v15  ;;  %v433_v34 = vsel %vm423_vm8, %v5757_v4, %v5762_v26  ;;  %v428_v48 = vsel %vm423_vm8, %v5758_v6, %v5763_v49 }
 0x11b   : > { %1002 = vmatpush.msrb.mxu2 %v433_v34  ;;  %5331 = vmatmul.msk.f32.vlgmr.msra.gmra.mxu1 %vm799_vm7, %v7112_v57 }
 0x11c   : > { %955 = vmatpush.msra.mxu3 %v474_v3  ;;  %1039 = vmatpush.msra.mxu0 %v670_v41 }
 0x11d   : > { %1003 = vmatpush.msrb.mxu2 %v428_v48 }
 0x11e   : > { %956 = vmatpush.msra.mxu3 %v432_v35  ;;  %1040 = vmatpush.msra.mxu0 %v9459_v42 }
 0x11f   : > { %1004 = vmatpush.msrb.mxu2 %v6924_v14  ;;  %5330 = vmatmul.msk.f32.gmra.mxu0 %vm799_vm7, %v7145_v36 }
 0x120   : > { %957 = vmatpush.msra.mxu3 %v427_v50  ;;  %1041 = vmatpush.msra.mxu0 %v9461_v53 }
 0x121   : > { %1005 = vmatpush.msrb.mxu2 %v6921_v13 }
 0x122   : > { %958 = vmatpush.msra.mxu3 %v6882_v7  ;;  %1006 = vmatmul.f32.vlgmr.msrb.gmra.mxu2 %v7161_v18 }
 0x123   : > { %1042 = vmatpush.msra.mxu0 %v9462_v37  ;;  %5332 = vmatmul.msk.f32.gmra.mxu1 %vm799_vm7, %v7145_v36 }
 0x124   : > { %959 = vmatpush.msra.mxu3 %v6888_v9 }
 0x125   : > { %1043 = vmatpush.msra.mxu0 %v5723_v10  ;;  %960 = vmatmul.f32.vlgmr.msra.gmra.mxu3 %v7161_v18 }
 0x127   : > { %1044 = vmatpush.msra.mxu0 %v5732_v40 }
 0x129   : > { %1045 = vmatpush.msra.mxu0 %v5733_v32 }
 0x12a   : > { %1009 = vmatmul.f32.gmra.mxu2 %v7186_v0 }
 0x12b   : > { %1046 = vmatpush.msra.mxu0 %v5747_v28  ;;  %5333 = vmatmul.msk.f32.vlgmr.msrb.gmra.mxu1 %vm799_vm7, %v7112_v57 }
 0x12d   : > { %1047 = vmatpush.msra.mxu0 %v5748_v22  ;;  %963 = vmatmul.f32.gmra.mxu3 %v7186_v0 }
 0x12f   : > { %1048 = vmatpush.msra.mxu0 %v5762_v26 }
 0x131   : > { %1049 = vmatpush.msra.mxu0 %v5763_v49 }
 0x133   : > { %1050 = vmatpush.msra.mxu0 %v6938_v17  ;;  %5334 = vmatmul.msk.f32.gmra.mxu1 %vm799_vm7, %v7145_v36 }
 0x135   : > { %1051 = vmatpush.msra.mxu0 %v6935_v16  ;;  %v1082_v16 = vld [vmem:[%s9425_s4] sm:$0x3f] }
 0x136   : > { %1052 = vmatmul.f32.vlgmr.msra.gmra.mxu0 %v7161_v18  ;;  %v1085_v52 = vperm.slane %v1082_v16, 1  ;;  %v1086_v24 = vperm.slane %v1082_v16, 2  ;;  %v1087_v20 = vperm.slane %v1082_v16, 3  ;;  %v1088_v23 = vperm.slane %v1082_v16, 4 }
 0x137   : > { %v1089_v31 = vperm.slane %v1082_v16, 5 }
 0x13e   : > { %1055 = vmatmul.f32.gmra.mxu0 %v7186_v0  ;;  %v1084_v0 = vperm.slane %v1082_v16, 0 }
 0x13f   : > { %v846_v7 = vpop.f32.mrf.mxu1 }
 0x14c   : > { %v849_v9 = vpop.f32.mrf.mxu1 }
 0x159   : > { %v892_v13 = vpop.f32.mrf.mxu3 }
 0x161   : > { %v895_v57 = vpop.f32.mrf.mxu3 }
 0x162   : > { %v915_v14 = vpop.f32.mrf.mxu1 }
 0x16b   : > { %v918_v63 = vpop.f32.mrf.mxu1 }
 0x16d   : > { %v823_v58 = vpop.f32.mrf.mxu0 }
 0x16e   : > { %v7390_v22 = vadd.f32 %v846_v7, %v823_v58 }
 0x170   : > { %v1096_v55 = vmul.f32 %v1084_v0, %v7390_v22 }
 0x172   : > { %v1125_v58 = vmul.f32 %v1096_v55, %v7390_v22 }
 0x173   : > { %v869_v51 = vpop.f32.mrf.mxu2 }
 0x174   : > { %v7392_v28 = vadd.f32 %v892_v13, %v869_v51 }
 0x175   : > { %v826_v10 = vpop.f32.mrf.mxu0 }
 0x176   : > { %v7398_v21 = vadd.f32 %v849_v9, %v826_v10  ;;  %v1097_v44 = vmul.f32 %v1085_v52, %v7392_v28 }
 0x178   : > { %v1108_v61 = vadd.f32 %v1097_v44, %v1096_v55  ;;  %v1102_v59 = vmul.f32 %v1084_v0, %v7398_v21 }
 0x17a   : > { %v1131_v1 = vmul.f32 %v1102_v59, %v7398_v21 }
 0x17b   : > { %v872_v36 = vpop.f32.mrf.mxu2 }
 0x17c   : > { %v7400_v45 = vadd.f32 %v895_v57, %v872_v36 }
 0x17e   : > { %v1103_v60 = vmul.f32 %v1085_v52, %v7400_v45 }
 0x180   : > { %v1132_v15 = vmul.f32 %v1103_v60, %v7400_v45  ;;  %v1117_v3 = vadd.f32 %v1103_v60, %v1102_v59 }
 0x182   : > { %v1145_v42 = vadd.f32 %v1132_v15, %v1131_v1 }
 0x188   : > { %v938_v25 = vpop.f32.mrf.mxu3 }
 0x189   : > { %v7394_v29 = vadd.f32 %v938_v25, %v915_v14 }
 0x18b   : > { %v1098_v46 = vmul.f32 %v1086_v24, %v7394_v29 }
 0x18d   : > { %v1109_v30 = vadd.f32 %v1108_v61, %v1098_v46  ;;  %v1127_v51 = vmul.f32 %v1098_v46, %v7394_v29 }
 0x190   : > { %v941_v40 = vpop.f32.mrf.mxu3 }
 0x191   : > { %v7405_v56 = vadd.f32 %v941_v40, %v918_v63  ;;  %v1126_v63 = vmul.f32 %v1097_v44, %v7392_v28 }
 0x193   : > { %v1104_v6 = vmul.f32 %v1086_v24, %v7405_v56  ;;  %v1137_v16 = vadd.f32 %v1126_v63, %v1125_v58 }
 0x194   : > { %v984_v32 = vpop.f32.mrf.mxu0 }
 0x195   : > { %v1133_v12 = vmul.f32 %v1104_v6, %v7405_v56  ;;  %v1118_v37 = vadd.f32 %v1117_v3, %v1104_v6 }
 0x197   : > { %v1146_v14 = vadd.f32 %v1145_v42, %v1133_v12 }
 0x198   : > { %v1030_v17 = vpop.f32.mrf.mxu1 }
 0x19c   : > { %v987_v54 = vpop.f32.mrf.mxu0 }
 0x1a0   : > { %v1033_v18 = vpop.f32.mrf.mxu1 }
 0x1a5   : > { %v1007_v8 = vpop.f32.mrf.mxu2 }
 0x1a6   : > { %v7410_v19 = vadd.f32 %v1030_v17, %v1007_v8 }
 0x1a8   : > { %v961_v47 = vpop.f32.mrf.mxu3  ;;  %v1076_v33 = vpop.f32.mrf.mxu1  ;;  %v1100_v48 = vmul.f32 %v1088_v23, %v7410_v19 }
 0x1a9   : > { %v7396_v27 = vadd.f32 %v984_v32, %v961_v47 }
 0x1aa   : > { %v1129_v55 = vmul.f32 %v1100_v48, %v7410_v19 }
 0x1ab   : > { %v1099_v2 = vmul.f32 %v1087_v20, %v7396_v27 }
 0x1ad   : > { %v1110_v26 = vadd.f32 %v1109_v30, %v1099_v2  ;;  %v1010_v38 = vpop.f32.mrf.mxu2 }
 0x1ae   : > { %v7423_v41 = vadd.f32 %v1033_v18, %v1010_v38  ;;  %v1128_v18 = vmul.f32 %v1099_v2, %v7396_v27  ;;  %v1153_v2 = vld [vmem:[#allocation6] sm:$0xff] }
 0x1af   : > { %v1111_v5 = vadd.f32 %v1110_v26, %v1100_v48 }
 0x1b0   : > { %v964_v43 = vpop.f32.mrf.mxu3  ;;  %v1079_v50 = vpop.f32.mrf.mxu1  ;;  %v1106_v9 = vmul.f32 %v1088_v23, %v7423_v41 }
 0x1b1   : > { %v7412_v4 = vadd.f32 %v987_v54, %v964_v43  ;;  %v1138_v54 = vadd.f32 %v1137_v16, %v1127_v51  ;;  %v1154_v43 = vld [vmem:[#allocation6 + $0x8] sm:$0xff]  ;;  %v1240_v51 = vld [vmem:[#allocation4 + $0x10] sm:$0xff] }
 0x1b2   : > { %v1135_v32 = vmul.f32 %v1106_v9, %v7423_v41 }
 0x1b3   : > { %v1053_v49 = vpop.f32.mrf.mxu0  ;;  %v1105_v34 = vmul.f32 %v1087_v20, %v7412_v4  ;;  %v1139_v20 = vadd.f32 %v1138_v54, %v1128_v18  ;;  %v1241_v18 = vld [vmem:[#allocation4 + $0x18] sm:$0xff] }
 0x1b4   : > { %v7416_v39 = vadd.f32 %v1076_v33, %v1053_v49 }
 0x1b5   : > { %v1134_v11 = vmul.f32 %v1105_v34, %v7412_v4  ;;  %v1119_v13 = vadd.f32 %v1118_v37, %v1105_v34  ;;  %v1140_v46 = vadd.f32 %v1139_v20, %v1129_v55 }
 0x1b6   : > { %v1101_v62 = vmul.f32 %v1089_v31, %v7416_v39 }
 0x1b7   : > { %v1147_v25 = vadd.f32 %v1146_v14, %v1134_v11  ;;  %v1120_v17 = vadd.f32 %v1119_v13, %v1106_v9  ;;  %v1235_v9 = vld [vmem:[#allocation4] sm:$0xff] }
 0x1b8   : > { %v1113_v35 = vsel %vm1112_vm9, %v1101_v62, 0.0  ;;  %v1130_v8 = vmul.f32 %v1101_v62, %v7416_v39 }
 0x1b9   : > { %v1114_v53 = vadd.f32 %v1113_v35, %v1111_v5  ;;  %v1148_v52 = vadd.f32 %v1147_v25, %v1135_v32  ;;  %v1236_v32 = vld [vmem:[#allocation4 + $0x8] sm:$0xff] }
 0x1ba   : > { %v1141_v44 = vsel %vm1112_vm9, %v1130_v8, 0.0 }
 0x1bb   : > { %v1056_v7 = vpop.f32.mrf.mxu0  ;;  %1115 = vadd.xlane.f32.xlu1 %v1114_v53  ;;  %v1142_v61 = vadd.f32 %v1141_v44, %v1140_v46 }
 0x1bc   : > { %v7428_v57 = vadd.f32 %v1079_v50, %v1056_v7 }
 0x1be   : > { %v1107_v10 = vmul.f32 %v1089_v31, %v7428_v57  ;;  %v6735_v31 = vmov 0  }
 0x1bf   : > { %5769 = vset.pattern.permute.xlu1 %v6735_v31  ;;  %5770 = vset.pattern.permute.xlu0 %v6735_v31 }
 0x1c0   : > { %v1121_v40 = vsel %vm1112_vm9, %v1107_v10, 0.0  ;;  %v1136_v36 = vmul.f32 %v1107_v10, %v7428_v57  ;;  %5771 = vset.pattern.permute.xlu2 %v6735_v31 }
 0x1c1   : > { %v1122_v0 = vadd.f32 %v1121_v40, %v1120_v17 }
 0x1c2   : > { %v1149_v47 = vsel %vm1112_vm9, %v1136_v36, 0.0 }
 0x1c3   : > { %1123 = vadd.xlane.f32.xlu0 %v1122_v0  ;;  %v1150_v24 = vadd.f32 %v1149_v47, %v1148_v52 }
 0x1c5   : > { %1151 = vadd.xlane.f32.xlu2 %v1150_v24 }
 0x1cd   : > { %1143 = vadd.xlane.f32.xlu2 %v1142_v61 }
 0x22e   : > { %v1116_v59 = vpop.xlane.xlu1 %1115 }
 0x236   : > { %v1124_v33 = vpop.xlane.xlu0 %1123 }
 0x237   : > { %1175 = vmatpush.msrb.mxu3 %v1124_v33 }
 0x238   : > { %v1152_v60 = vpop.xlane.xlu2 %1151 }
 0x239   : > { %1176 = vmatpush.msrb.mxu3 %v1116_v59  ;;  %1198 = vmatpush.msra.mxu2 %v1152_v60 }
 0x23a   : > { %5335 = vmatmul.msk.f32.vlgmr.msrb.gmra.mxu3 %vm799_vm7, %v1153_v2 }
 0x240   : > { %v1144_v23 = vpop.xlane.xlu2 %1143 }
 0x241   : > { %1199 = vmatpush.msra.mxu2 %v1144_v23 }
 0x242   : > { %5337 = vmatmul.msk.f32.vlgmr.msra.gmra.mxu2 %vm799_vm7, %v1153_v2  ;;  %5336 = vmatmul.msk.f32.gmra.mxu3 %vm799_vm7, %v1154_v43 }
 0x24a   : > { %5338 = vmatmul.msk.f32.gmra.mxu2 %vm799_vm7, %v1154_v43 }
 0x2bd   : > { %v1178_v30 = vpop.f32.mrf.mxu3 }
 0x2be   : > { %v1207_v6 = vmul.f32 %v1178_v30, %v1178_v30 }
 0x2c5   : > { %v1201_v49 = vpop.f32.mrf.mxu2  ;;  %v1181_v1 = vpop.f32.mrf.mxu3 }
 0x2c6   : > { %v1209_v26 = vsub.f32 %v1201_v49, %v1207_v6  ;;  %v1208_v34 = vmul.f32 %v1181_v1, %v1181_v1 }
 0x2c8   : > { %v1211_v38 = vmax.f32 %v1209_v26, 0.0 }
 0x2ca   : > { %v1213_v15 = vadd.f32 1e-05, %v1211_v38 }
 0x2cc   : > { %6547 = vrsqrt.f32 %v1213_v15  ;;  %vm1221_vm11 = vweird.f32 %v1213_v15 }
 0x2cd   : > { %v1204_v48 = vpop.f32.mrf.mxu2 }
 0x2ce   : > { %v1210_v62 = vsub.f32 %v1204_v48, %v1208_v34 }
 0x2d0   : > { %v1212_v3 = vmax.f32 %v1210_v62, 0.0 }
 0x2d2   : > { %v6548_v12 = vpop.eup %6547  ;;  %v1214_v5 = vadd.f32 1e-05, %v1212_v3 }
 0x2d3   : > { %v1216_v35 = vmul.f32 %v6548_v12, %v1213_v15  ;;  %vm1222_vm10 = vweird.f32 %v6548_v12 }
 0x2d4   : > { %6549 = vrsqrt.f32 %v1214_v5  ;;  %vm1223_vm12 = vmor %vm1221_vm11, %vm1222_vm10  ;;  %vm1231_vm13 = vweird.f32 %v1214_v5 }
 0x2d5   : > { %v1217_v42 = vmul.f32 %v6548_v12, %v1216_v35 }
 0x2d7   : > { %v1218_v11 = vmul.f32 0.5, %v1217_v42 }
 0x2d9   : > { %v1219_v50 = vsub.f32 1.5, %v1218_v11 }
 0x2da   : > { %v6550_v53 = vpop.eup %6549 }
 0x2db   : > { %v1226_v37 = vmul.f32 %v6550_v53, %v1214_v5  ;;  %v1220_v7 = vmul.f32 %v6548_v12, %v1219_v50  ;;  %vm1232_vm14 = vweird.f32 %v6550_v53 }
 0x2dc   : > { %vm1233_vm15 = vmor %vm1231_vm13, %vm1232_vm14 }
 0x2dd   : > { %v1227_v13 = vmul.f32 %v6550_v53, %v1226_v37  ;;  %v1224_v14 = vsel %vm1223_vm12, %v6548_v12, %v1220_v7 }
 0x2de   : > { %v1237_v58 = vmul.f32 %v1235_v9, %v1224_v14 }
 0x2df   : > { %v1228_v63 = vmul.f32 0.5, %v1227_v13 }
 0x2e0   : > { %1248 = vperm.xlu1 %5769, %v1237_v58   ;;  %v1242_v10 = vmul.f32 %v1237_v58, %v1178_v30 }
 0x2e1   : > { %v1229_v25 = vsub.f32 1.5, %v1228_v63 }
 0x2e2   : > { %v1244_v36 = vsub.f32 %v1240_v51, %v1242_v10 }
 0x2e3   : > { %v1230_v17 = vmul.f32 %v6550_v53, %v1229_v25 }
 0x2e5   : > { %v1234_v40 = vsel %vm1233_vm15, %v6550_v53, %v1230_v17 }
 0x2e6   : > { %v1238_v16 = vmul.f32 %v1236_v32, %v1234_v40 }
 0x2e8   : > { %1270 = vperm.xlu1 %5769, %v1244_v36   ;;  %1253 = vperm.xlu0 %5770, %v1238_v16   ;;  %v1243_v0 = vmul.f32 %v1238_v16, %v1181_v1 }
 0x2ea   : > { %v1245_v52 = vsub.f32 %v1241_v18, %v1243_v0 }
 0x2ec   : > { %1275 = vperm.xlu2 %5771, %v1245_v52  }
 0x346   : > { %v1276_v59 = vpop.permute.xlu2 %1275 }
 0x352   : > { %v7446_v47 = vpop.permute.xlu1 %1248 }
 0x353   : > { %v1257_v24 = vmul.f32 %v7446_v47, %v7392_v28  ;;  %v1258_v54 = vmul.f32 %v7446_v47, %v7394_v29  ;;  %v1256_v60 = vmul.f32 %v7446_v47, %v7390_v22  ;;  %v1259_v1 = vmul.f32 %v7446_v47, %v7396_v27 }
 0x354   : > { %v1260_v62 = vmul.f32 %v7446_v47, %v7410_v19  ;;  %v1261_v42 = vmul.f32 %v7446_v47, %v7416_v39 }
 0x35a   : > { %v7452_v8 = vpop.permute.xlu1 %1270  ;;  %v1254_v61 = vpop.permute.xlu0 %1253 }
 0x35b   : > { %v7455_v20 = vadd.f32 %v7452_v8, %v1257_v24  ;;  %v7458_v55 = vadd.f32 %v7452_v8, %v1258_v54  ;;  %v1262_v29 = vmul.f32 %v1254_v61, %v7398_v21  ;;  %v1263_v33 = vmul.f32 %v1254_v61, %v7400_v45 }
 0x35c   : > { %v1264_v2 = vmul.f32 %v1254_v61, %v7405_v56  ;;  %v7481_v31 = vadd.f32 %v7452_v8, %v1256_v60  ;;  %v1265_v26 = vmul.f32 %v1254_v61, %v7412_v4  ;;  %v7507_v15 = vadd.f32 %v7452_v8, %v1259_v1 }
 0x35d   : > { %v9446_v44 = vmax.f32 %v7455_v20, 0.0  ;;  %v9444_v46 = vmax.f32 %v7458_v55, 0.0  ;;  %v7474_v43 = vadd.f32 %v1276_v59, %v1262_v29  ;;  %v7476_v23 = vadd.f32 %v1276_v59, %v1263_v33 }
 0x35e   : > { %v7478_v30 = vadd.f32 %v1276_v59, %v1264_v2  ;;  %v1290_v22 = vmax.f32 %v7481_v31, 0.0  ;;  %v7504_v38 = vadd.f32 %v1276_v59, %v1265_v26  ;;  %v9442_v4 = vmax.f32 %v7507_v15, 0.0 }
 0x35f   : > { %v5787_v28 = vpack.i.bf16 %v9444_v46, %v9446_v44  ;;  %v1296_v21 = vmax.f32 %v7474_v43, 0.0  ;;  %v1297_v45 = vmax.f32 %v7476_v23, 0.0  ;;  %v1266_v48 = vmul.f32 %v1254_v61, %v7423_v41 }
 0x360   : > { %v9445_v56 = vmax.f32 %v7478_v30, 0.0  ;;  %v9443_v34 = vmax.f32 %v7504_v38, 0.0  ;;  %v7527_v12 = vadd.f32 %v7452_v8, %v1260_v62  ;;  %v1267_v35 = vmul.f32 %v1254_v61, %v7428_v57 }
 0x361   : > { %5788 = vrot.lane.b32.xlu1 %v5787_v28, %s6731_s21  ;;  %5783 = vrot.lane.b32.xlu0 %v5787_v28, %s6729_s19  ;;  %v5822_v49 = vpack.i.bf16 %v1297_v45, %v1296_v21  ;;  %v7524_v3 = vadd.f32 %v1276_v59, %v1266_v48  ;;  %v7553_v50 = vadd.f32 %v7452_v8, %v1261_v42  ;;  %v9463_v23 = vmax.f32 %v7455_v20, 0.0 }
 0x362   : > { %5773 = vrot.lane.b32.xlu2 %v5787_v28, %s6728_s18  ;;  %v5817_v6 = vpack.i.bf16 %v1290_v22, %v9445_v56  ;;  %v5857_v27 = vpack.i.bf16 %v9442_v4, %v9443_v34  ;;  %v9440_v41 = vmax.f32 %v7527_v12, 0.0  ;;  %v7550_v11 = vadd.f32 %v1276_v59, %v1267_v35 }
 0x363   : > { %v9441_v5 = vmax.f32 %v7524_v3, 0.0  ;;  %v9438_v57 = vmax.f32 %v7553_v50, 0.0 }
 0x364   : > { %v9439_v53 = vmax.f32 %v7550_v11, 0.0 }
 0x365   : > { %v5872_v19 = vpack.i.bf16 %v9440_v41, %v9441_v5 }
 0x366   : > { %v5932_v39 = vpack.i.bf16 %v9438_v57, %v9439_v53 }
 0x369   : > { %5798 = vrot.lane.b32.xlu1 %v5787_v28, %s6733_s23  ;;  %5793 = vrot.lane.b32.xlu0 %v5787_v28, %s6732_s22 }
 0x36a   : > { %5778 = vrot.lane.b32.xlu2 %v5787_v28, %s6727_s17 }
 0x371   : > { %5818 = vrot.lane.b32.xlu1 %v5817_v6, %s6728_s18  ;;  %5823 = vrot.lane.b32.xlu0 %v5822_v49, %s6727_s17 }
 0x372   : > { %5803 = vrot.lane.b32.xlu2 %v5787_v28, %s6730_s20 }
 0x379   : > { %5828 = vrot.lane.b32.xlu1 %v5817_v6, %s6727_s17  ;;  %5833 = vrot.lane.b32.xlu0 %v5822_v49, %s6729_s19 }
 0x37a   : > { %5808 = vrot.lane.b32.xlu2 %v5787_v28, %s6734_s24 }
 0x381   : > { %5838 = vrot.lane.b32.xlu1 %v5817_v6, %s6729_s19  ;;  %5858 = vrot.lane.b32.xlu0 %v5857_v27, %s6727_s17 }
 0x382   : > { %5813 = vrot.lane.b32.xlu2 %v5822_v49, %s6728_s18 }
 0x389   : > { %5848 = vrot.lane.b32.xlu1 %v5822_v49, %s6731_s21  ;;  %5868 = vrot.lane.b32.xlu0 %v5817_v6, %s6732_s22 }
 0x38a   : > { %5843 = vrot.lane.b32.xlu2 %v5857_v27, %s6728_s18 }
 0x391   : > { %5873 = vrot.lane.b32.xlu1 %v5872_v19, %s6728_s18  ;;  %5893 = vrot.lane.b32.xlu0 %v5872_v19, %s6727_s17 }
 0x392   : > { %5853 = vrot.lane.b32.xlu2 %v5817_v6, %s6731_s21 }
 0x399   : > { %5883 = vrot.lane.b32.xlu1 %v5822_v49, %s6733_s23  ;;  %5908 = vrot.lane.b32.xlu0 %v5817_v6, %s6730_s20 }
 0x39a   : > { %5863 = vrot.lane.b32.xlu2 %v5822_v49, %s6732_s22 }
 0x3a1   : > { %5898 = vrot.lane.b32.xlu1 %v5857_v27, %s6731_s21  ;;  %5913 = vrot.lane.b32.xlu0 %v5822_v49, %s6734_s24 }
 0x3a2   : > { %5878 = vrot.lane.b32.xlu2 %v5857_v27, %s6729_s19 }
 0x3a9   : > { %5918 = vrot.lane.b32.xlu1 %v5817_v6, %s6734_s24  ;;  %5928 = vrot.lane.b32.xlu0 %v5857_v27, %s6732_s22 }
 0x3aa   : > { %5888 = vrot.lane.b32.xlu2 %v5817_v6, %s6733_s23 }
 0x3b1   : > { %5933 = vrot.lane.b32.xlu1 %v5932_v39, %s6728_s18  ;;  %5938 = vrot.lane.b32.xlu0 %v5872_v19, %s6731_s21 }
 0x3b2   : > { %5903 = vrot.lane.b32.xlu2 %v5822_v49, %s6730_s20 }
 0x3b9   : > { %5943 = vrot.lane.b32.xlu1 %v5857_v27, %s6733_s23  ;;  %5953 = vrot.lane.b32.xlu0 %v5872_v19, %s6732_s22 }
 0x3ba   : > { %5923 = vrot.lane.b32.xlu2 %v5872_v19, %s6729_s19 }
 0x3bc   : > { %v7570_v37 = vpop.permute.xlu2 %5773 }
 0x3bd   : > { %v5776_v40 = vunpack.i.h.bf16 %v7570_v37  ;;  %v5775_v36 = vunpack.i.l.bf16 %v7570_v37 }
 0x3bf   : > { %v1615_v29 = vsel %vm717_vm0, %v5775_v36, %v5776_v40 }
 0x3c1   : > { %5958 = vrot.lane.b32.xlu1 %v5857_v27, %s6734_s24  ;;  %5968 = vrot.lane.b32.xlu0 %v5872_v19, %s6733_s23 }
 0x3c2   : > { %5948 = vrot.lane.b32.xlu2 %v5932_v39, %s6727_s17 }
 0x3c4   : > { %v7575_v7 = vpop.permute.xlu2 %5778 }
 0x3c5   : > { %v5781_v33 = vunpack.i.h.bf16 %v7575_v7  ;;  %v5780_v2 = vunpack.i.l.bf16 %v7575_v7 }
 0x3c7   : > { %v1569_v35 = vsel %vm664_vm1, %v5780_v2, %v5781_v33 }
 0x3c9   : > { %5973 = vrot.lane.b32.xlu1 %v5932_v39, %s6731_s21  ;;  %5983 = vrot.lane.b32.xlu0 %v5872_v19, %s6734_s24  ;;  %s6741_s21 = smov 120  }
 0x3ca   : > { %5963 = vrot.lane.b32.xlu2 %v5932_v39, %s6729_s19  ;;  %s5439_s19 = sshll.u32 %s9479_s9, 4 }
 0x3cc   : > { %v7580_v9 = vpop.permute.xlu2 %5803 }
 0x3d1   : > { %5988 = vrot.lane.b32.xlu1 %v5932_v39, %s6732_s22  ;;  %5998 = vrot.lane.b32.xlu0 %v5932_v39, %s6733_s23 }
 0x3d2   : > { %5978 = vrot.lane.b32.xlu2 %v5857_v27, %s6730_s20 }
 0x3d3   : > { %v7585_v13 = vpop.permute.xlu1 %5788  ;;  %v7587_v14 = vpop.permute.xlu0 %5783 }
 0x3d4   : > { %v7589_v58 = vpop.permute.xlu2 %5808 }
 0x3d5   : > { %v5810_v7 = vunpack.i.l.bf16 %v7589_v58 }
 0x3d9   : > { %6003 = vrot.lane.b32.xlu1 %v5932_v39, %s6734_s24 }
 0x3da   : > { %5993 = vrot.lane.b32.xlu2 %v5872_v19, %s6730_s20 }
 0x3db   : > { %v7593_v63 = vpop.permute.xlu1 %5798  ;;  %v7595_v25 = vpop.permute.xlu0 %5793 }
 0x3dc   : > { %v5814_v10 = vpop.permute.xlu2 %5813  ;;  %v5801_v57 = vunpack.i.h.bf16 %v7593_v63 }
 0x3dd   : > { %v5816_v51 = vunpack.i.h.bf16 %v5814_v10  ;;  %v5815_v17 = vunpack.i.l.bf16 %v5814_v10  ;;  %v5786_v10 = vunpack.i.h.bf16 %v7587_v14 }
 0x3df   : > { %v1619_v32 = vsel %vm717_vm0, %v5815_v17, %v5816_v51 }
 0x3e0   : > { %1693 = vmatpush.msra.mxu1 %v1619_v32 }
 0x3e2   : > { %6008 = vrot.lane.b32.xlu2 %v5932_v39, %s6730_s20 }
 0x3e3   : > { %v7601_v16 = vpop.permute.xlu1 %5818  ;;  %v5824_v18 = vpop.permute.xlu0 %5823 }
 0x3e4   : > { %v5821_v0 = vunpack.i.h.bf16 %v7601_v16  ;;  %v5820_v52 = vunpack.i.l.bf16 %v7601_v16  ;;  %v5826_v47 = vunpack.i.h.bf16 %v5824_v18  ;;  %v5825_v24 = vunpack.i.l.bf16 %v5824_v18  ;;  %v7605_v54 = vpop.permute.xlu2 %5843 }
 0x3e5   : > { %v5846_v44 = vunpack.i.h.bf16 %v7605_v54 }
 0x3e6   : > { %v1614_v8 = vsel %vm717_vm0, %v5821_v0, %v5775_v36  ;;  %v1620_v61 = vsel %vm717_vm0, %v5816_v51, %v5820_v52  ;;  %v1573_v28 = vsel %vm664_vm1, %v5825_v24, %v5826_v47  ;;  %v5785_v51 = vunpack.i.l.bf16 %v7587_v14 }
 0x3e7   : > { %1694 = vmatpush.msra.mxu1 %v1614_v8  ;;  %1739 = vmatpush.msrb.mxu0 %v1620_v61  ;;  %v5791_v24 = vunpack.i.h.bf16 %v7585_v13  ;;  %v5790_v8 = vunpack.i.l.bf16 %v7585_v13  ;;  %v1616_v16 = vsel %vm717_vm0, %v5776_v40, %v5846_v44 }
 0x3e9   : > { %1695 = vmatpush.msra.mxu1 %v1573_v28  ;;  %1740 = vmatpush.msrb.mxu0 %v1615_v29 }
 0x3eb   : > { %v7617_v59 = vpop.permute.xlu1 %5828  ;;  %v5834_v60 = vpop.permute.xlu0 %5833 }
 0x3ec   : > { %v5831_v6 = vunpack.i.h.bf16 %v7617_v59  ;;  %v5830_v49 = vunpack.i.l.bf16 %v7617_v59  ;;  %v5836_v26 = vunpack.i.h.bf16 %v5834_v60  ;;  %v5835_v1 = vunpack.i.l.bf16 %v5834_v60  ;;  %v7621_v27 = vpop.permute.xlu2 %5853 }
 0x3ed   : > { %v5856_v29 = vunpack.i.h.bf16 %v7621_v27 }
 0x3ee   : > { %v1568_v48 = vsel %vm664_vm1, %v5831_v6, %v5780_v2  ;;  %v1574_v62 = vsel %vm664_vm1, %v5826_v47, %v5830_v49  ;;  %v1527_v19 = vsel %vm611_vm3, %v5835_v1, %v5836_v26  ;;  %v1523_v47 = vsel %vm611_vm3, %v5785_v51, %v5786_v10 }
 0x3ef   : > { %1696 = vmatpush.msra.mxu1 %v1568_v48  ;;  %1741 = vmatpush.msrb.mxu0 %v1574_v62  ;;  %v5855_v2 = vunpack.i.l.bf16 %v7621_v27  ;;  %v7794_v27 = vld [vmem:[#allocation2 + $0x20] sm:$0xff] }
 0x3f1   : > { %1697 = vmatpush.msra.mxu1 %v1527_v19  ;;  %1742 = vmatpush.msrb.mxu0 %v1569_v35 }
 0x3f3   : > { %v7631_v42 = vpop.permute.xlu1 %5838  ;;  %v7633_v39 = vpop.permute.xlu0 %5858 }
 0x3f4   : > { %v5841_v17 = vunpack.i.h.bf16 %v7631_v42  ;;  %v5840_v32 = vunpack.i.l.bf16 %v7631_v42  ;;  %v5864_v36 = vpop.permute.xlu2 %5863 }
 0x3f5   : > { %v5865_v48 = vunpack.i.l.bf16 %v5864_v36 }
 0x3f6   : > { %v1522_v18 = vsel %vm611_vm3, %v5841_v17, %v5785_v51  ;;  %v1528_v0 = vsel %vm611_vm3, %v5836_v26, %v5840_v32  ;;  %v5866_v26 = vunpack.i.h.bf16 %v5864_v36  ;;  %v1477_v51 = vsel %vm564_vm4, %v5790_v8, %v5791_v24 }
 0x3f7   : > { %1698 = vmatpush.msra.mxu1 %v1522_v18  ;;  %1743 = vmatpush.msrb.mxu0 %v1528_v0  ;;  %v5796_v17 = vunpack.i.h.bf16 %v7595_v25  ;;  %v5795_v18 = vunpack.i.l.bf16 %v7595_v25  ;;  %v1476_v0 = vsel %vm564_vm4, %v5856_v29, %v5790_v8 }
 0x3f9   : > { %1744 = vmatpush.msrb.mxu0 %v1523_v47  ;;  %v1435_v47 = vsel %vm517_vm5, %v5865_v48, %v5866_v26  ;;  %v1431_v8 = vsel %vm517_vm5, %v5795_v18, %v5796_v17  ;;  %v5806_v48 = vunpack.i.h.bf16 %v7580_v9 }
 0x3fb   : > { %v5849_v61 = vpop.permute.xlu1 %5848  ;;  %v7648_v28 = vpop.permute.xlu0 %5868 }
 0x3fc   : > { %v5851_v60 = vunpack.i.h.bf16 %v5849_v61  ;;  %v5850_v6 = vunpack.i.l.bf16 %v5849_v61  ;;  %v7652_v1 = vpop.permute.xlu2 %5878  ;;  %v5870_v62 = vunpack.i.l.bf16 %v7648_v28  ;;  %v5871_v36 = vunpack.i.h.bf16 %v7648_v28 }
 0x3fd   : > { %v5881_v37 = vunpack.i.h.bf16 %v7652_v1 }
 0x3fe   : > { %v1481_v19 = vsel %vm564_vm4, %v5850_v6, %v5851_v60  ;;  %v1482_v35 = vsel %vm564_vm4, %v5851_v60, %v5855_v2  ;;  %v1436_v61 = vsel %vm517_vm5, %v5866_v26, %v5870_v62  ;;  %v5805_v26 = vunpack.i.l.bf16 %v7580_v9 }
 0x3ff   : > { %1699 = vmatpush.msra.mxu1 %v1481_v19  ;;  %1745 = vmatpush.msrb.mxu0 %v1482_v35  ;;  %v1430_v19 = vsel %vm517_vm5, %v5871_v36, %v5795_v18  ;;  %v5800_v18 = vunpack.i.l.bf16 %v7593_v63 }
 0x401   : > { %1700 = vmatpush.msra.mxu1 %v1476_v0  ;;  %1746 = vmatpush.msrb.mxu0 %v1477_v51 }
 0x403   : > { %v7670_v60 = vpop.permute.xlu1 %5873  ;;  %v7672_v6 = vpop.permute.xlu0 %5893  ;;  %1701 = vmatpush.msra.mxu1 %v1435_v47  ;;  %1747 = vmatpush.msrb.mxu0 %v1436_v61 }
 0x404   : > { %v7678_v29 = vpop.permute.xlu2 %5888 }
 0x405   : > { %1702 = vmatpush.msra.mxu1 %v1430_v19  ;;  %1748 = vmatpush.msrb.mxu0 %v1431_v8  ;;  %v5890_v0 = vunpack.i.l.bf16 %v7678_v29  ;;  %v5891_v19 = vunpack.i.h.bf16 %v7678_v29 }
 0x40b   : > { %v5884_v35 = vpop.permute.xlu1 %5883  ;;  %v7682_v51 = vpop.permute.xlu0 %5908 }
 0x40c   : > { %v5886_v47 = vunpack.i.h.bf16 %v5884_v35  ;;  %v5885_v61 = vunpack.i.l.bf16 %v5884_v35  ;;  %v5910_v36 = vunpack.i.l.bf16 %v7682_v51  ;;  %v5911_v8 = vunpack.i.h.bf16 %v7682_v51  ;;  %v5904_v53 = vpop.permute.xlu2 %5903 }
 0x40d   : > { %v5906_v41 = vunpack.i.h.bf16 %v5904_v53  ;;  %v5905_v5 = vunpack.i.l.bf16 %v5904_v53  ;;  %v5845_v35 = vunpack.i.l.bf16 %v7605_v54  ;;  %v1384_v53 = vsel %vm470_vm6, %v5891_v19, %v5800_v18  ;;  %v7844_v54 = vld [vmem:[#allocation2 + $0x30] sm:$0xff] }
 0x40e   : > { %v1389_v4 = vsel %vm470_vm6, %v5885_v61, %v5886_v47  ;;  %v1390_v34 = vsel %vm470_vm6, %v5886_v47, %v5890_v0  ;;  %v1385_v47 = vsel %vm470_vm6, %v5800_v18, %v5801_v57  ;;  %v7704_v61 = vld [vmem:[#allocation2 + $0x28] sm:$0xff] }
 0x40f   : > { %1703 = vmatpush.msra.mxu1 %v1389_v4  ;;  %1749 = vmatpush.msrb.mxu0 %v1390_v34  ;;  %v1665_v46 = vsel %vm770_vm2, %v5905_v5, %v5906_v41  ;;  %v1666_v56 = vsel %vm770_vm2, %v5906_v41, %v5910_v36  ;;  %v1660_v34 = vsel %vm770_vm2, %v5911_v8, %v5805_v26  ;;  %v5860_v5 = vunpack.i.l.bf16 %v7633_v39 }
 0x410   : > { %1730 = vmatpush.msra.mxu3 %v1665_v46  ;;  %1776 = vmatpush.msrb.mxu2 %v1666_v56  ;;  %v1661_v4 = vsel %vm770_vm2, %v5805_v26, %v5806_v48  ;;  %v1621_v46 = vsel %vm717_vm0, %v5820_v52, %v5845_v35  ;;  %v5861_v26 = vunpack.i.h.bf16 %v7633_v39 }
 0x411   : > { %1704 = vmatpush.msra.mxu1 %v1384_v53  ;;  %1750 = vmatpush.msrb.mxu0 %v1385_v47  ;;  %v5880_v53 = vunpack.i.l.bf16 %v7652_v1  ;;  %v1575_v47 = vsel %vm664_vm1, %v5830_v49, %v5860_v5 }
 0x412   : > { %1731 = vmatpush.msra.mxu3 %v1660_v34  ;;  %1777 = vmatpush.msrb.mxu2 %v1661_v4  ;;  %v1570_v40 = vsel %vm664_vm1, %v5781_v33, %v5861_v26  ;;  %v7743_v34 = vld [vmem:[#allocation2 + $0x38] sm:$0xff] }
 0x413   : > { %v7716_v56 = vpop.permute.xlu1 %5898  ;;  %v5914_v41 = vpop.permute.xlu0 %5913  ;;  %5341 = vmatmul.msk.f32.vlgmr.msrb.gmra.mxu2 %vm799_vm7, %v7704_v61  ;;  %5339 = vmatmul.msk.f32.vlgmr.msra.gmra.mxu3 %vm799_vm7, %v7704_v61  ;;  %v1529_v59 = vsel %vm611_vm3, %v5840_v32, %v5880_v53  ;;  %v1524_v32 = vsel %vm611_vm3, %v5786_v10, %v5881_v37 }
 0x414   : > { %1785 = vmatpush.msrb.mxu3 %v1621_v46  ;;  %v5916_v18 = vunpack.i.h.bf16 %v5914_v41  ;;  %v5915_v19 = vunpack.i.l.bf16 %v5914_v41  ;;  %v7721_v8 = vpop.permute.xlu2 %5923  ;;  %v5900_v4 = vunpack.i.l.bf16 %v7716_v56  ;;  %v5811_v41 = vunpack.i.h.bf16 %v7589_v58 }
 0x415   : > { %v5901_v42 = vunpack.i.h.bf16 %v7716_v56  ;;  %v5926_v20 = vunpack.i.h.bf16 %v7721_v8 }
 0x416   : > { %1786 = vmatpush.msrb.mxu3 %v1616_v16  ;;  %v1343_v52 = vsel %vm423_vm8, %v5915_v19, %v5916_v18  ;;  %v1483_v14 = vsel %vm564_vm4, %v5855_v2, %v5900_v4  ;;  %v1339_v10 = vsel %vm423_vm8, %v5810_v7, %v5811_v41  ;;  %v5895_v2 = vunpack.i.l.bf16 %v7672_v6 }
 0x417   : > { %1705 = vmatpush.msra.mxu1 %v1343_v52 }
 0x418   : > { %1787 = vmatpush.msrb.mxu3 %v1575_v47  ;;  %v1576_v25 = vsel %vm664_vm1, %v5860_v5, %v5895_v2 }
 0x41a   : > { %1788 = vmatpush.msrb.mxu3 %v1570_v40  ;;  %v5875_v40 = vunpack.i.l.bf16 %v7670_v60 }
 0x41b   : > { %v7751_v49 = vpop.permute.xlu1 %5918  ;;  %v7753_v46 = vpop.permute.xlu0 %5928  ;;  %5342 = vmatmul.msk.f32.gmra.mxu2 %vm799_vm7, %v7743_v34  ;;  %5340 = vmatmul.msk.f32.gmra.mxu3 %vm799_vm7, %v7743_v34 }
 0x41c   : > { %1789 = vmatpush.msrb.mxu3 %v1529_v59  ;;  %v5921_v33 = vunpack.i.h.bf16 %v7751_v49  ;;  %v5920_v19 = vunpack.i.l.bf16 %v7751_v49  ;;  %v7762_v16 = vpop.permute.xlu2 %5948  ;;  %v5930_v59 = vunpack.i.l.bf16 %v7753_v46  ;;  %v1622_v43 = vsel %vm717_vm0, %v5845_v35, %v5875_v40 }
 0x41d   : > { %v5950_v63 = vunpack.i.l.bf16 %v7762_v16 }
 0x41e   : > { %1790 = vmatpush.msrb.mxu3 %v1524_v32  ;;  %v1338_v52 = vsel %vm423_vm8, %v5921_v33, %v5810_v7  ;;  %v1344_v47 = vsel %vm423_vm8, %v5916_v18, %v5920_v19  ;;  %v5876_v33 = vunpack.i.h.bf16 %v7670_v60  ;;  %v5931_v18 = vunpack.i.h.bf16 %v7753_v46 }
 0x41f   : > { %1706 = vmatpush.msra.mxu1 %v1338_v52  ;;  %1751 = vmatpush.msrb.mxu0 %v1344_v47  ;;  %v1478_v32 = vsel %vm564_vm4, %v5791_v24, %v5901_v42  ;;  %v1437_v7 = vsel %vm517_vm5, %v5870_v62, %v5930_v59  ;;  %v1577_v46 = vsel %vm664_vm1, %v5895_v2, %v5950_v63 }
 0x420   : > { %1791 = vmatpush.msrb.mxu3 %v1483_v14  ;;  %v1432_v31 = vsel %vm517_vm5, %v5796_v17, %v5931_v18  ;;  %v1525_v14 = vsel %vm611_vm3, %v5881_v37, %v5926_v20 }
 0x421   : > { %1707 = vmatpush.msra.mxu1 %v1296_v21  ;;  %1752 = vmatpush.msrb.mxu0 %v1339_v10  ;;  %v5896_v21 = vunpack.i.h.bf16 %v7672_v6  ;;  %v9464_v6 = vmax.f32 %v7478_v30, 0.0 }
 0x422   : > { %1792 = vmatpush.msrb.mxu3 %v1478_v32 }
 0x423   : > { %v7802_v52 = vpop.permute.xlu1 %5933  ;;  %v7804_v13 = vpop.permute.xlu0 %5938  ;;  %1708 = vmatpush.msra.mxu1 %v1290_v22  ;;  %1753 = vmatpush.msrb.mxu0 %v1297_v45  ;;  %v1617_v45 = vsel %vm717_vm0, %v5846_v44, %v5876_v33  ;;  %v5925_v22 = vunpack.i.l.bf16 %v7721_v8  ;;  %v1571_v44 = vsel %vm664_vm1, %v5861_v26, %v5896_v21 }
 0x424   : > { %1793 = vmatpush.msrb.mxu3 %v1437_v7  ;;  %v7816_v24 = vpop.permute.xlu2 %5963  ;;  %1709 = vmatmul.f32.vlgmr.msra.gmra.mxu1 %v7794_v27  ;;  %v5940_v28 = vunpack.i.l.bf16 %v7804_v13  ;;  %v5941_v26 = vunpack.i.h.bf16 %v7804_v13  ;;  %v5935_v7 = vunpack.i.l.bf16 %v7802_v52 }
 0x425   : > { %1831 = vmatpush.msrb.mxu1 %v1622_v43  ;;  %1754 = vmatpush.msrb.mxu0 %v9463_v23  ;;  %v1530_v35 = vsel %vm611_vm3, %v5880_v53, %v5925_v22 }
 0x426   : > { %1794 = vmatpush.msrb.mxu3 %v1432_v31  ;;  %1755 = vmatmul.f32.vlgmr.msrb.gmra.mxu0 %v7794_v27  ;;  %v1484_v1 = vsel %vm564_vm4, %v5900_v4, %v5940_v28  ;;  %v1479_v4 = vsel %vm564_vm4, %v5901_v42, %v5941_v26 }
 0x427   : > { %1832 = vmatpush.msrb.mxu1 %v1617_v45 }
 0x429   : > { %1833 = vmatpush.msrb.mxu1 %v1576_v25 }
 0x42b   : > { %1834 = vmatpush.msrb.mxu1 %v1571_v44  ;;  %v7847_v62 = vpop.permute.xlu1 %5943  ;;  %v7849_v17 = vpop.permute.xlu0 %5953 }
 0x42c   : > { %v5946_v5 = vunpack.i.h.bf16 %v7847_v62  ;;  %v5945_v39 = vunpack.i.l.bf16 %v7847_v62  ;;  %v5979_v47 = vpop.permute.xlu2 %5978  ;;  %1712 = vmatmul.f32.gmra.mxu1 %v7844_v54  ;;  %v5955_v43 = vunpack.i.l.bf16 %v7849_v17  ;;  %v5956_v31 = vunpack.i.h.bf16 %v7849_v17 }
 0x42d   : > { %1835 = vmatpush.msrb.mxu1 %v1530_v35  ;;  %v5981_v10 = vunpack.i.h.bf16 %v5979_v47  ;;  %v5980_v32 = vunpack.i.l.bf16 %v5979_v47 }
 0x42e   : > { %v1391_v53 = vsel %vm470_vm6, %v5890_v0, %v5945_v39  ;;  %1758 = vmatmul.f32.gmra.mxu0 %v7844_v54  ;;  %v1386_v29 = vsel %vm470_vm6, %v5801_v57, %v5946_v5  ;;  %v5936_v0 = vunpack.i.h.bf16 %v7802_v52  ;;  %v1623_v57 = vsel %vm717_vm0, %v5875_v40, %v5935_v7 }
 0x42f   : > { %1836 = vmatpush.msrb.mxu1 %v1525_v14  ;;  %1795 = vmatpush.msrb.mxu3 %v1391_v53  ;;  %v1667_v37 = vsel %vm770_vm2, %v5910_v36, %v5980_v32  ;;  %v1662_v51 = vsel %vm770_vm2, %v5806_v48, %v5981_v10  ;;  %v1438_v9 = vsel %vm517_vm5, %v5930_v59, %v5955_v43  ;;  %v5951_v40 = vunpack.i.h.bf16 %v7762_v16 }
 0x430   : > { %1822 = vmatpush.msra.mxu2 %v1667_v37  ;;  %v1618_v25 = vsel %vm717_vm0, %v5876_v33, %v5936_v0  ;;  %v1433_v59 = vsel %vm517_vm5, %v5931_v18, %v5956_v31  ;;  %v5965_v33 = vunpack.i.l.bf16 %v7816_v24  ;;  %vm2000_vm0 = vcmask 228352  }
 0x431   : > { %1837 = vmatpush.msrb.mxu1 %v1484_v1  ;;  %1796 = vmatpush.msrb.mxu3 %v1386_v29  ;;  %v1572_v35 = vsel %vm664_vm1, %v5896_v21, %v5951_v40  ;;  %v9466_v29 = vmax.f32 %v7504_v38, 0.0 }
 0x432   : > { %1823 = vmatpush.msra.mxu2 %v1662_v51  ;;  %v1531_v58 = vsel %vm611_vm3, %v5925_v22, %v5965_v33  ;;  %v9465_v22 = vmax.f32 %v7458_v55, 0.0 }
 0x433   : > { %1838 = vmatpush.msrb.mxu1 %v1479_v4  ;;  %v7896_v36 = vpop.permute.xlu1 %5958  ;;  %v7898_v52 = vpop.permute.xlu0 %5968  ;;  %5343 = vmatmul.msk.f32.vlgmr.msra.gmra.mxu2 %vm799_vm7, %v7704_v61 }
 0x434   : > { %1877 = vmatpush.msrb.mxu2 %v1623_v57  ;;  %v5961_v48 = vunpack.i.h.bf16 %v7896_v36  ;;  %v5960_v56 = vunpack.i.l.bf16 %v7896_v36  ;;  %v5970_v42 = vunpack.i.l.bf16 %v7898_v52  ;;  %v5971_v23 = vunpack.i.h.bf16 %v7898_v52  ;;  %v5994_v45 = vpop.permute.xlu2 %5993 }
 0x435   : > { %1839 = vmatpush.msrb.mxu1 %v1438_v9  ;;  %v5996_v44 = vunpack.i.h.bf16 %v5994_v45  ;;  %v5995_v62 = vunpack.i.l.bf16 %v5994_v45  ;;  %v9468_v52 = vmax.f32 %v7524_v3, 0.0 }
 0x436   : > { %1878 = vmatpush.msrb.mxu2 %v1618_v25  ;;  %v1345_v16 = vsel %vm423_vm8, %v5920_v19, %v5960_v56  ;;  %v1392_v60 = vsel %vm470_vm6, %v5945_v39, %v5970_v42  ;;  %v1340_v49 = vsel %vm423_vm8, %v5811_v41, %v5961_v48  ;;  %v5966_v19 = vunpack.i.h.bf16 %v7816_v24 }
 0x437   : > { %1840 = vmatpush.msrb.mxu1 %v1433_v59  ;;  %1797 = vmatpush.msrb.mxu3 %v1345_v16  ;;  %v1668_v18 = vsel %vm770_vm2, %v5980_v32, %v5995_v62  ;;  %v1387_v2 = vsel %vm470_vm6, %v5946_v5, %v5971_v23  ;;  %v1663_v39 = vsel %vm770_vm2, %v5981_v10, %v5996_v44 }
 0x438   : > { %1879 = vmatpush.msrb.mxu2 %v1577_v46  ;;  %1868 = vmatpush.msra.mxu0 %v1668_v18  ;;  %v1526_v32 = vsel %vm611_vm3, %v5926_v20, %v5966_v19 }
 0x439   : > { %1841 = vmatpush.msrb.mxu1 %v1392_v60  ;;  %1798 = vmatpush.msrb.mxu3 %v1340_v49  ;;  %v5351_v60 = vld [vmem:[%s9425_s4 + $0x6] sm:$0x3f] }
 0x43a   : > { %1880 = vmatpush.msrb.mxu2 %v1572_v35  ;;  %1869 = vmatpush.msra.mxu0 %v1663_v39  ;;  %v1973_v49 = vperm.slane %v5351_v60, 1  ;;  %v1974_v35 = vperm.slane %v5351_v60, 2 }
 0x43b   : > { %1842 = vmatpush.msrb.mxu1 %v1387_v2  ;;  %v5974_v41 = vpop.permute.xlu1 %5973  ;;  %v7945_v24 = vpop.permute.xlu0 %5983  ;;  %1799 = vmatpush.msrb.mxu3 %v9464_v6 }
 0x43c   : > { %1881 = vmatpush.msrb.mxu2 %v1531_v58  ;;  %1923 = vmatpush.msrb.mxu0 %v5935_v7  ;;  %v5975_v21 = vunpack.i.l.bf16 %v5974_v41  ;;  %v5986_v5 = vunpack.i.h.bf16 %v7945_v24  ;;  %v5985_v47 = vunpack.i.l.bf16 %v7945_v24  ;;  %v5976_v14 = vunpack.i.h.bf16 %v5974_v41  ;;  %v6009_v10 = vpop.permute.xlu2 %6008 }
 0x43d   : > { %1800 = vmatpush.msrb.mxu3 %v9465_v22  ;;  %5344 = vmatmul.msk.f32.gmra.mxu2 %vm799_vm7, %v7743_v34  ;;  %v6011_v30 = vunpack.i.h.bf16 %v6009_v10  ;;  %v6010_v53 = vunpack.i.l.bf16 %v6009_v10 }
 0x43e   : > { %1882 = vmatpush.msrb.mxu2 %v1526_v32  ;;  %1924 = vmatpush.msrb.mxu0 %v5936_v0  ;;  %v1346_v7 = vsel %vm423_vm8, %v5960_v56, %v5985_v47  ;;  %v1485_v1 = vsel %vm564_vm4, %v5940_v28, %v5975_v21  ;;  %v1341_v8 = vsel %vm423_vm8, %v5961_v48, %v5986_v5  ;;  %v9469_v56 = vmax.f32 %v7527_v12, 0.0 }
 0x43f   : > { %1801 = vmatmul.f32.vlgmr.msrb.gmra.mxu3 %v7794_v27  ;;  %1843 = vmatpush.msrb.mxu1 %v1346_v7  ;;  %v1669_v55 = vsel %vm770_vm2, %v5995_v62, %v6010_v53  ;;  %v1480_v20 = vsel %vm564_vm4, %v5941_v26, %v5976_v14  ;;  %v1664_v28 = vsel %vm770_vm2, %v5996_v44, %v6011_v30  ;;  %v1977_v7 = vperm.slane %v5351_v60, 5 }
 0x440   : > { %1925 = vmatpush.msrb.mxu0 %v5950_v63  ;;  %1883 = vmatpush.msrb.mxu2 %v1485_v1  ;;  %v9467_v63 = vmax.f32 %v7507_v15, 0.0 }
 0x441   : > { %1914 = vmatpush.msra.mxu3 %v1669_v55  ;;  %1844 = vmatpush.msrb.mxu1 %v1341_v8  ;;  %v1976_v8 = vperm.slane %v5351_v60, 4 }
 0x442   : > { %1926 = vmatpush.msrb.mxu0 %v5951_v40  ;;  %1884 = vmatpush.msrb.mxu2 %v1480_v20  ;;  %v9471_v40 = vmax.f32 %v7553_v50, 0.0 }
 0x443   : > { %1915 = vmatpush.msra.mxu3 %v1664_v28  ;;  %v5989_v37 = vpop.permute.xlu1 %5988  ;;  %1845 = vmatpush.msrb.mxu1 %v9466_v29  ;;  %v5999_v4 = vpop.permute.xlu0 %5998 }
 0x444   : > { %1927 = vmatpush.msrb.mxu0 %v5965_v33  ;;  %v5990_v0 = vunpack.i.l.bf16 %v5989_v37  ;;  %v5991_v51 = vunpack.i.h.bf16 %v5989_v37  ;;  %v6000_v26 = vunpack.i.l.bf16 %v5999_v4  ;;  %v6001_v38 = vunpack.i.h.bf16 %v5999_v4 }
 0x445   : > { %1846 = vmatpush.msrb.mxu1 %v9467_v63  ;;  %5345 = vmatmul.msk.f32.vlgmr.msra.gmra.mxu0 %vm799_vm7, %v7704_v61 }
 0x446   : > { %1928 = vmatpush.msrb.mxu0 %v5966_v19  ;;  %1847 = vmatmul.f32.vlgmr.msrb.gmra.mxu1 %v7794_v27  ;;  %v1439_v13 = vsel %vm517_vm5, %v5955_v43, %v5990_v0  ;;  %v1434_v15 = vsel %vm517_vm5, %v5956_v31, %v5991_v51  ;;  %v1393_v36 = vsel %vm470_vm6, %v5970_v42, %v6000_v26  ;;  %v9470_v42 = vmax.f32 %v7550_v11, 0.0 }
 0x447   : > { %1804 = vmatmul.f32.gmra.mxu3 %v7844_v54  ;;  %1960 = vmatpush.msra.mxu1 %v6010_v53  ;;  %v1388_v48 = vsel %vm470_vm6, %v5971_v23, %v6001_v38 }
 0x448   : > { %1929 = vmatpush.msrb.mxu0 %v5975_v21  ;;  %1885 = vmatpush.msrb.mxu2 %v1439_v13 }
 0x449   : > { %1961 = vmatpush.msra.mxu1 %v6011_v30 }
 0x44a   : > { %1930 = vmatpush.msrb.mxu0 %v5976_v14  ;;  %1886 = vmatpush.msrb.mxu2 %v1434_v15 }
 0x44b   : > { %v6004_v57 = vpop.permute.xlu1 %6003 }
 0x44c   : > { %1931 = vmatpush.msrb.mxu0 %v5990_v0  ;;  %v6005_v43 = vunpack.i.l.bf16 %v6004_v57  ;;  %1887 = vmatpush.msrb.mxu2 %v1393_v36  ;;  %v6006_v9 = vunpack.i.h.bf16 %v6004_v57 }
 0x44d   : > { %5346 = vmatmul.msk.f32.gmra.mxu0 %vm799_vm7, %v7743_v34 }
 0x44e   : > { %1932 = vmatpush.msrb.mxu0 %v5991_v51  ;;  %1888 = vmatpush.msrb.mxu2 %v1388_v48  ;;  %v1347_v17 = vsel %vm423_vm8, %v5985_v47, %v6005_v43  ;;  %v1342_v31 = vsel %vm423_vm8, %v5986_v5, %v6006_v9  ;;  %v1975_v47 = vperm.slane %v5351_v60, 3 }
 0x44f   : > { %1850 = vmatmul.f32.gmra.mxu1 %v7844_v54  ;;  %5347 = vmatmul.msk.f32.vlgmr.msra.gmra.mxu3 %vm799_vm7, %v7704_v61 }
 0x450   : > { %1933 = vmatpush.msrb.mxu0 %v6000_v26  ;;  %1889 = vmatpush.msrb.mxu2 %v1347_v17 }
 0x452   : > { %1934 = vmatpush.msrb.mxu0 %v6001_v38  ;;  %1890 = vmatpush.msrb.mxu2 %v1342_v31 }
 0x454   : > { %1935 = vmatpush.msrb.mxu0 %v6005_v43  ;;  %1891 = vmatpush.msrb.mxu2 %v9468_v52 }
 0x456   : > { %1936 = vmatpush.msrb.mxu0 %v6006_v9  ;;  %1892 = vmatpush.msrb.mxu2 %v9469_v56 }
 0x457   : > { %1893 = vmatmul.f32.vlgmr.msrb.gmra.mxu2 %v7794_v27  ;;  %5349 = vmatmul.msk.f32.vlgmr.msra.gmra.mxu1 %vm799_vm7, %v7704_v61 }
 0x458   : > { %1937 = vmatpush.msrb.mxu0 %v9470_v42  ;;  %5348 = vmatmul.msk.f32.gmra.mxu3 %vm799_vm7, %v7743_v34 }
 0x45a   : > { %1938 = vmatpush.msrb.mxu0 %v9471_v40 }
 0x45b   : > { %1939 = vmatmul.f32.vlgmr.msrb.gmra.mxu0 %v7794_v27 }
 0x45f   : > { %1896 = vmatmul.f32.gmra.mxu2 %v7844_v54  ;;  %5350 = vmatmul.msk.f32.gmra.mxu1 %vm799_vm7, %v7743_v34 }
 0x463   : > { %1942 = vmatmul.f32.gmra.mxu0 %v7844_v54  ;;  %v1972_v54 = vperm.slane %v5351_v60, 0 }
 0x496   : > { %v1733_v12 = vpop.f32.mrf.mxu3  ;;  %v1779_v11 = vpop.f32.mrf.mxu2 }
 0x49e   : > { %v1736_v45 = vpop.f32.mrf.mxu3  ;;  %v1782_v59 = vpop.f32.mrf.mxu2 }
 0x4a1   : > { %v1710_v3 = vpop.f32.mrf.mxu1 }
 0x4a2   : > { %v8021_v33 = vadd.f32 %v1733_v12, %v1710_v3 }
 0x4a3   : > { %v1756_v61 = vpop.f32.mrf.mxu0 }
 0x4a4   : > { %v8023_v18 = vadd.f32 %v1779_v11, %v1756_v61  ;;  %v1984_v39 = vmul.f32 %v1972_v54, %v8021_v33 }
 0x4a6   : > { %v1985_v6 = vmul.f32 %v1973_v49, %v8023_v18  ;;  %v2013_v48 = vmul.f32 %v1984_v39, %v8021_v33 }
 0x4a8   : > { %v1996_v10 = vadd.f32 %v1985_v6, %v1984_v39  ;;  %v2014_v17 = vmul.f32 %v1985_v6, %v8023_v18 }
 0x4a9   : > { %v1713_v23 = vpop.f32.mrf.mxu1 }
 0x4aa   : > { %v8028_v58 = vadd.f32 %v1736_v45, %v1713_v23 }
 0x4ab   : > { %v1759_v25 = vpop.f32.mrf.mxu0 }
 0x4ac   : > { %v8030_v41 = vadd.f32 %v1782_v59, %v1759_v25  ;;  %v1990_v22 = vmul.f32 %v1972_v54, %v8028_v58  ;;  %v2025_v59 = vadd.f32 %v2014_v17, %v2013_v48 }
 0x4ae   : > { %v1991_v30 = vmul.f32 %v1973_v49, %v8030_v41  ;;  %v2019_v51 = vmul.f32 %v1990_v22, %v8028_v58 }
 0x4b0   : > { %v2020_v63 = vmul.f32 %v1991_v30, %v8030_v41  ;;  %v2005_v57 = vadd.f32 %v1991_v30, %v1990_v22  ;;  %v2042_v30 = vld [vmem:[#allocation6 + $0x10] sm:$0xff] }
 0x4b2   : > { %v2033_v56 = vadd.f32 %v2020_v63, %v2019_v51 }
 0x4b6   : > { %v1825_v16 = vpop.f32.mrf.mxu2 }
 0x4c0   : > { %v1828_v2 = vpop.f32.mrf.mxu2 }
 0x4c2   : > { %v1802_v50 = vpop.f32.mrf.mxu3  ;;  %v1871_v62 = vpop.f32.mrf.mxu0 }
 0x4c3   : > { %v1848_v44 = vpop.f32.mrf.mxu1  ;;  %v8025_v19 = vadd.f32 %v1825_v16, %v1802_v50 }
 0x4c4   : > { %v8034_v5 = vadd.f32 %v1871_v62, %v1848_v44 }
 0x4c5   : > { %v1986_v21 = vmul.f32 %v1974_v35, %v8025_v19 }
 0x4c6   : > { %v1987_v1 = vmul.f32 %v1975_v47, %v8034_v5 }
 0x4c7   : > { %v1997_v20 = vadd.f32 %v1996_v10, %v1986_v21  ;;  %v2015_v12 = vmul.f32 %v1986_v21, %v8025_v19 }
 0x4c8   : > { %v2016_v62 = vmul.f32 %v1987_v1, %v8034_v5 }
 0x4c9   : > { %v1998_v26 = vadd.f32 %v1997_v20, %v1987_v1 }
 0x4ca   : > { %v1805_v34 = vpop.f32.mrf.mxu3  ;;  %v1874_v46 = vpop.f32.mrf.mxu0 }
 0x4cb   : > { %v8036_v32 = vadd.f32 %v1828_v2, %v1805_v34 }
 0x4cc   : > { %v1851_v27 = vpop.f32.mrf.mxu1 }
 0x4cd   : > { %v1992_v37 = vmul.f32 %v1974_v35, %v8036_v32  ;;  %v8044_v29 = vadd.f32 %v1874_v46, %v1851_v27  ;;  %v2026_v46 = vadd.f32 %v2025_v59, %v2015_v12 }
 0x4cf   : > { %v2021_v36 = vmul.f32 %v1992_v37, %v8036_v32  ;;  %v1993_v43 = vmul.f32 %v1975_v47, %v8044_v29  ;;  %v2006_v3 = vadd.f32 %v2005_v57, %v1992_v37  ;;  %v2027_v6 = vadd.f32 %v2026_v46, %v2016_v62 }
 0x4d1   : > { %v2022_v11 = vmul.f32 %v1993_v43, %v8044_v29  ;;  %v2034_v25 = vadd.f32 %v2033_v56, %v2021_v36  ;;  %v2007_v50 = vadd.f32 %v2006_v3, %v1993_v43  ;;  %v2125_v3 = vld [vmem:[#allocation4 + $0x20] sm:$0xff] }
 0x4d2   : > { %v1917_v14 = vpop.f32.mrf.mxu3 }
 0x4d3   : > { %v2035_v54 = vadd.f32 %v2034_v25, %v2022_v11 }
 0x4d4   : > { %v1963_v24 = vpop.f32.mrf.mxu1 }
 0x4d8   : > { %v1940_v53 = vpop.f32.mrf.mxu0 }
 0x4d9   : > { %v8041_v55 = vadd.f32 %v1963_v24, %v1940_v53 }
 0x4da   : > { %v1894_v28 = vpop.f32.mrf.mxu2 }
 0x4db   : > { %v8046_v0 = vadd.f32 %v1917_v14, %v1894_v28  ;;  %v1989_v4 = vmul.f32 %v1977_v7, %v8041_v55  ;;  %v1920_v52 = vpop.f32.mrf.mxu3 }
 0x4dc   : > { %v1966_v38 = vpop.f32.mrf.mxu1 }
 0x4dd   : > { %v1988_v13 = vmul.f32 %v1976_v8, %v8046_v0  ;;  %v2001_v15 = vsel %vm2000_vm0, %v1989_v4, 0.0  ;;  %v2018_v21 = vmul.f32 %v1989_v4, %v8041_v55 }
 0x4df   : > { %v1999_v9 = vadd.f32 %v1998_v26, %v1988_v13  ;;  %v2017_v2 = vmul.f32 %v1988_v13, %v8046_v0  ;;  %v2029_v14 = vsel %vm2000_vm0, %v2018_v21, 0.0 }
 0x4e0   : > { %v1943_v31 = vpop.f32.mrf.mxu0 }
 0x4e1   : > { %v8057_v42 = vadd.f32 %v1966_v38, %v1943_v31  ;;  %v2002_v40 = vadd.f32 %v2001_v15, %v1999_v9  ;;  %v2028_v47 = vadd.f32 %v2027_v6, %v2017_v2 }
 0x4e2   : > { %v1897_v61 = vpop.f32.mrf.mxu2 }
 0x4e3   : > { %v8061_v23 = vadd.f32 %v1920_v52, %v1897_v61  ;;  %2003 = vadd.xlane.f32.xlu1 %v2002_v40  ;;  %v1995_v45 = vmul.f32 %v1977_v7, %v8057_v42  ;;  %v2030_v10 = vadd.f32 %v2029_v14, %v2028_v47 }
 0x4e5   : > { %v1994_v44 = vmul.f32 %v1976_v8, %v8061_v23  ;;  %v2009_v16 = vsel %vm2000_vm0, %v1995_v45, 0.0  ;;  %v2024_v27 = vmul.f32 %v1995_v45, %v8057_v42  ;;  %v2043_v8 = vld [vmem:[#allocation6 + $0x18] sm:$0xff] }
 0x4e7   : > { %v2008_v60 = vadd.f32 %v2007_v50, %v1994_v44  ;;  %v2023_v34 = vmul.f32 %v1994_v44, %v8061_v23  ;;  %v2037_v39 = vsel %vm2000_vm0, %v2024_v27, 0.0  ;;  %v2126_v44 = vld [vmem:[#allocation4 + $0x28] sm:$0xff] }
 0x4e9   : > { %v2010_v49 = vadd.f32 %v2009_v16, %v2008_v60  ;;  %v2036_v35 = vadd.f32 %v2035_v54, %v2023_v34  ;;  %v2131_v16 = vld [vmem:[#allocation4 + $0x38] sm:$0xff]  ;;  %v2130_v54 = vld [vmem:[#allocation4 + $0x30] sm:$0xff] }
 0x4eb   : > { %2011 = vadd.xlane.f32.xlu0 %v2010_v49  ;;  %v2038_v24 = vadd.f32 %v2037_v39, %v2036_v35 }
 0x4ed   : > { %2039 = vadd.xlane.f32.xlu2 %v2038_v24 }
 0x4f3   : > { %2031 = vadd.xlane.f32.xlu0 %v2030_v10 }
 0x556   : > { %v2004_v53 = vpop.xlane.xlu1 %2003 }
 0x55e   : > { %v2012_v22 = vpop.xlane.xlu0 %2011 }
 0x55f   : > { %2064 = vmatpush.msrb.mxu3 %v2012_v22 }
 0x560   : > { %v2040_v7 = vpop.xlane.xlu2 %2039 }
 0x561   : > { %2065 = vmatpush.msrb.mxu3 %v2004_v53  ;;  %2087 = vmatpush.msra.mxu2 %v2040_v7 }
 0x562   : > { %5352 = vmatmul.msk.f32.vlgmr.msrb.gmra.mxu3 %vm799_vm7, %v2042_v30 }
 0x566   : > { %v2032_v1 = vpop.xlane.xlu0 %2031 }
 0x567   : > { %2088 = vmatpush.msra.mxu2 %v2032_v1 }
 0x568   : > { %5354 = vmatmul.msk.f32.vlgmr.msra.gmra.mxu2 %vm799_vm7, %v2042_v30 }
 0x56a   : > { %5353 = vmatmul.msk.f32.gmra.mxu3 %vm799_vm7, %v2043_v8 }
 0x570   : > { %5355 = vmatmul.msk.f32.gmra.mxu2 %vm799_vm7, %v2043_v8 }
 0x5e5   : > { %v2067_v20 = vpop.f32.mrf.mxu3 }
 0x5e6   : > { %v2096_v28 = vmul.f32 %v2067_v20, %v2067_v20 }
 0x5eb   : > { %v2090_v37 = vpop.f32.mrf.mxu2 }
 0x5ec   : > { %v2098_v4 = vsub.f32 %v2090_v37, %v2096_v28 }
 0x5ed   : > { %v2070_v51 = vpop.f32.mrf.mxu3 }
 0x5ee   : > { %v2100_v63 = vmax.f32 %v2098_v4, 0.0  ;;  %v2097_v26 = vmul.f32 %v2070_v51, %v2070_v51 }
 0x5f0   : > { %v2102_v13 = vadd.f32 1e-05, %v2100_v63 }
 0x5f2   : > { %6551 = vrsqrt.f32 %v2102_v13  ;;  %vm2110_vm4 = vweird.f32 %v2102_v13 }
 0x5f3   : > { %v2093_v38 = vpop.f32.mrf.mxu2 }
 0x5f4   : > { %v2099_v15 = vsub.f32 %v2093_v38, %v2097_v26 }
 0x5f6   : > { %v2101_v57 = vmax.f32 %v2099_v15, 0.0  ;;  %v2193_v15 = vld [vmem:[#allocation2 + $0x40] sm:$0xff] }
 0x5f8   : > { %v6552_v36 = vpop.eup %6551  ;;  %v2103_v43 = vadd.f32 1e-05, %v2101_v57 }
 0x5f9   : > { %v2105_v9 = vmul.f32 %v6552_v36, %v2102_v13  ;;  %vm2111_vm3 = vweird.f32 %v6552_v36 }
 0x5fa   : > { %6553 = vrsqrt.f32 %v2103_v43  ;;  %vm2112_vm9 = vmor %vm2110_vm4, %vm2111_vm3  ;;  %vm2120_vm11 = vweird.f32 %v2103_v43 }
 0x5fb   : > { %v2106_v48 = vmul.f32 %v6552_v36, %v2105_v9  ;;  %v2194_v9 = vld [vmem:[#allocation2 + $0x50] sm:$0xff] }
 0x5fd   : > { %v2107_v17 = vmul.f32 0.5, %v2106_v48 }
 0x5ff   : > { %v2108_v31 = vsub.f32 1.5, %v2107_v17  ;;  %v5368_v17 = vld [vmem:[%s9425_s4 + $0xc] sm:$0x3f] }
 0x600   : > { %v6554_v52 = vpop.eup %6553 }
 0x601   : > { %v2115_v56 = vmul.f32 %v6554_v52, %v2103_v43  ;;  %v2109_v40 = vmul.f32 %v6552_v36, %v2108_v31  ;;  %vm2121_vm10 = vweird.f32 %v6554_v52  ;;  %v2343_v31 = vperm.slane %v5368_v17, 1 }
 0x602   : > { %vm2122_vm12 = vmor %vm2120_vm11, %vm2121_vm10  ;;  %vm2769_vm10 = vcmask 1014784   ;;  %vm3286_vm11 = vcmask 89088  }
 0x603   : > { %v2116_v12 = vmul.f32 %v6554_v52, %v2115_v56  ;;  %v2113_v61 = vsel %vm2112_vm9, %v6552_v36, %v2109_v40  ;;  %vm2884_vm9 = vcmask 556032  }
 0x604   : > { %v2127_v11 = vmul.f32 %v2125_v3, %v2113_v61  ;;  %v2344_v61 = vperm.slane %v5368_v17, 2 }
 0x605   : > { %v2117_v45 = vmul.f32 0.5, %v2116_v12 }
 0x606   : > { %2138 = vperm.xlu2 %5771, %v2127_v11   ;;  %v2132_v34 = vmul.f32 %v2127_v11, %v2067_v20 }
 0x607   : > { %v2118_v25 = vsub.f32 1.5, %v2117_v45 }
 0x608   : > { %v2134_v46 = vsub.f32 %v2130_v54, %v2132_v34 }
 0x609   : > { %v2119_v59 = vmul.f32 %v6554_v52, %v2118_v25 }
 0x60b   : > { %v2123_v50 = vsel %vm2122_vm12, %v6554_v52, %v2119_v59  ;;  %v2342_v52 = vperm.slane %v5368_v17, 0 }
 0x60c   : > { %v2128_v62 = vmul.f32 %v2126_v44, %v2123_v50  ;;  %v2345_v44 = vperm.slane %v5368_v17, 3 }
 0x60e   : > { %2143 = vperm.xlu1 %5769, %v2128_v62   ;;  %v2133_v27 = vmul.f32 %v2128_v62, %v2070_v51 }
 0x610   : > { %v2135_v60 = vsub.f32 %v2131_v16, %v2133_v27  ;;  %v2346_v16 = vperm.slane %v5368_v17, 4 }
 0x612   : > { %2165 = vperm.xlu0 %5770, %v2135_v60  }
 0x616   : > { %2160 = vperm.xlu1 %5769, %v2134_v46  }
 0x660   : > { %v2139_v35 = vpop.permute.xlu2 %2138 }
 0x661   : > { %v2146_v30 = vmul.f32 %v2139_v35, %v8021_v33  ;;  %v2147_v53 = vmul.f32 %v2139_v35, %v8023_v18  ;;  %v2148_v7 = vmul.f32 %v2139_v35, %v8025_v19  ;;  %v2149_v1 = vmul.f32 %v2139_v35, %v8034_v5 }
 0x662   : > { %v2150_v37 = vmul.f32 %v2139_v35, %v8046_v0  ;;  %v2151_v4 = vmul.f32 %v2139_v35, %v8041_v55 }
 0x680   : > { %v2144_v49 = vpop.permute.xlu1 %2143 }
 0x681   : > { %v2152_v2 = vmul.f32 %v2144_v49, %v8028_v58  ;;  %v2153_v39 = vmul.f32 %v2144_v49, %v8030_v41  ;;  %v2154_v24 = vmul.f32 %v2144_v49, %v8036_v32  ;;  %v2155_v6 = vmul.f32 %v2144_v49, %v8044_v29 }
 0x682   : > { %v2156_v29 = vmul.f32 %v2144_v49, %v8061_v23  ;;  %v2157_v28 = vmul.f32 %v2144_v49, %v8057_v42 }
 0x684   : > { %v2166_v21 = vpop.permute.xlu0 %2165 }
 0x685   : > { %v2174_v47 = vadd.f32 %v2166_v21, %v2152_v2  ;;  %v2175_v14 = vadd.f32 %v2166_v21, %v2153_v39  ;;  %v2176_v10 = vadd.f32 %v2166_v21, %v2154_v24  ;;  %v2177_v22 = vadd.f32 %v2166_v21, %v2155_v6 }
 0x686   : > { %v2178_v51 = vadd.f32 %v2166_v21, %v2156_v29  ;;  %v2179_v63 = vadd.f32 %v2166_v21, %v2157_v28  ;;  %v2347_v39 = vperm.slane %v5368_v17, 5 }
 0x687   : > { %v2186_v58 = vmax.f32 %v2174_v47, 0.0  ;;  %v2187_v8 = vmax.f32 %v2175_v14, 0.0  ;;  %v2188_v41 = vmax.f32 %v2176_v10, 0.0  ;;  %v2189_v20 = vmax.f32 %v2177_v22, 0.0 }
 0x688   : > { %v2161_v32 = vpop.permute.xlu1 %2160  ;;  %v2190_v55 = vmax.f32 %v2178_v51, 0.0  ;;  %v2191_v0 = vmax.f32 %v2179_v63, 0.0 }
 0x689   : > { %2215 = vmatpush.msrb.mxu1 %v2186_v58  ;;  %2238 = vmatpush.msra.mxu3 %v2187_v8  ;;  %v2168_v33 = vadd.f32 %v2161_v32, %v2146_v30  ;;  %v2169_v18 = vadd.f32 %v2161_v32, %v2147_v53  ;;  %v2170_v19 = vadd.f32 %v2161_v32, %v2148_v7 }
 0x68a   : > { %2261 = vmatpush.msra.mxu0 %v2188_v41  ;;  %2284 = vmatpush.msrb.mxu2 %v2189_v20  ;;  %v2171_v5 = vadd.f32 %v2161_v32, %v2149_v1  ;;  %v2172_v42 = vadd.f32 %v2161_v32, %v2150_v37  ;;  %v2173_v57 = vadd.f32 %v2161_v32, %v2151_v4 }
 0x68b   : > { %v2180_v13 = vmax.f32 %v2168_v33, 0.0  ;;  %v2181_v26 = vmax.f32 %v2169_v18, 0.0  ;;  %v2182_v38 = vmax.f32 %v2170_v19, 0.0 }
 0x68c   : > { %v2183_v23 = vmax.f32 %v2171_v5, 0.0  ;;  %v2184_v36 = vmax.f32 %v2172_v42, 0.0  ;;  %v2185_v43 = vmax.f32 %v2173_v57, 0.0 }
 0x68d   : > { %2216 = vmatpush.msrb.mxu1 %v2180_v13  ;;  %2239 = vmatpush.msra.mxu3 %v2181_v26 }
 0x68e   : > { %2262 = vmatpush.msra.mxu0 %v2182_v38  ;;  %2285 = vmatpush.msrb.mxu2 %v2183_v23 }
 0x68f   : > { %5356 = vmatmul.msk.f32.vlgmr.msrb.gmra.mxu1 %vm799_vm7, %v2193_v15  ;;  %5358 = vmatmul.msk.f32.vlgmr.msra.gmra.mxu3 %vm799_vm7, %v2193_v15 }
 0x690   : > { %2307 = vmatpush.msra.mxu1 %v2190_v55  ;;  %2330 = vmatpush.msrb.mxu3 %v2191_v0 }
 0x691   : > { %5362 = vmatmul.msk.f32.vlgmr.msrb.gmra.mxu2 %vm799_vm7, %v2193_v15  ;;  %5360 = vmatmul.msk.f32.vlgmr.msra.gmra.mxu0 %vm799_vm7, %v2193_v15 }
 0x692   : > { %2308 = vmatpush.msra.mxu1 %v2184_v36  ;;  %2331 = vmatpush.msrb.mxu3 %v2185_v43 }
 0x697   : > { %5357 = vmatmul.msk.f32.gmra.mxu1 %vm799_vm7, %v2194_v9  ;;  %5359 = vmatmul.msk.f32.gmra.mxu3 %vm799_vm7, %v2194_v9 }
 0x699   : > { %5363 = vmatmul.msk.f32.gmra.mxu2 %vm799_vm7, %v2194_v9  ;;  %5361 = vmatmul.msk.f32.gmra.mxu0 %vm799_vm7, %v2194_v9 }
 0x69f   : > { %5364 = vmatmul.msk.f32.vlgmr.msra.gmra.mxu1 %vm799_vm7, %v2193_v15  ;;  %5366 = vmatmul.msk.f32.vlgmr.msrb.gmra.mxu3 %vm799_vm7, %v2193_v15 }
 0x6a7   : > { %5365 = vmatmul.msk.f32.gmra.mxu1 %vm799_vm7, %v2194_v9  ;;  %5367 = vmatmul.msk.f32.gmra.mxu3 %vm799_vm7, %v2194_v9 }
 0x70c   : > { %v8101_v48 = vpop.f32.mrf.mxu1 }
 0x70d   : > { %v2354_v11 = vmul.f32 %v2342_v52, %v8101_v48 }
 0x70e   : > { %v8108_v40 = vpop.f32.mrf.mxu0 }
 0x70f   : > { %v2356_v59 = vmul.f32 %v2344_v61, %v8108_v40  ;;  %v2382_v50 = vmul.f32 %v2354_v11, %v8101_v48 }
 0x711   : > { %v2384_v60 = vmul.f32 %v2356_v59, %v8108_v40 }
 0x712   : > { %v8106_v56 = vpop.f32.mrf.mxu3 }
 0x713   : > { %v2355_v3 = vmul.f32 %v2343_v31, %v8106_v56 }
 0x714   : > { %v8111_v12 = vpop.f32.mrf.mxu1  ;;  %v8114_v45 = vpop.f32.mrf.mxu2 }
 0x715   : > { %v2383_v25 = vmul.f32 %v2355_v3, %v8106_v56  ;;  %v2357_v34 = vmul.f32 %v2345_v44, %v8114_v45  ;;  %v2360_v35 = vmul.f32 %v2342_v52, %v8111_v12  ;;  %v2366_v26 = vadd.f32 %v2355_v3, %v2354_v11  ;;  %v2411_v11 = vld [vmem:[#allocation6 + $0x20] sm:$0xff] }
 0x716   : > { %v8126_v49 = vpop.f32.mrf.mxu0 }
 0x717   : > { %v2394_v27 = vadd.f32 %v2383_v25, %v2382_v50  ;;  %v2385_v6 = vmul.f32 %v2357_v34, %v8114_v45  ;;  %v2362_v47 = vmul.f32 %v2344_v61, %v8126_v49  ;;  %v2388_v10 = vmul.f32 %v2360_v35, %v8111_v12 }
 0x718   : > { %v2367_v36 = vadd.f32 %v2366_v26, %v2356_v59  ;;  %v2412_v59 = vld [vmem:[#allocation6 + $0x28] sm:$0xff] }
 0x719   : > { %v2395_v24 = vadd.f32 %v2394_v27, %v2384_v60  ;;  %v2390_v58 = vmul.f32 %v2362_v47, %v8126_v49 }
 0x71a   : > { %v8119_v62 = vpop.f32.mrf.mxu3  ;;  %v2368_v9 = vadd.f32 %v2367_v36, %v2357_v34 }
 0x71b   : > { %v2361_v54 = vmul.f32 %v2343_v31, %v8119_v62  ;;  %v2396_v20 = vadd.f32 %v2395_v24, %v2385_v6 }
 0x71c   : > { %v8124_v46 = vpop.f32.mrf.mxu1  ;;  %v8133_v14 = vpop.f32.mrf.mxu2 }
 0x71d   : > { %v2358_v2 = vmul.f32 %v2346_v16, %v8124_v46  ;;  %v2389_v21 = vmul.f32 %v2361_v54, %v8119_v62  ;;  %v2374_v22 = vadd.f32 %v2361_v54, %v2360_v35  ;;  %v2363_v8 = vmul.f32 %v2345_v44, %v8133_v14 }
 0x71f   : > { %v2386_v30 = vmul.f32 %v2358_v2, %v8124_v46  ;;  %v2402_v1 = vadd.f32 %v2389_v21, %v2388_v10  ;;  %v2375_v29 = vadd.f32 %v2374_v22, %v2362_v47  ;;  %v2391_v18 = vmul.f32 %v2363_v8, %v8133_v14 }
 0x720   : > { %v2369_v31 = vadd.f32 %v2368_v9, %v2358_v2 }
 0x721   : > { %v2397_v37 = vadd.f32 %v2396_v20, %v2386_v30  ;;  %v2403_v33 = vadd.f32 %v2402_v1, %v2390_v58  ;;  %v2376_v63 = vadd.f32 %v2375_v29, %v2363_v8  ;;  %v2494_v20 = vld [vmem:[#allocation4 + $0x40] sm:$0xff] }
 0x722   : > { %v8137_v53 = vpop.f32.mrf.mxu3 }
 0x723   : > { %v2359_v7 = vmul.f32 %v2347_v39, %v8137_v53  ;;  %v2404_v23 = vadd.f32 %v2403_v33, %v2391_v18  ;;  %v2495_v18 = vld [vmem:[#allocation4 + $0x48] sm:$0xff] }
 0x724   : > { %v8142_v41 = vpop.f32.mrf.mxu1 }
 0x725   : > { %v2387_v32 = vmul.f32 %v2359_v7, %v8137_v53  ;;  %v2364_v28 = vmul.f32 %v2346_v16, %v8142_v41  ;;  %v2370_v17 = vsel %vm2000_vm0, %v2359_v7, 0.0 }
 0x726   : > { %v2371_v52 = vadd.f32 %v2370_v17, %v2369_v31 }
 0x727   : > { %v2398_v4 = vsel %vm2000_vm0, %v2387_v32, 0.0  ;;  %v2392_v5 = vmul.f32 %v2364_v28, %v8142_v41  ;;  %v2377_v38 = vadd.f32 %v2376_v63, %v2364_v28  ;;  %v2500_v63 = vld [vmem:[#allocation4 + $0x58] sm:$0xff] }
 0x728   : > { %v2399_v19 = vadd.f32 %v2398_v4, %v2397_v37 }
 0x729   : > { %v2405_v55 = vadd.f32 %v2404_v23, %v2392_v5  ;;  %v2499_v23 = vld [vmem:[#allocation4 + $0x50] sm:$0xff] }
 0x72a   : > { %v8149_v51 = vpop.f32.mrf.mxu3  ;;  %2400 = vadd.xlane.f32.xlu2 %v2399_v19 }
 0x72b   : > { %v2365_v13 = vmul.f32 %v2347_v39, %v8149_v51 }
 0x72d   : > { %v2393_v15 = vmul.f32 %v2365_v13, %v8149_v51  ;;  %v2378_v42 = vsel %vm2000_vm0, %v2365_v13, 0.0 }
 0x72e   : > { %v2379_v57 = vadd.f32 %v2378_v42, %v2377_v38 }
 0x72f   : > { %v2406_v0 = vsel %vm2000_vm0, %v2393_v15, 0.0 }
 0x730   : > { %2380 = vadd.xlane.f32.xlu1 %v2379_v57  ;;  %v2407_v43 = vadd.f32 %v2406_v0, %v2405_v55 }
 0x732   : > { %2408 = vadd.xlane.f32.xlu0 %v2407_v43 }
 0x73a   : > { %2372 = vadd.xlane.f32.xlu0 %v2371_v52 }
 0x79d   : > { %v2401_v25 = vpop.xlane.xlu2 %2400 }
 0x7a3   : > { %v2381_v3 = vpop.xlane.xlu1 %2380 }
 0x7a4   : > { %2433 = vmatpush.msrb.mxu0 %v2381_v3 }
 0x7a5   : > { %v2409_v61 = vpop.xlane.xlu0 %2408 }
 0x7a6   : > { %2456 = vmatpush.msra.mxu2 %v2409_v61 }
 0x7a8   : > { %2457 = vmatpush.msra.mxu2 %v2401_v25 }
 0x7a9   : > { %5371 = vmatmul.msk.f32.vlgmr.msra.gmra.mxu2 %vm799_vm7, %v2411_v11 }
 0x7ad   : > { %v2373_v44 = vpop.xlane.xlu0 %2372 }
 0x7ae   : > { %2434 = vmatpush.msrb.mxu0 %v2373_v44 }
 0x7af   : > { %5369 = vmatmul.msk.f32.vlgmr.msrb.gmra.mxu0 %vm799_vm7, %v2411_v11 }
 0x7b1   : > { %5372 = vmatmul.msk.f32.gmra.mxu2 %vm799_vm7, %v2412_v59 }
 0x7b7   : > { %5370 = vmatmul.msk.f32.gmra.mxu0 %vm799_vm7, %v2412_v59 }
 0x82c   : > { %v2436_v50 = vpop.f32.mrf.mxu0  ;;  %v2459_v16 = vpop.f32.mrf.mxu2 }
 0x82d   : > { %v2465_v27 = vmul.f32 %v2436_v50, %v2436_v50 }
 0x82f   : > { %v2467_v60 = vsub.f32 %v2459_v16, %v2465_v27 }
 0x831   : > { %v2469_v34 = vmax.f32 %v2467_v60, 0.0 }
 0x833   : > { %v2471_v54 = vadd.f32 1e-05, %v2469_v34 }
 0x834   : > { %v2439_v35 = vpop.f32.mrf.mxu0  ;;  %v2462_v2 = vpop.f32.mrf.mxu2 }
 0x835   : > { %6555 = vrsqrt.f32 %v2471_v54  ;;  %v2466_v39 = vmul.f32 %v2439_v35, %v2439_v35  ;;  %vm2479_vm14 = vweird.f32 %v2471_v54 }
 0x837   : > { %v2468_v24 = vsub.f32 %v2462_v2, %v2466_v39 }
 0x839   : > { %v2470_v6 = vmax.f32 %v2468_v24, 0.0 }
 0x83b   : > { %v6556_v21 = vpop.eup %6555  ;;  %v2472_v47 = vadd.f32 1e-05, %v2470_v6 }
 0x83c   : > { %v2474_v10 = vmul.f32 %v6556_v21, %v2471_v54  ;;  %vm2480_vm13 = vweird.f32 %v6556_v21 }
 0x83d   : > { %6557 = vrsqrt.f32 %v2472_v47  ;;  %vm2481_vm15 = vmor %vm2479_vm14, %vm2480_vm13  ;;  %vm2489_vm3 = vweird.f32 %v2472_v47 }
 0x83e   : > { %v2475_v22 = vmul.f32 %v6556_v21, %v2474_v10 }
 0x840   : > { %v2476_v30 = vmul.f32 0.5, %v2475_v22 }
 0x842   : > { %v2477_v7 = vsub.f32 1.5, %v2476_v30 }
 0x843   : > { %v6558_v1 = vpop.eup %6557 }
 0x844   : > { %v2484_v58 = vmul.f32 %v6558_v1, %v2472_v47  ;;  %v2478_v8 = vmul.f32 %v6556_v21, %v2477_v7  ;;  %vm2490_vm0 = vweird.f32 %v6558_v1 }
 0x845   : > { %vm2491_vm4 = vmor %vm2489_vm3, %vm2490_vm0 }
 0x846   : > { %v2485_v32 = vmul.f32 %v6558_v1, %v2484_v58  ;;  %v2482_v29 = vsel %vm2481_vm15, %v6556_v21, %v2478_v8 }
 0x847   : > { %v2496_v28 = vmul.f32 %v2494_v20, %v2482_v29 }
 0x848   : > { %v2486_v37 = vmul.f32 0.5, %v2485_v32 }
 0x849   : > { %2507 = vperm.xlu1 %5769, %v2496_v28   ;;  %v2501_v38 = vmul.f32 %v2496_v28, %v2436_v50 }
 0x84a   : > { %v2487_v4 = vsub.f32 1.5, %v2486_v37 }
 0x84b   : > { %v2503_v15 = vsub.f32 %v2499_v23, %v2501_v38 }
 0x84c   : > { %v2488_v33 = vmul.f32 %v6558_v1, %v2487_v4 }
 0x84e   : > { %v2492_v19 = vsel %vm2491_vm4, %v6558_v1, %v2488_v33 }
 0x84f   : > { %v2497_v5 = vmul.f32 %v2495_v18, %v2492_v19 }
 0x851   : > { %2512 = vperm.xlu2 %5771, %v2497_v5   ;;  %v2502_v13 = vmul.f32 %v2497_v5, %v2439_v35 }
 0x853   : > { %v2504_v26 = vsub.f32 %v2500_v63, %v2502_v13 }
 0x855   : > { %2534 = vperm.xlu0 %5770, %v2504_v26  }
 0x859   : > { %2529 = vperm.xlu2 %5771, %v2503_v15  }
 0x8ab   : > { %v2513_v42 = vpop.permute.xlu2 %2512 }
 0x8ac   : > { %v2525_v16 = vmul.f32 %v2513_v42, %v8142_v41  ;;  %v2526_v27 = vmul.f32 %v2513_v42, %v8149_v51  ;;  %v2523_v60 = vmul.f32 %v2513_v42, %v8126_v49  ;;  %v2524_v34 = vmul.f32 %v2513_v42, %v8133_v14 }
 0x8ad   : > { %v2521_v21 = vmul.f32 %v2513_v42, %v8111_v12  ;;  %v2522_v47 = vmul.f32 %v2513_v42, %v8119_v62 }
 0x8b3   : > { %v2530_v9 = vpop.permute.xlu2 %2529 }
 0x8bb   : > { %v2508_v57 = vpop.permute.xlu1 %2507 }
 0x8bc   : > { %v2517_v55 = vmul.f32 %v2508_v57, %v8108_v40  ;;  %v2518_v0 = vmul.f32 %v2508_v57, %v8114_v45  ;;  %v2519_v36 = vmul.f32 %v2508_v57, %v8124_v46  ;;  %v2520_v43 = vmul.f32 %v2508_v57, %v8137_v53 }
 0x8bd   : > { %v2515_v17 = vmul.f32 %v2508_v57, %v8101_v48  ;;  %v2516_v31 = vmul.f32 %v2508_v57, %v8106_v56 }
 0x8be   : > { %v8166_v52 = vadd.f32 %v2530_v9, %v2517_v55  ;;  %v2540_v3 = vadd.f32 %v2530_v9, %v2518_v0  ;;  %v2541_v61 = vadd.f32 %v2530_v9, %v2519_v36  ;;  %v8168_v11 = vadd.f32 %v2530_v9, %v2520_v43 }
 0x8bf   : > { %v2537_v46 = vadd.f32 %v2530_v9, %v2515_v17  ;;  %v2538_v53 = vadd.f32 %v2530_v9, %v2516_v31 }
 0x8c0   : > { %v2551_v25 = vmax.f32 %v8166_v52, 0.0  ;;  %v2552_v40 = vmax.f32 %v2540_v3, 0.0  ;;  %v8171_v44 = vmax.f32 %v2541_v61, 0.0  ;;  %v2554_v45 = vmax.f32 %v8168_v11, 0.0 }
 0x8c1   : > { %v2549_v59 = vmax.f32 %v2537_v46, 0.0  ;;  %v2550_v50 = vmax.f32 %v2538_v53, 0.0 }
 0x8c2   : > { %v6012_v48 = vpack.i.bf16 %v2552_v40, %v2551_v25  ;;  %v6017_v56 = vpack.i.bf16 %v2554_v45, %v8171_v44 }
 0x8c3   : > { %v6022_v6 = vpack.i.bf16 %v2550_v50, %v2549_v59 }
 0x8c4   : > { %6013 = vrot.lane.b32.xlu2 %v6012_v48, %s6734_s24  ;;  %6018 = vrot.lane.b32.xlu0 %v6017_v56, %s6734_s24 }
 0x8c7   : > { %v2535_v54 = vpop.permute.xlu0 %2534 }
 0x8c8   : > { %v2547_v35 = vadd.f32 %v2535_v54, %v2525_v16  ;;  %v2548_v2 = vadd.f32 %v2535_v54, %v2526_v27  ;;  %v2545_v39 = vadd.f32 %v2535_v54, %v2523_v60  ;;  %v2546_v24 = vadd.f32 %v2535_v54, %v2524_v34 }
 0x8c9   : > { %v2543_v51 = vadd.f32 %v2535_v54, %v2521_v21  ;;  %v2544_v7 = vadd.f32 %v2535_v54, %v2522_v47 }
 0x8ca   : > { %v8187_v10 = vmax.f32 %v2547_v35, 0.0  ;;  %v2560_v22 = vmax.f32 %v2548_v2, 0.0  ;;  %v2557_v41 = vmax.f32 %v2545_v39, 0.0  ;;  %v2558_v30 = vmax.f32 %v2546_v24, 0.0 }
 0x8cb   : > { %v2555_v1 = vmax.f32 %v2543_v51, 0.0  ;;  %v2556_v12 = vmax.f32 %v2544_v7, 0.0 }
 0x8cc   : > { %6023 = vrot.lane.b32.xlu2 %v6022_v6, %s6734_s24  ;;  %v6032_v49 = vpack.i.bf16 %v2560_v22, %v8187_v10  ;;  %v6027_v14 = vpack.i.bf16 %v2558_v30, %v2557_v41 }
 0x8cd   : > { %v6037_v58 = vpack.i.bf16 %v2556_v12, %v2555_v1 }
 0x8ce   : > { %6033 = vrot.lane.b32.xlu1 %v6032_v49, %s6734_s24  ;;  %6028 = vrot.lane.b32.xlu0 %v6027_v14, %s6734_s24 }
 0x8d6   : > { %6038 = vrot.lane.b32.xlu1 %v6037_v58, %s6734_s24 }
 0x91e   : > { %v6014_v62 = vpop.permute.xlu2 %6013 }
 0x91f   : > { %v6015_v20 = vunpack.i.l.bf16 %v6014_v62  ;;  %v6016_v5 = vunpack.i.h.bf16 %v6014_v62 }
 0x921   : > { %v2593_v0 = vsel %vm423_vm8, %v6015_v20, %v6016_v5 }
 0x922   : > { %v2611_v46 = vmax.f32 %v2551_v25, %v2593_v0 }
 0x926   : > { %v6024_v8 = vpop.permute.xlu2 %6023 }
 0x927   : > { %v6026_v32 = vunpack.i.h.bf16 %v6024_v8  ;;  %v6025_v29 = vunpack.i.l.bf16 %v6024_v8 }
 0x929   : > { %v2591_v28 = vsel %vm423_vm8, %v6025_v29, %v6026_v32  ;;  %v2592_v37 = vsel %vm423_vm8, %v6026_v32, %v6015_v20 }
 0x92a   : > { %v8196_v4 = vmax.f32 %v2549_v59, %v2591_v28  ;;  %v8198_v33 = vmax.f32 %v2550_v50, %v2592_v37 }
 0x92c   : > { %v6047_v18 = vpack.i.bf16 %v8198_v33, %v8196_v4 }
 0x92e   : > { %6048 = vrot.lane.b32.xlu1 %v6047_v18, %s6732_s22 }
 0x936   : > { %v6019_v19 = vpop.permute.xlu0 %6018 }
 0x937   : > { %v6021_v63 = vunpack.i.h.bf16 %v6019_v19  ;;  %v6020_v13 = vunpack.i.l.bf16 %v6019_v19 }
 0x939   : > { %v2594_v26 = vsel %vm423_vm8, %v6016_v5, %v6020_v13  ;;  %v2625_v38 = vsel %vm423_vm8, %v6020_v13, %v6021_v63  ;;  %v2632_v31 = vmax.f32 %v2554_v45, %v6021_v63  ;;  %v2613_v21 = vmax.f32 %v8171_v44, %v6020_v13 }
 0x93a   : > { %v2612_v23 = vmax.f32 %v2552_v40, %v2594_v26  ;;  %v2631_v15 = vmax.f32 %v8171_v44, %v2625_v38 }
 0x93c   : > { %v6042_v42 = vpack.i.bf16 %v2631_v15, %v2612_v23 }
 0x93e   : > { %6043 = vrot.lane.b32.xlu2 %v6042_v42, %s6732_s22 }
 0x940   : > { %v6034_v57 = vpop.permute.xlu1 %6033  ;;  %v6029_v55 = vpop.permute.xlu0 %6028 }
 0x941   : > { %v6036_v36 = vunpack.i.h.bf16 %v6034_v57  ;;  %v8208_v43 = vunpack.i.l.bf16 %v6034_v57  ;;  %v6031_v9 = vunpack.i.h.bf16 %v6029_v55  ;;  %v6030_v17 = vunpack.i.l.bf16 %v6029_v55 }
 0x943   : > { %v2634_v3 = vmax.f32 %v2560_v22, %v6036_v36  ;;  %v2626_v61 = vsel %vm423_vm8, %v8208_v43, %v6036_v36  ;;  %v2597_v40 = vsel %vm423_vm8, %v6030_v17, %v6031_v9  ;;  %v2598_v48 = vsel %vm423_vm8, %v6031_v9, %v8208_v43 }
 0x944   : > { %v2633_v53 = vmax.f32 %v8187_v10, %v2626_v61  ;;  %v8220_v56 = vmax.f32 %v2557_v41, %v2597_v40  ;;  %v8222_v50 = vmax.f32 %v2558_v30, %v2598_v48  ;;  %v2618_v61 = vmax.f32 %v8187_v10, %v8208_v43 }
 0x945   : > { %v6052_v59 = vpack.i.bf16 %v2632_v31, %v2634_v3 }
 0x946   : > { %v6062_v11 = vpack.i.bf16 %v2611_v46, %v2633_v53  ;;  %v6057_v45 = vpack.i.bf16 %v8222_v50, %v8220_v56 }
 0x947   : > { %6053 = vrot.lane.b32.xlu2 %v6052_v59, %s6732_s22 }
 0x948   : > { %6063 = vrot.lane.b32.xlu1 %v6062_v11, %s6732_s22  ;;  %v6039_v52 = vpop.permute.xlu1 %6038  ;;  %6058 = vrot.lane.b32.xlu0 %v6057_v45, %s6732_s22 }
 0x949   : > { %v6041_v25 = vunpack.i.h.bf16 %v6039_v52  ;;  %v6040_v16 = vunpack.i.l.bf16 %v6039_v52 }
 0x94b   : > { %v2595_v27 = vsel %vm423_vm8, %v6040_v16, %v6041_v25  ;;  %v2596_v60 = vsel %vm423_vm8, %v6041_v25, %v6030_v17  ;;  %vm2961_vm8 = vcmask 113664  }
 0x94c   : > { %v8231_v34 = vmax.f32 %v2555_v1, %v2595_v27  ;;  %v2615_v54 = vmax.f32 %v2556_v12, %v2596_v60 }
 0x94e   : > { %v6067_v35 = vpack.i.bf16 %v2615_v54, %v8231_v34 }
 0x950   : > { %6068 = vrot.lane.b32.xlu0 %v6067_v35, %s6732_s22  ;;  %s6742_s22 = smov 116  }
 0x998   : > { %v6044_v2 = vpop.permute.xlu2 %6043 }
 0x999   : > { %v6046_v24 = vunpack.i.h.bf16 %v6044_v2  ;;  %v6045_v30 = vunpack.i.l.bf16 %v6044_v2 }
 0x99b   : > { %v2674_v7 = vsel %vm517_vm5, %v6045_v30, %v6046_v24 }
 0x99c   : > { %v8246_v8 = vmax.f32 %v2612_v23, %v2674_v7 }
 0x9a0   : > { %v6049_v41 = vpop.permute.xlu1 %6048 }
 0x9a1   : > { %v8235_v39 = vpop.permute.xlu2 %6053  ;;  %v6051_v49 = vunpack.i.h.bf16 %v6049_v41  ;;  %v6050_v14 = vunpack.i.l.bf16 %v6049_v41 }
 0x9a2   : > { %v6056_v6 = vunpack.i.h.bf16 %v8235_v39  ;;  %v6055_v17 = vunpack.i.l.bf16 %v8235_v39 }
 0x9a3   : > { %v2671_v1 = vsel %vm517_vm5, %v6050_v14, %v6051_v49 }
 0x9a4   : > { %v2675_v47 = vsel %vm517_vm5, %v6046_v24, %v6056_v6  ;;  %v8249_v44 = vmax.f32 %v8196_v4, %v2671_v1 }
 0x9a5   : > { %v8240_v22 = vmax.f32 %v2613_v21, %v2675_v47 }
 0x9ba   : > { %v6064_v51 = vpop.permute.xlu1 %6063  ;;  %v6059_v4 = vpop.permute.xlu0 %6058 }
 0x9bb   : > { %v6066_v12 = vunpack.i.h.bf16 %v6064_v51  ;;  %v6061_v18 = vunpack.i.h.bf16 %v6059_v4  ;;  %v6060_v19 = vunpack.i.l.bf16 %v6059_v4 }
 0x9bd   : > { %v2672_v58 = vsel %vm517_vm5, %v6051_v49, %v6066_v12  ;;  %v2673_v62 = vsel %vm517_vm5, %v6066_v12, %v6045_v30  ;;  %v2678_v63 = vsel %vm517_vm5, %v6060_v19, %v6061_v18 }
 0x9be   : > { %v8252_v20 = vmax.f32 %v8198_v33, %v2672_v58  ;;  %v8254_v32 = vmax.f32 %v2611_v46, %v2673_v62  ;;  %v6065_v33 = vunpack.i.l.bf16 %v6064_v51  ;;  %v8286_v38 = vmax.f32 %v8220_v56, %v2678_v63 }
 0x9c0   : > { %v8258_v29 = vpack.i.bf16 %v8252_v20, %v8249_v44  ;;  %v6072_v28 = vpack.i.bf16 %v8246_v8, %v8254_v32  ;;  %v6102_v37 = vpack.i.bf16 %v8254_v32, %v8252_v20  ;;  %v2679_v5 = vsel %vm517_vm5, %v6061_v18, %v6065_v33 }
 0x9c1   : > { %v8283_v26 = vmax.f32 %v8222_v50, %v2679_v5  ;;  %v6177_v31 = vpack.i.bf16 %v8249_v44, %v8286_v38  ;;  %v2680_v3 = vsel %vm517_vm5, %v6065_v33, %v6055_v17 }
 0x9c2   : > { %6093 = vrot.lane.b32.xlu0 %v8258_v29, %s6736_s30  ;;  %6083 = vrot.lane.b32.xlu2 %v8258_v29, %s6737_s12  ;;  %v6069_v13 = vpop.permute.xlu0 %6068  ;;  %v8319_v40 = vmax.f32 %v2618_v61, %v2680_v3 }
 0x9c3   : > { %6073 = vrot.lane.b32.xlu1 %v6072_v28, %s6737_s12  ;;  %v6071_v23 = vunpack.i.h.bf16 %v6069_v13  ;;  %v6070_v15 = vunpack.i.l.bf16 %v6069_v13  ;;  %v6142_v42 = vpack.i.bf16 %v8283_v26, %v8286_v38  ;;  %v6232_v10 = vpack.i.bf16 %v8246_v8, %v8283_v26 }
 0x9c4   : > { %v6197_v46 = vpack.i.bf16 %v8240_v22, %v8319_v40 }
 0x9c5   : > { %v2677_v57 = vsel %vm517_vm5, %v6071_v23, %v6060_v19  ;;  %v2676_v55 = vsel %vm517_vm5, %v6070_v15, %v6071_v23  ;;  %vm3000_vm5 = vcmask 97280  }
 0x9c6   : > { %v8297_v0 = vmax.f32 %v2615_v54, %v2677_v57  ;;  %v8300_v36 = vmax.f32 %v8231_v34, %v2676_v55 }
 0x9c8   : > { %v6152_v9 = vpack.i.bf16 %v8297_v0, %v8300_v36 }
 0x9ca   : > { %6103 = vrot.lane.b32.xlu0 %v6102_v37, %s6738_s10  ;;  %6088 = vrot.lane.b32.xlu2 %v6072_v28, %s6739_s14 }
 0x9cb   : > { %6078 = vrot.lane.b32.xlu1 %v6072_v28, %s6736_s30 }
 0x9d2   : > { %6118 = vrot.lane.b32.xlu0 %v8258_v29, %s6730_s20  ;;  %6098 = vrot.lane.b32.xlu2 %v6072_v28, %s6730_s20 }
 0x9d3   : > { %6108 = vrot.lane.b32.xlu1 %v8258_v29, %s6739_s14 }
 0x9da   : > { %6133 = vrot.lane.b32.xlu0 %v6072_v28, %s6733_s23  ;;  %6113 = vrot.lane.b32.xlu2 %v6072_v28, %s6727_s17 }
 0x9db   : > { %6123 = vrot.lane.b32.xlu1 %v6072_v28, %s6740_s15 }
 0x9e2   : > { %6143 = vrot.lane.b32.xlu0 %v6142_v42, %s6737_s12  ;;  %6128 = vrot.lane.b32.xlu2 %v8258_v29, %s6727_s17 }
 0x9e3   : > { %6138 = vrot.lane.b32.xlu1 %v8258_v29, %s6740_s15 }
 0x9ea   : > { %6153 = vrot.lane.b32.xlu0 %v6152_v9, %s6737_s12  ;;  %6148 = vrot.lane.b32.xlu2 %v6142_v42, %s6736_s30 }
 0x9eb   : > { %6163 = vrot.lane.b32.xlu1 %v6152_v9, %s6736_s30 }
 0x9f2   : > { %6158 = vrot.lane.b32.xlu0 %v6142_v42, %s6739_s14  ;;  %6173 = vrot.lane.b32.xlu2 %v6152_v9, %s6738_s10 }
 0x9f3   : > { %6168 = vrot.lane.b32.xlu1 %v6142_v42, %s6730_s20 }
 0x9fa   : > { %6178 = vrot.lane.b32.xlu0 %v6177_v31, %s6738_s10  ;;  %6188 = vrot.lane.b32.xlu2 %v6142_v42, %s6727_s17 }
 0x9fb   : > { %6183 = vrot.lane.b32.xlu1 %v6152_v9, %s6739_s14 }
 0xa02   : > { %6193 = vrot.lane.b32.xlu0 %v6152_v9, %s6730_s20  ;;  %6208 = vrot.lane.b32.xlu2 %v6152_v9, %s6727_s17 }
 0xa03   : > { %6198 = vrot.lane.b32.xlu1 %v6197_v46, %s6737_s12 }
 0xa0a   : > { %6213 = vrot.lane.b32.xlu0 %v6197_v46, %s6736_s30  ;;  %6228 = vrot.lane.b32.xlu2 %v6197_v46, %s6739_s14 }
 0xa0b   : > { %6203 = vrot.lane.b32.xlu1 %v6142_v42, %s6740_s15 }
 0xa12   : > { %6218 = vrot.lane.b32.xlu0 %v6142_v42, %s6733_s23  ;;  %6233 = vrot.lane.b32.xlu2 %v6232_v10, %s6738_s10 }
 0xa13   : > { %6223 = vrot.lane.b32.xlu1 %v6152_v9, %s6740_s15 }
 0xa1a   : > { %6243 = vrot.lane.b32.xlu0 %v6152_v9, %s6733_s23  ;;  %6238 = vrot.lane.b32.xlu2 %v8258_v29, %s6733_s23 }
 0xa1b   : > { %6248 = vrot.lane.b32.xlu1 %v6197_v46, %s6730_s20 }
 0xa1c   : > { %v6084_v43 = vpop.permute.xlu2 %6083 }
 0xa1d   : > { %v6086_v47 = vunpack.i.h.bf16 %v6084_v43  ;;  %v6085_v41 = vunpack.i.l.bf16 %v6084_v43 }
 0xa1f   : > { %v2962_v4 = vsel %vm2961_vm8, %v6085_v41, %v6086_v47 }
 0xa22   : > { %6253 = vrot.lane.b32.xlu0 %v6197_v46, %s6727_s17  ;;  %6263 = vrot.lane.b32.xlu2 %v6197_v46, %s6733_s23 }
 0xa23   : > { %6258 = vrot.lane.b32.xlu1 %v6197_v46, %s6740_s15 }
 0xa24   : > { %v8341_v53 = vpop.permute.xlu2 %6088 }
 0xa2a   : > { %6268 = vrot.lane.b32.xlu0 %v6197_v46, %s6738_s10 }
 0xa2c   : > { %v8344_v48 = vpop.permute.xlu2 %6098 }
 0xa34   : > { %v6094_v56 = vpop.permute.xlu0 %6093  ;;  %v8346_v59 = vpop.permute.xlu2 %6113 }
 0xa35   : > { %v8348_v50 = vpop.permute.xlu1 %6073  ;;  %v6096_v37 = vunpack.i.h.bf16 %v6094_v56  ;;  %v6095_v33 = vunpack.i.l.bf16 %v6094_v56 }
 0xa36   : > { %v6075_v14 = vunpack.i.l.bf16 %v8348_v50  ;;  %v6076_v41 = vunpack.i.h.bf16 %v8348_v50 }
 0xa37   : > { %v2923_v57 = vsel %vm799_vm7, %v6095_v33, %v6096_v37 }
 0xa38   : > { %v2963_v5 = vsel %vm2961_vm8, %v6086_v47, %v6075_v14 }
 0xa3c   : > { %v8350_v11 = vpop.permute.xlu0 %6103  ;;  %v8352_v45 = vpop.permute.xlu2 %6128 }
 0xa3d   : > { %v8354_v52 = vpop.permute.xlu1 %6078  ;;  %v6106_v9 = vunpack.i.h.bf16 %v8350_v11  ;;  %v6105_v17 = vunpack.i.l.bf16 %v8350_v11 }
 0xa3e   : > { %v6080_v18 = vunpack.i.l.bf16 %v8354_v52  ;;  %v6081_v33 = vunpack.i.h.bf16 %v8354_v52 }
 0xa40   : > { %v2924_v55 = vsel %vm799_vm7, %v6096_v37, %v6080_v18 }
 0xa44   : > { %v8356_v25 = vpop.permute.xlu0 %6118  ;;  %v8358_v16 = vpop.permute.xlu2 %6148 }
 0xa45   : > { %v8360_v27 = vpop.permute.xlu1 %6108  ;;  %v6150_v19 = vunpack.i.l.bf16 %v8358_v16 }
 0xa46   : > { %v6111_v61 = vunpack.i.h.bf16 %v8360_v27 }
 0xa4c   : > { %v8362_v60 = vpop.permute.xlu0 %6133  ;;  %v8364_v34 = vpop.permute.xlu2 %6173 }
 0xa4d   : > { %v6176_v54 = vunpack.i.h.bf16 %v8364_v34  ;;  %v6175_v35 = vunpack.i.l.bf16 %v8364_v34  ;;  %v8368_v2 = vpop.permute.xlu1 %6123  ;;  %v6110_v34 = vunpack.i.l.bf16 %v8360_v27 }
 0xa4f   : > { %v3005_v39 = vsel %vm3000_vm5, %v6175_v35, %v6176_v54 }
 0xa50   : > { %3067 = vmatpush.msra.mxu3 %v3005_v39 }
 0xa54   : > { %v8371_v24 = vpop.permute.xlu0 %6143  ;;  %v8373_v6 = vpop.permute.xlu2 %6188 }
 0xa55   : > { %v8375_v21 = vpop.permute.xlu1 %6138  ;;  %v6145_v51 = vunpack.i.l.bf16 %v8371_v24  ;;  %v6146_v46 = vunpack.i.h.bf16 %v8371_v24 }
 0xa5c   : > { %v6154_v30 = vpop.permute.xlu0 %6153  ;;  %v8377_v49 = vpop.permute.xlu2 %6208 }
 0xa5d   : > { %v6156_v7 = vunpack.i.h.bf16 %v6154_v30  ;;  %v6155_v1 = vunpack.i.l.bf16 %v6154_v30  ;;  %v6164_v12 = vpop.permute.xlu1 %6163 }
 0xa5e   : > { %v6166_v58 = vunpack.i.h.bf16 %v6164_v12  ;;  %v6165_v62 = vunpack.i.l.bf16 %v6164_v12  ;;  %v6151_v12 = vunpack.i.h.bf16 %v8358_v16 }
 0xa5f   : > { %v2966_v29 = vsel %vm2961_vm8, %v6155_v1, %v6156_v7  ;;  %v2967_v28 = vsel %vm2961_vm8, %v6156_v7, %v6145_v51  ;;  %v6090_v1 = vunpack.i.l.bf16 %v8341_v53 }
 0xa60   : > { %3030 = vmatpush.msrb.mxu1 %v2966_v29  ;;  %3076 = vmatpush.msra.mxu0 %v2967_v28  ;;  %v2927_v63 = vsel %vm799_vm7, %v6165_v62, %v6166_v58  ;;  %v2928_v13 = vsel %vm799_vm7, %v6166_v58, %v6150_v19  ;;  %v2968_v29 = vsel %vm2961_vm8, %v6145_v51, %v6146_v46 }
 0xa61   : > { %v2885_v28 = vsel %vm2884_vm9, %v6110_v34, %v6111_v61  ;;  %v2886_v37 = vsel %vm2884_vm9, %v6111_v61, %v6090_v1  ;;  %v2964_v51 = vsel %vm2961_vm8, %v6075_v14, %v6076_v41 }
 0xa62   : > { %3031 = vmatpush.msrb.mxu1 %v2962_v4  ;;  %3077 = vmatpush.msra.mxu0 %v2963_v5  ;;  %v8426_v4 = vld [vmem:[#allocation2 + $0x68] sm:$0xff] }
 0xa64   : > { %v8391_v23 = vpop.permute.xlu0 %6158  ;;  %v8393_v15 = vpop.permute.xlu2 %6228  ;;  %3032 = vmatpush.msrb.mxu1 %v2927_v63  ;;  %3078 = vmatpush.msra.mxu0 %v2928_v13 }
 0xa65   : > { %v8395_v42 = vpop.permute.xlu1 %6168  ;;  %v6160_v35 = vunpack.i.l.bf16 %v8391_v23  ;;  %v6161_v63 = vunpack.i.h.bf16 %v8391_v23 }
 0xa66   : > { %3033 = vmatpush.msrb.mxu1 %v2923_v57  ;;  %3079 = vmatpush.msra.mxu0 %v2924_v55  ;;  %v2929_v57 = vsel %vm799_vm7, %v6150_v19, %v6151_v12  ;;  %v6170_v55 = vunpack.i.l.bf16 %v8395_v42  ;;  %v6120_v19 = vunpack.i.l.bf16 %v8356_v25 }
 0xa6c   : > { %v6179_v31 = vpop.permute.xlu0 %6178  ;;  %v8403_v3 = vpop.permute.xlu2 %6233 }
 0xa6d   : > { %v6181_v10 = vunpack.i.h.bf16 %v6179_v31  ;;  %v6180_v43 = vunpack.i.l.bf16 %v6179_v31  ;;  %v6184_v56 = vpop.permute.xlu1 %6183  ;;  %v6235_v11 = vunpack.i.l.bf16 %v8403_v3  ;;  %v6236_v62 = vunpack.i.h.bf16 %v8403_v3 }
 0xa6e   : > { %v6186_v39 = vunpack.i.h.bf16 %v6184_v56  ;;  %v6185_v47 = vunpack.i.l.bf16 %v6184_v56  ;;  %v6091_v56 = vunpack.i.h.bf16 %v8341_v53  ;;  %v9472_v53 = vunpack.i.h.bf16 %v8344_v48 }
 0xa6f   : > { %v3001_v30 = vsel %vm3000_vm5, %v6181_v10, %v6105_v17  ;;  %v3006_v7 = vsel %vm3000_vm5, %v6176_v54, %v6180_v43  ;;  %v3002_v54 = vsel %vm3000_vm5, %v6105_v17, %v6106_v9  ;;  %v3007_v5 = vsel %vm3000_vm5, %v6180_v43, %v6235_v11 }
 0xa70   : > { %v2889_v58 = vsel %vm2884_vm9, %v6185_v47, %v6186_v39  ;;  %3068 = vmatpush.msra.mxu3 %v3001_v30  ;;  %v2890_v27 = vsel %vm2884_vm9, %v6186_v39, %v6160_v35  ;;  %3113 = vmatpush.msrb.mxu2 %v3006_v7  ;;  %v3003_v14 = vsel %vm3000_vm5, %v6106_v9, %v6236_v62  ;;  %v6121_v10 = vunpack.i.h.bf16 %v8356_v25 }
 0xa71   : > { %3034 = vmatpush.msrb.mxu1 %v2889_v58  ;;  %3080 = vmatpush.msra.mxu0 %v2890_v27  ;;  %v2925_v9 = vsel %vm799_vm7, %v6080_v18, %v6081_v33  ;;  %v6100_v47 = vunpack.i.l.bf16 %v8344_v48  ;;  %v6211_v25 = vunpack.i.h.bf16 %v8377_v49  ;;  %v6210_v30 = vunpack.i.l.bf16 %v8377_v49 }
 0xa72   : > { %3122 = vmatpush.msrb.mxu3 %v2968_v29  ;;  %3114 = vmatpush.msrb.mxu2 %v3002_v54  ;;  %v6131_v58 = vunpack.i.h.bf16 %v8352_v45  ;;  %v6171_v18 = vunpack.i.h.bf16 %v8395_v42  ;;  %v2891_v27 = vsel %vm2884_vm9, %v6160_v35, %v6161_v63  ;;  %v6130_v29 = vunpack.i.l.bf16 %v8352_v45  ;;  %v8485_v35 = vld [vmem:[#allocation2 + $0x78] sm:$0xff] }
 0xa73   : > { %3035 = vmatpush.msrb.mxu1 %v2885_v28  ;;  %3081 = vmatpush.msra.mxu0 %v2886_v37  ;;  %v6190_v49 = vunpack.i.l.bf16 %v8373_v6  ;;  %v2846_v54 = vsel %vm770_vm2, %v6120_v19, %v6121_v10  ;;  %v2847_v28 = vsel %vm770_vm2, %v6121_v10, %v6100_v47  ;;  %v9452_v37 = vunpack.i.h.bf16 %v8344_v48 }
 0xa74   : > { %3123 = vmatpush.msrb.mxu3 %v2964_v51  ;;  %3159 = vmatpush.msra.mxu2 %v3007_v5  ;;  %v6194_v13 = vpop.permute.xlu0 %6193  ;;  %v2887_v45 = vsel %vm2884_vm9, %v6090_v1, %v6091_v56  ;;  %v6115_v51 = vunpack.i.l.bf16 %v8346_v59  ;;  %v2852_v1 = vsel %vm770_vm2, %v6170_v55, %v6171_v18  ;;  %v2808_v10 = vsel %vm664_vm1, %v6130_v29, %v6131_v58 }
 0xa75   : > { %v6196_v17 = vunpack.i.h.bf16 %v6194_v13  ;;  %v6195_v31 = vunpack.i.l.bf16 %v6194_v13  ;;  %v8442_v61 = vpop.permute.xlu1 %6198  ;;  %5375 = vmatmul.msk.f32.vlgmr.msrb.gmra.mxu2 %vm799_vm7, %v8426_v4  ;;  %5373 = vmatmul.msk.f32.vlgmr.msra.gmra.mxu3 %vm799_vm7, %v8426_v4  ;;  %v2812_v13 = vsel %vm664_vm1, %v6210_v30, %v6211_v25  ;;  %v9473_v3 = vunpack.i.h.bf16 %v8373_v6 }
 0xa76   : > { %v6200_v43 = vunpack.i.l.bf16 %v8442_v61  ;;  %3124 = vmatpush.msrb.mxu3 %v2929_v57  ;;  %3160 = vmatpush.msra.mxu2 %v3003_v14  ;;  %v6201_v7 = vunpack.i.h.bf16 %v8442_v61  ;;  %v2813_v57 = vsel %vm664_vm1, %v6211_v25, %v6190_v49  ;;  %v2809_v19 = vsel %vm664_vm1, %v6131_v58, %v6115_v51 }
 0xa77   : > { %v2850_v34 = vsel %vm770_vm2, %v6195_v31, %v6196_v17  ;;  %v2851_v39 = vsel %vm770_vm2, %v6196_v17, %v6170_v55  ;;  %v9451_v17 = vunpack.i.h.bf16 %v8373_v6  ;;  %v6230_v58 = vunpack.i.l.bf16 %v8393_v15 }
 0xa78   : > { %3125 = vmatpush.msrb.mxu3 %v2925_v9  ;;  %3214 = vmatpush.msrb.mxu2 %v6200_v43  ;;  %v9448_v9 = vunpack.i.h.bf16 %v8346_v59 }
 0xa79   : > { %3036 = vmatpush.msrb.mxu1 %v2850_v34  ;;  %3082 = vmatpush.msra.mxu0 %v2851_v39  ;;  %v2848_v34 = vsel %vm770_vm2, %v6100_v47, %v9452_v37  ;;  %v2814_v30 = vsel %vm664_vm1, %v6190_v49, %v9451_v17  ;;  %v9449_v47 = vunpack.i.h.bf16 %v8368_v2  ;;  %v2892_v52 = vsel %vm2884_vm9, %v6161_v63, %v6230_v58 }
 0xa7a   : > { %3126 = vmatpush.msrb.mxu3 %v2891_v27  ;;  %3215 = vmatpush.msrb.mxu2 %v6201_v7  ;;  %v6125_v27 = vunpack.i.l.bf16 %v8368_v2  ;;  %v2810_v29 = vsel %vm664_vm1, %v6115_v51, %v9448_v9  ;;  %v6141_v51 = vunpack.i.h.bf16 %v8375_v21 }
 0xa7b   : > { %3037 = vmatpush.msrb.mxu1 %v2846_v54  ;;  %3083 = vmatpush.msra.mxu0 %v2847_v28  ;;  %v6231_v54 = vunpack.i.h.bf16 %v8393_v15 }
 0xa7c   : > { %3127 = vmatpush.msrb.mxu3 %v2887_v45  ;;  %v8488_v5 = vpop.permute.xlu0 %6213  ;;  %v2771_v9 = vsel %vm2769_vm10, %v6141_v51, %v6125_v27 }
 0xa7d   : > { %v6215_v31 = vunpack.i.l.bf16 %v8488_v5  ;;  %v8494_v14 = vpop.permute.xlu1 %6203  ;;  %3038 = vmatpush.msrb.mxu1 %v2812_v13  ;;  %3084 = vmatpush.msra.mxu0 %v2813_v57  ;;  %v6216_v39 = vunpack.i.h.bf16 %v8488_v5 }
 0xa7e   : > { %3128 = vmatpush.msrb.mxu3 %v2852_v1  ;;  %5376 = vmatmul.msk.f32.gmra.mxu2 %vm799_vm7, %v8485_v35  ;;  %v9447_v55 = vunpack.i.h.bf16 %v8494_v14  ;;  %v6205_v25 = vunpack.i.l.bf16 %v8494_v14  ;;  %v6140_v1 = vunpack.i.l.bf16 %v8375_v21  ;;  %v9475_v42 = vunpack.i.h.bf16 %v8494_v14 }
 0xa7f   : > { %3039 = vmatpush.msrb.mxu1 %v2808_v10  ;;  %3085 = vmatpush.msra.mxu0 %v2809_v19  ;;  %v2930_v24 = vsel %vm799_vm7, %v6151_v12, %v6215_v31  ;;  %v2926_v50 = vsel %vm799_vm7, %v6081_v33, %v6216_v39 }
 0xa80   : > { %3129 = vmatpush.msrb.mxu3 %v2848_v34  ;;  %3216 = vmatpush.msrb.mxu2 %v6215_v31  ;;  %v2776_v57 = vsel %vm2769_vm10, %v6205_v25, %v9447_v55  ;;  %v6136_v34 = vunpack.i.h.bf16 %v8362_v60 }
 0xa81   : > { %5374 = vmatmul.msk.f32.gmra.mxu3 %vm799_vm7, %v8485_v35 }
 0xa82   : > { %3130 = vmatpush.msrb.mxu3 %v2814_v30  ;;  %3217 = vmatpush.msrb.mxu2 %v6216_v39  ;;  %v6135_v30 = vunpack.i.l.bf16 %v8362_v60 }
 0xa84   : > { %3131 = vmatpush.msrb.mxu3 %v2810_v29  ;;  %3218 = vmatpush.msrb.mxu2 %v6230_v58  ;;  %v8528_v49 = vpop.permute.xlu0 %6218  ;;  %v2772_v29 = vsel %vm2769_vm10, %v6125_v27, %v9449_v47  ;;  %v6239_v47 = vpop.permute.xlu2 %6238 }
 0xa85   : > { %v9450_v28 = vunpack.i.h.bf16 %v8528_v49  ;;  %v6220_v45 = vunpack.i.l.bf16 %v8528_v49  ;;  %v6224_v13 = vpop.permute.xlu1 %6223 }
 0xa86   : > { %v6226_v10 = vunpack.i.h.bf16 %v6224_v13  ;;  %v6225_v19 = vunpack.i.l.bf16 %v6224_v13  ;;  %3132 = vmatpush.msrb.mxu3 %v2776_v57  ;;  %3219 = vmatpush.msrb.mxu2 %v6231_v54  ;;  %v2770_v57 = vsel %vm2769_vm10, %v6140_v1, %v6141_v51  ;;  %v8562_v51 = vld [vmem:[#allocation2 + $0x60] sm:$0xff] }
 0xa87   : > { %v2737_v55 = vsel %vm470_vm6, %v6220_v45, %v9450_v28  ;;  %5377 = vmatmul.msk.f32.vlgmr.msra.gmra.mxu2 %vm799_vm7, %v8426_v4  ;;  %v2733_v28 = vsel %vm470_vm6, %v6135_v30, %v6136_v34 }
 0xa88   : > { %3133 = vmatpush.msrb.mxu3 %v2772_v29  ;;  %v2774_v21 = vsel %vm2769_vm10, %v6225_v19, %v6226_v10  ;;  %v2775_v13 = vsel %vm2769_vm10, %v6226_v10, %v6205_v25  ;;  %v6241_v25 = vunpack.i.h.bf16 %v6239_v47  ;;  %v6240_v10 = vunpack.i.l.bf16 %v6239_v47 }
 0xa89   : > { %3040 = vmatpush.msrb.mxu1 %v2774_v21  ;;  %3086 = vmatpush.msra.mxu0 %v2775_v13 }
 0xa8a   : > { %3134 = vmatpush.msrb.mxu3 %v2737_v55  ;;  %v2732_v47 = vsel %vm470_vm6, %v6241_v25, %v6135_v30  ;;  %v2969_v30 = vsel %vm2961_vm8, %v6146_v46, %v6200_v43 }
 0xa8b   : > { %3041 = vmatpush.msrb.mxu1 %v2770_v57  ;;  %3087 = vmatpush.msra.mxu0 %v2771_v9 }
 0xa8c   : > { %3135 = vmatpush.msrb.mxu3 %v2733_v28  ;;  %v6244_v29 = vpop.permute.xlu0 %6243 }
 0xa8d   : > { %v6246_v17 = vunpack.i.h.bf16 %v6244_v29  ;;  %v6245_v19 = vunpack.i.l.bf16 %v6244_v29  ;;  %v8556_v37 = vpop.permute.xlu1 %6248 }
 0xa8e   : > { %v6250_v55 = vunpack.i.l.bf16 %v8556_v37  ;;  %3136 = vmatpush.msrb.mxu3 %v8286_v38  ;;  %v6251_v28 = vunpack.i.h.bf16 %v8556_v37  ;;  %v2731_v38 = vsel %vm470_vm6, %v6240_v10, %v6241_v25 }
 0xa8f   : > { %v2735_v27 = vsel %vm470_vm6, %v6245_v19, %v6246_v17  ;;  %v2736_v9 = vsel %vm470_vm6, %v6246_v17, %v6220_v45  ;;  %5378 = vmatmul.msk.f32.gmra.mxu2 %vm799_vm7, %v8485_v35 }
 0xa90   : > { %3137 = vmatpush.msrb.mxu3 %v8254_v32  ;;  %3220 = vmatpush.msrb.mxu2 %v6250_v55  ;;  %v8577_v32 = vld [vmem:[#allocation2 + $0x70] sm:$0xff]  ;;  %v2853_v23 = vsel %vm770_vm2, %v6171_v18, %v6250_v55  ;;  %v2849_v15 = vsel %vm770_vm2, %v9472_v53, %v6251_v28 }
 0xa91   : > { %3042 = vmatpush.msrb.mxu1 %v2735_v27  ;;  %3088 = vmatpush.msra.mxu0 %v2736_v9 }
 0xa92   : > { %3221 = vmatpush.msrb.mxu2 %v6251_v28  ;;  %3138 = vmatmul.f32.vlgmr.msrb.gmra.mxu3 %v8562_v51 }
 0xa93   : > { %3043 = vmatpush.msrb.mxu1 %v2731_v38  ;;  %3089 = vmatpush.msra.mxu0 %v2732_v47 }
 0xa94   : > { %v6254_v17 = vpop.permute.xlu0 %6253 }
 0xa95   : > { %v6255_v45 = vunpack.i.l.bf16 %v6254_v17  ;;  %3044 = vmatpush.msrb.mxu1 %v8300_v36  ;;  %3090 = vmatpush.msra.mxu0 %v8297_v0  ;;  %v6259_v1 = vpop.permute.xlu1 %6258  ;;  %v6256_v36 = vunpack.i.h.bf16 %v6254_v17  ;;  %v6264_v0 = vpop.permute.xlu2 %6263 }
 0xa96   : > { %v6261_v43 = vunpack.i.h.bf16 %v6259_v1  ;;  %v6266_v12 = vunpack.i.h.bf16 %v6264_v0 }
 0xa97   : > { %3045 = vmatpush.msrb.mxu1 %v8249_v44  ;;  %3091 = vmatpush.msra.mxu0 %v8252_v20  ;;  %v2965_v44 = vsel %vm2961_vm8, %v6076_v41, %v6201_v7  ;;  %v6260_v20 = vunpack.i.l.bf16 %v6259_v1  ;;  %v6265_v41 = vunpack.i.l.bf16 %v6264_v0 }
 0xa98   : > { %3046 = vmatmul.f32.vlgmr.msrb.gmra.mxu1 %v8562_v51  ;;  %3092 = vmatmul.f32.vlgmr.msra.gmra.mxu0 %v8562_v51 }
 0xa99   : > { %3168 = vmatpush.msra.mxu1 %v2969_v30  ;;  %3222 = vmatpush.msrb.mxu2 %v6255_v45  ;;  %v2777_v63 = vsel %vm2769_vm10, %v9475_v42, %v6260_v20 }
 0xa9a   : > { %3141 = vmatmul.f32.gmra.mxu3 %v8577_v32 }
 0xa9b   : > { %3169 = vmatpush.msra.mxu1 %v2965_v44  ;;  %3223 = vmatpush.msrb.mxu2 %v6256_v36 }
 0xa9c   : > { %v6269_v46 = vpop.permute.xlu0 %6268 }
 0xa9d   : > { %3170 = vmatpush.msra.mxu1 %v2930_v24  ;;  %3224 = vmatpush.msrb.mxu2 %v6260_v20  ;;  %v6270_v61 = vunpack.i.l.bf16 %v6269_v46  ;;  %v6271_v7 = vunpack.i.h.bf16 %v6269_v46 }
 0xa9f   : > { %3171 = vmatpush.msra.mxu1 %v2926_v50  ;;  %3225 = vmatpush.msrb.mxu2 %v6261_v43  ;;  %v3008_v16 = vsel %vm3000_vm5, %v6235_v11, %v6270_v61  ;;  %v2888_v11 = vsel %vm2884_vm9, %v6091_v56, %v6231_v54  ;;  %v3004_v33 = vsel %vm3000_vm5, %v6236_v62, %v6271_v7 }
 0xaa0   : > { %3049 = vmatmul.f32.gmra.mxu1 %v8577_v32  ;;  %3095 = vmatmul.f32.gmra.mxu0 %v8577_v32  ;;  %v2815_v62 = vsel %vm664_vm1, %v9473_v3, %v6255_v45 }
 0xaa1   : > { %3172 = vmatpush.msra.mxu1 %v2892_v52  ;;  %3226 = vmatpush.msrb.mxu2 %v6265_v41 }
 0xaa2   : > { %3251 = vmatpush.msra.mxu3 %v6270_v61  ;;  %3205 = vmatpush.msrb.mxu0 %v3008_v16 }
 0xaa3   : > { %3173 = vmatpush.msra.mxu1 %v2888_v11  ;;  %3227 = vmatpush.msrb.mxu2 %v6266_v12 }
 0xaa4   : > { %3252 = vmatpush.msra.mxu3 %v6271_v7  ;;  %3206 = vmatpush.msrb.mxu0 %v3004_v33 }
 0xaa5   : > { %3174 = vmatpush.msra.mxu1 %v2853_v23  ;;  %3228 = vmatpush.msrb.mxu2 %v8319_v40  ;;  %v9474_v40 = vunpack.i.h.bf16 %v8346_v59 }
 0xaa6   : > { %5381 = vmatmul.msk.f32.vlgmr.msra.gmra.mxu3 %vm799_vm7, %v8426_v4 }
 0xaa7   : > { %3175 = vmatpush.msra.mxu1 %v2849_v15  ;;  %3229 = vmatpush.msrb.mxu2 %v8240_v22  ;;  %v2811_v48 = vsel %vm664_vm1, %v9474_v40, %v6256_v36  ;;  %v9476_v22 = vunpack.i.h.bf16 %v8368_v2  ;;  %v2734_v2 = vsel %vm470_vm6, %v6136_v34, %v6266_v12 }
 0xaa8   : > { %3230 = vmatmul.f32.vlgmr.msrb.gmra.mxu2 %v8562_v51  ;;  %5379 = vmatmul.msk.f32.vlgmr.msrb.gmra.mxu0 %vm799_vm7, %v8426_v4  ;;  %v9477_v4 = vunpack.i.h.bf16 %v8528_v49 }
 0xaa9   : > { %3176 = vmatpush.msra.mxu1 %v2815_v62  ;;  %v2773_v6 = vsel %vm2769_vm10, %v9476_v22, %v6261_v43 }
 0xaaa   : > { %v2738_v59 = vsel %vm470_vm6, %v9477_v4, %v6265_v41 }
 0xaab   : > { %3177 = vmatpush.msra.mxu1 %v2811_v48 }
 0xaad   : > { %3178 = vmatpush.msra.mxu1 %v2777_v63 }
 0xaae   : > { %5382 = vmatmul.msk.f32.gmra.mxu3 %vm799_vm7, %v8485_v35 }
 0xaaf   : > { %3179 = vmatpush.msra.mxu1 %v2773_v6 }
 0xab0   : > { %3233 = vmatmul.f32.gmra.mxu2 %v8577_v32  ;;  %5380 = vmatmul.msk.f32.gmra.mxu0 %vm799_vm7, %v8485_v35 }
 0xab1   : > { %3180 = vmatpush.msra.mxu1 %v2738_v59 }
 0xab3   : > { %3181 = vmatpush.msra.mxu1 %v2734_v2 }
 0xab5   : > { %3182 = vmatpush.msra.mxu1 %v8283_v26  ;;  %v5383_v26 = vld [vmem:[%s9425_s4 + $0x12] sm:$0x3f] }
 0xab6   : > { %v3263_v49 = vperm.slane %v5383_v26, 0  ;;  %v3264_v21 = vperm.slane %v5383_v26, 1  ;;  %v3265_v55 = vperm.slane %v5383_v26, 2  ;;  %v3267_v38 = vperm.slane %v5383_v26, 4 }
 0xab7   : > { %3183 = vmatpush.msra.mxu1 %v8246_v8  ;;  %v3266_v45 = vperm.slane %v5383_v26, 3 }
 0xab8   : > { %3184 = vmatmul.f32.vlgmr.msra.gmra.mxu1 %v8562_v51 }
 0xac0   : > { %3187 = vmatmul.f32.gmra.mxu1 %v8577_v32 }
 0xaf8   : > { %v3070_v56 = vpop.f32.mrf.mxu3  ;;  %v3116_v18 = vpop.f32.mrf.mxu2 }
 0xb01   : > { %v3119_v5 = vpop.f32.mrf.mxu2 }
 0xb04   : > { %v3073_v37 = vpop.f32.mrf.mxu3 }
 0xb0a   : > { %v3162_v35 = vpop.f32.mrf.mxu2 }
 0xb12   : > { %v3165_v58 = vpop.f32.mrf.mxu2 }
 0xb15   : > { %v3139_v31 = vpop.f32.mrf.mxu3  ;;  %v3093_v14 = vpop.f32.mrf.mxu0 }
 0xb16   : > { %v3047_v39 = vpop.f32.mrf.mxu1  ;;  %v8667_v34 = vadd.f32 %v3116_v18, %v3093_v14  ;;  %v8671_v10 = vadd.f32 %v3162_v35, %v3139_v31 }
 0xb17   : > { %v8665_v8 = vadd.f32 %v3070_v56, %v3047_v39 }
 0xb18   : > { %v3274_v25 = vmul.f32 %v3264_v21, %v8667_v34  ;;  %v3275_v17 = vmul.f32 %v3265_v55, %v8671_v10 }
 0xb19   : > { %v3273_v19 = vmul.f32 %v3263_v49, %v8665_v8 }
 0xb1a   : > { %v3299_v3 = vmul.f32 %v3274_v25, %v8667_v34  ;;  %v3300_v22 = vmul.f32 %v3275_v17, %v8671_v10 }
 0xb1b   : > { %v3283_v47 = vadd.f32 %v3274_v25, %v3273_v19  ;;  %v3298_v23 = vmul.f32 %v3273_v19, %v8665_v8  ;;  %v3324_v19 = vld [vmem:[#allocation6 + $0x38] sm:$0xff] }
 0xb1d   : > { %v3142_v60 = vpop.f32.mrf.mxu3  ;;  %v3096_v54 = vpop.f32.mrf.mxu0  ;;  %v3284_v46 = vadd.f32 %v3283_v47, %v3275_v17  ;;  %v3308_v59 = vadd.f32 %v3299_v3, %v3298_v23 }
 0xb1e   : > { %v3050_v29 = vpop.f32.mrf.mxu1  ;;  %v8675_v51 = vadd.f32 %v3119_v5, %v3096_v54  ;;  %v8680_v32 = vadd.f32 %v3165_v58, %v3142_v60 }
 0xb1f   : > { %v8673_v9 = vadd.f32 %v3073_v37, %v3050_v29  ;;  %v3309_v14 = vadd.f32 %v3308_v59, %v3300_v22 }
 0xb20   : > { %v3279_v36 = vmul.f32 %v3264_v21, %v8675_v51  ;;  %v3280_v16 = vmul.f32 %v3265_v55, %v8680_v32  ;;  %v3323_v21 = vld [vmem:[#allocation6 + $0x30] sm:$0xff] }
 0xb21   : > { %v3278_v30 = vmul.f32 %v3263_v49, %v8673_v9 }
 0xb22   : > { %v3304_v7 = vmul.f32 %v3279_v36, %v8675_v51  ;;  %v3305_v40 = vmul.f32 %v3280_v16, %v8680_v32 }
 0xb23   : > { %v3303_v41 = vmul.f32 %v3278_v30, %v8673_v9  ;;  %v3291_v11 = vadd.f32 %v3279_v36, %v3278_v30 }
 0xb25   : > { %v3208_v27 = vpop.f32.mrf.mxu0  ;;  %v3315_v62 = vadd.f32 %v3304_v7, %v3303_v41  ;;  %v3292_v42 = vadd.f32 %v3291_v11, %v3280_v16 }
 0xb27   : > { %v3316_v2 = vadd.f32 %v3315_v62, %v3305_v40  ;;  %v3411_v40 = vld [vmem:[#allocation4 + $0x70] sm:$0xff] }
 0xb29   : > { %v3254_v57 = vpop.f32.mrf.mxu3 }
 0xb2b   : > { %v3231_v13 = vpop.f32.mrf.mxu2 }
 0xb2c   : > { %v8677_v28 = vadd.f32 %v3254_v57, %v3231_v13 }
 0xb2d   : > { %v3211_v12 = vpop.f32.mrf.mxu0 }
 0xb2e   : > { %v3277_v24 = vmul.f32 %v3267_v38, %v8677_v28 }
 0xb30   : > { %v3287_v50 = vsel %vm3286_vm11, %v3277_v24, 0.0  ;;  %v3302_v60 = vmul.f32 %v3277_v24, %v8677_v28 }
 0xb31   : > { %v3257_v0 = vpop.f32.mrf.mxu3 }
 0xb32   : > { %v3311_v26 = vsel %vm3286_vm11, %v3302_v60, 0.0 }
 0xb33   : > { %v3234_v20 = vpop.f32.mrf.mxu2 }
 0xb34   : > { %v8688_v61 = vadd.f32 %v3257_v0, %v3234_v20 }
 0xb35   : > { %v3185_v1 = vpop.f32.mrf.mxu1 }
 0xb36   : > { %v8684_v44 = vadd.f32 %v3208_v27, %v3185_v1  ;;  %v3282_v53 = vmul.f32 %v3267_v38, %v8688_v61 }
 0xb38   : > { %v3276_v43 = vmul.f32 %v3266_v45, %v8684_v44  ;;  %v3307_v6 = vmul.f32 %v3282_v53, %v8688_v61  ;;  %v3294_v4 = vsel %vm3286_vm11, %v3282_v53, 0.0 }
 0xb3a   : > { %v3285_v52 = vadd.f32 %v3284_v46, %v3276_v43  ;;  %v3301_v37 = vmul.f32 %v3276_v43, %v8684_v44  ;;  %v3318_v35 = vsel %vm3286_vm11, %v3307_v6, 0.0 }
 0xb3c   : > { %v3288_v33 = vadd.f32 %v3287_v50, %v3285_v52  ;;  %v3310_v58 = vadd.f32 %v3309_v14, %v3301_v37 }
 0xb3d   : > { %v3188_v15 = vpop.f32.mrf.mxu1 }
 0xb3e   : > { %v8698_v48 = vadd.f32 %v3211_v12, %v3188_v15  ;;  %3289 = vadd.xlane.f32.xlu2 %v3288_v33  ;;  %v3312_v54 = vadd.f32 %v3311_v26, %v3310_v58  ;;  %v3406_v12 = vld [vmem:[#allocation4 + $0x60] sm:$0xff] }
 0xb40   : > { %v3281_v63 = vmul.f32 %v3266_v45, %v8698_v48 }
 0xb42   : > { %v3306_v56 = vmul.f32 %v3281_v63, %v8698_v48  ;;  %v3293_v18 = vadd.f32 %v3292_v42, %v3281_v63  ;;  %v3407_v42 = vld [vmem:[#allocation4 + $0x68] sm:$0xff] }
 0xb44   : > { %v3295_v5 = vadd.f32 %v3294_v4, %v3293_v18  ;;  %v3317_v31 = vadd.f32 %v3316_v2, %v3306_v56  ;;  %v3412_v4 = vld [vmem:[#allocation4 + $0x78] sm:$0xff] }
 0xb46   : > { %3296 = vadd.xlane.f32.xlu1 %v3295_v5  ;;  %v3319_v39 = vadd.f32 %v3318_v35, %v3317_v31 }
 0xb48   : > { %3320 = vadd.xlane.f32.xlu0 %v3319_v39 }
 0xb4e   : > { %3313 = vadd.xlane.f32.xlu1 %v3312_v54 }
 0xbb1   : > { %v3290_v13 = vpop.xlane.xlu2 %3289 }
 0xbb9   : > { %v3297_v49 = vpop.xlane.xlu1 %3296 }
 0xbba   : > { %3345 = vmatpush.msra.mxu0 %v3297_v49 }
 0xbbb   : > { %v3321_v57 = vpop.xlane.xlu0 %3320 }
 0xbbc   : > { %3346 = vmatpush.msra.mxu0 %v3290_v13  ;;  %3368 = vmatpush.msrb.mxu1 %v3321_v57 }
 0xbbd   : > { %5384 = vmatmul.msk.f32.vlgmr.msra.gmra.mxu0 %vm799_vm7, %v3323_v21 }
 0xbc1   : > { %v3314_v29 = vpop.xlane.xlu1 %3313 }
 0xbc2   : > { %3369 = vmatpush.msrb.mxu1 %v3314_v29 }
 0xbc3   : > { %5386 = vmatmul.msk.f32.vlgmr.msrb.gmra.mxu1 %vm799_vm7, %v3323_v21 }
 0xbc5   : > { %5385 = vmatmul.msk.f32.gmra.mxu0 %vm799_vm7, %v3324_v19 }
 0xbcb   : > { %5387 = vmatmul.msk.f32.gmra.mxu1 %vm799_vm7, %v3324_v19 }
 0xc3a   : > { %v3348_v25 = vpop.f32.mrf.mxu0 }
 0xc3b   : > { %v3377_v55 = vmul.f32 %v3348_v25, %v3348_v25 }
 0xc40   : > { %v3371_v27 = vpop.f32.mrf.mxu1 }
 0xc41   : > { %v3379_v38 = vsub.f32 %v3371_v27, %v3377_v55 }
 0xc42   : > { %v3351_v47 = vpop.f32.mrf.mxu0 }
 0xc43   : > { %v3381_v17 = vmax.f32 %v3379_v38, 0.0  ;;  %v3378_v1 = vmul.f32 %v3351_v47, %v3351_v47 }
 0xc45   : > { %v3383_v45 = vadd.f32 1e-05, %v3381_v17 }
 0xc47   : > { %6559 = vrsqrt.f32 %v3383_v45  ;;  %vm3391_vm13 = vweird.f32 %v3383_v45 }
 0xc48   : > { %v3374_v30 = vpop.f32.mrf.mxu1 }
 0xc49   : > { %v3380_v36 = vsub.f32 %v3374_v30, %v3378_v1 }
 0xc4b   : > { %v3382_v20 = vmax.f32 %v3380_v36, 0.0 }
 0xc4d   : > { %v6560_v0 = vpop.eup %6559  ;;  %v3384_v24 = vadd.f32 1e-05, %v3382_v20 }
 0xc4e   : > { %v3386_v46 = vmul.f32 %v6560_v0, %v3383_v45  ;;  %vm3392_vm12 = vweird.f32 %v6560_v0 }
 0xc4f   : > { %6561 = vrsqrt.f32 %v3384_v24  ;;  %vm3393_vm14 = vmor %vm3391_vm13, %vm3392_vm12  ;;  %vm3401_vm15 = vweird.f32 %v3384_v24 }
 0xc50   : > { %v3387_v43 = vmul.f32 %v6560_v0, %v3386_v46 }
 0xc52   : > { %v3388_v50 = vmul.f32 0.5, %v3387_v43 }
 0xc54   : > { %v3389_v41 = vsub.f32 1.5, %v3388_v50 }
 0xc55   : > { %v6562_v7 = vpop.eup %6561 }
 0xc56   : > { %v3390_v16 = vmul.f32 %v6560_v0, %v3389_v41  ;;  %v3396_v52 = vmul.f32 %v6562_v7, %v3384_v24  ;;  %vm3402_vm0 = vweird.f32 %v6562_v7 }
 0xc57   : > { %vm3403_vm3 = vmor %vm3401_vm15, %vm3402_vm0 }
 0xc58   : > { %v3397_v11 = vmul.f32 %v6562_v7, %v3396_v52  ;;  %v3394_v33 = vsel %vm3393_vm14, %v6560_v0, %v3390_v16 }
 0xc59   : > { %v3408_v23 = vmul.f32 %v3406_v12, %v3394_v33 }
 0xc5a   : > { %v3398_v53 = vmul.f32 0.5, %v3397_v11 }
 0xc5b   : > { %3419 = vperm.xlu0 %5770, %v3408_v23   ;;  %v3413_v3 = vmul.f32 %v3408_v23, %v3348_v25 }
 0xc5c   : > { %v3399_v15 = vsub.f32 1.5, %v3398_v53 }
 0xc5d   : > { %v3415_v22 = vsub.f32 %v3411_v40, %v3413_v3 }
 0xc5e   : > { %v3400_v62 = vmul.f32 %v6562_v7, %v3399_v15 }
 0xc60   : > { %v3404_v63 = vsel %vm3403_vm3, %v6562_v7, %v3400_v62 }
 0xc61   : > { %v3409_v6 = vmul.f32 %v3407_v42, %v3404_v63 }
 0xc63   : > { %3439 = vperm.xlu0 %5770, %v3415_v22   ;;  %3424 = vperm.xlu2 %5771, %v3409_v6   ;;  %v3414_v59 = vmul.f32 %v3409_v6, %v3351_v47 }
 0xc65   : > { %v3416_v2 = vsub.f32 %v3412_v4, %v3414_v59 }
 0xc67   : > { %3444 = vperm.xlu1 %5769, %v3416_v2  }
 0xccd   : > { %v3420_v56 = vpop.permute.xlu0 %3419 }
 0xcce   : > { %v3428_v18 = vmul.f32 %v3420_v56, %v8667_v34  ;;  %v3429_v37 = vmul.f32 %v3420_v56, %v8671_v10  ;;  %v3430_v5 = vmul.f32 %v3420_v56, %v8684_v44  ;;  %v3431_v31 = vmul.f32 %v3420_v56, %v8677_v28  ;;  %v3425_v44 = vpop.permute.xlu2 %3424 }
 0xccf   : > { %v3432_v13 = vmul.f32 %v3425_v44, %v8673_v9  ;;  %v3433_v57 = vmul.f32 %v3425_v44, %v8675_v51  ;;  %v3434_v29 = vmul.f32 %v3425_v44, %v8680_v32  ;;  %v3427_v19 = vmul.f32 %v3420_v56, %v8665_v8 }
 0xcd0   : > { %v3435_v45 = vmul.f32 %v3425_v44, %v8698_v48  ;;  %v3436_v1 = vmul.f32 %v3425_v44, %v8688_v61 }
 0xcd5   : > { %v3440_v35 = vpop.permute.xlu0 %3439 }
 0xcd6   : > { %v8717_v14 = vadd.f32 %v3440_v35, %v3428_v18  ;;  %v8719_v39 = vadd.f32 %v3440_v35, %v3429_v37  ;;  %v3450_v60 = vadd.f32 %v3440_v35, %v3430_v5  ;;  %v3451_v58 = vadd.f32 %v3440_v35, %v3431_v31 }
 0xcd7   : > { %v8743_v38 = vadd.f32 %v3440_v35, %v3427_v19 }
 0xcd8   : > { %v3458_v26 = vmax.f32 %v8717_v14, 0.0  ;;  %v3459_v54 = vmax.f32 %v8719_v39, 0.0  ;;  %v8723_v49 = vmax.f32 %v3450_v60, 0.0  ;;  %v3461_v34 = vmax.f32 %v3451_v58, 0.0 }
 0xcd9   : > { %v3445_v21 = vpop.permute.xlu1 %3444  ;;  %v3457_v32 = vmax.f32 %v8743_v38, 0.0 }
 0xcda   : > { %v6297_v10 = vpack.i.bf16 %v3461_v34, %v8723_v49  ;;  %v6292_v28 = vpack.i.bf16 %v3459_v54, %v3458_v26  ;;  %v8737_v25 = vadd.f32 %v3445_v21, %v3432_v13  ;;  %v8739_v55 = vadd.f32 %v3445_v21, %v3433_v57 }
 0xcdb   : > { %v8741_v27 = vadd.f32 %v3445_v21, %v3434_v29  ;;  %v3455_v30 = vadd.f32 %v3445_v21, %v3435_v45  ;;  %v3456_v36 = vadd.f32 %v3445_v21, %v3436_v1 }
 0xcdc   : > { %6298 = vrot.lane.b32.xlu0 %v6297_v10, %s6737_s12  ;;  %6293 = vrot.lane.b32.xlu2 %v6292_v28, %s6727_s17  ;;  %v3462_v9 = vmax.f32 %v8737_v25, 0.0  ;;  %v3463_v51 = vmax.f32 %v8739_v55, 0.0 }
 0xcdd   : > { %6273 = vrot.lane.b32.xlu1 %v6292_v28, %s6737_s12  ;;  %v3464_v8 = vmax.f32 %v8741_v27, 0.0  ;;  %v8771_v20 = vmax.f32 %v3455_v30, 0.0  ;;  %v3466_v0 = vmax.f32 %v3456_v36, 0.0  ;;  %v5396_v27 = vld [vmem:[%s9425_s4 + $0x18] sm:$0x3f] }
 0xcde   : > { %v6317_v17 = vpack.i.bf16 %v3463_v51, %v3462_v9 }
 0xcdf   : > { %v6322_v47 = vpack.i.bf16 %v3457_v32, %v3464_v8  ;;  %v6367_v24 = vpack.i.bf16 %v3466_v0, %v8771_v20  ;;  %v6397_v61 = vpack.i.bf16 %v8723_v49, %v8771_v20 }
 0xce4   : > { %6313 = vrot.lane.b32.xlu0 %v6292_v28, %s6733_s23  ;;  %6308 = vrot.lane.b32.xlu2 %v6297_v10, %s6736_s30 }
 0xce5   : > { %6278 = vrot.lane.b32.xlu1 %v6292_v28, %s6736_s30 }
 0xcec   : > { %6323 = vrot.lane.b32.xlu0 %v6322_v47, %s6737_s12  ;;  %6318 = vrot.lane.b32.xlu2 %v6317_v17, %s6737_s12 }
 0xced   : > { %6283 = vrot.lane.b32.xlu1 %v6292_v28, %s6739_s14 }
 0xcf4   : > { %6333 = vrot.lane.b32.xlu0 %v6322_v47, %s6736_s30  ;;  %6328 = vrot.lane.b32.xlu2 %v6317_v17, %s6736_s30 }
 0xcf5   : > { %6288 = vrot.lane.b32.xlu1 %v6292_v28, %s6730_s20 }
 0xcfc   : > { %6343 = vrot.lane.b32.xlu0 %v6322_v47, %s6739_s14  ;;  %6338 = vrot.lane.b32.xlu2 %v6317_v17, %s6739_s14 }
 0xcfd   : > { %6303 = vrot.lane.b32.xlu1 %v6292_v28, %s6740_s15 }
 0xd04   : > { %6353 = vrot.lane.b32.xlu0 %v6322_v47, %s6730_s20  ;;  %6348 = vrot.lane.b32.xlu2 %v6317_v17, %s6730_s20 }
 0xd05   : > { %6368 = vrot.lane.b32.xlu1 %v6367_v24, %s6737_s12 }
 0xd0c   : > { %6363 = vrot.lane.b32.xlu0 %v6322_v47, %s6727_s17  ;;  %6358 = vrot.lane.b32.xlu2 %v6317_v17, %s6727_s17 }
 0xd0d   : > { %6373 = vrot.lane.b32.xlu1 %v6317_v17, %s6740_s15 }
 0xd14   : > { %6383 = vrot.lane.b32.xlu0 %v6367_v24, %s6736_s30  ;;  %6378 = vrot.lane.b32.xlu2 %v6322_v47, %s6740_s15 }
 0xd15   : > { %6393 = vrot.lane.b32.xlu1 %v6322_v47, %s6733_s23 }
 0xd1c   : > { %6388 = vrot.lane.b32.xlu0 %v6317_v17, %s6733_s23  ;;  %6398 = vrot.lane.b32.xlu2 %v6397_v61, %s6739_s14 }
 0xd1d   : > { %6403 = vrot.lane.b32.xlu1 %v6397_v61, %s6730_s20 }
 0xd24   : > { %6418 = vrot.lane.b32.xlu0 %v6317_v17, %s6738_s10  ;;  %6408 = vrot.lane.b32.xlu2 %v6397_v61, %s6727_s17 }
 0xd25   : > { %6423 = vrot.lane.b32.xlu1 %v6322_v47, %s6738_s10 }
 0xd2c   : > { %6428 = vrot.lane.b32.xlu0 %v6397_v61, %s6740_s15  ;;  %6413 = vrot.lane.b32.xlu2 %v6292_v28, %s6738_s10 }
 0xd2d   : > { %6433 = vrot.lane.b32.xlu1 %v6397_v61, %s6733_s23 }
 0xd34   : > { %6443 = vrot.lane.b32.xlu0 %v6297_v10, %s6738_s10  ;;  %6438 = vrot.lane.b32.xlu2 %v6367_v24, %s6738_s10 }
 0xd36   : > { %v8796_v48 = vpop.permute.xlu2 %6293 }
 0xd3e   : > { %v8798_v46 = vpop.permute.xlu2 %6308 }
 0xd3f   : > { %v6311_v14 = vunpack.i.h.bf16 %v8798_v46 }
 0xd46   : > { %v6319_v43 = vpop.permute.xlu2 %6318 }
 0xd47   : > { %v6321_v50 = vunpack.i.h.bf16 %v6319_v43  ;;  %v6320_v41 = vunpack.i.l.bf16 %v6319_v43 }
 0xd49   : > { %v3687_v7 = vsel %vm2961_vm8, %v6320_v41, %v6321_v50 }
 0xd4a   : > { %3746 = vmatpush.msrb.mxu3 %v3687_v7 }
 0xd4e   : > { %v8801_v16 = vpop.permute.xlu0 %6298  ;;  %v6329_v52 = vpop.permute.xlu2 %6328 }
 0xd4f   : > { %v8803_v12 = vpop.permute.xlu1 %6273  ;;  %v6331_v53 = vunpack.i.h.bf16 %v6329_v52  ;;  %v6330_v15 = vunpack.i.l.bf16 %v6329_v52 }
 0xd50   : > { %v6276_v40 = vunpack.i.h.bf16 %v8803_v12  ;;  %v6275_v42 = vunpack.i.l.bf16 %v8803_v12 }
 0xd51   : > { %v3651_v2 = vsel %vm799_vm7, %v6330_v15, %v6331_v53 }
 0xd52   : > { %v3684_v56 = vsel %vm2961_vm8, %v6275_v42, %v6276_v40 }
 0xd56   : > { %v8805_v11 = vpop.permute.xlu0 %6313  ;;  %v6339_v33 = vpop.permute.xlu2 %6338 }
 0xd57   : > { %v8807_v23 = vpop.permute.xlu1 %6278  ;;  %v6341_v18 = vunpack.i.h.bf16 %v6339_v33  ;;  %v6340_v37 = vunpack.i.l.bf16 %v6339_v33 }
 0xd58   : > { %v6281_v35 = vunpack.i.h.bf16 %v8807_v23  ;;  %v6280_v60 = vunpack.i.l.bf16 %v8807_v23 }
 0xd59   : > { %v3614_v21 = vsel %vm2884_vm9, %v6340_v37, %v6341_v18  ;;  %v6296_v37 = vunpack.i.h.bf16 %v8796_v48 }
 0xd5a   : > { %v3648_v13 = vsel %vm799_vm7, %v6280_v60, %v6281_v35 }
 0xd5e   : > { %v8809_v3 = vpop.permute.xlu0 %6323  ;;  %v6349_v62 = vpop.permute.xlu2 %6348 }
 0xd5f   : > { %v6326_v63 = vunpack.i.h.bf16 %v8809_v3  ;;  %v6325_v22 = vunpack.i.l.bf16 %v8809_v3  ;;  %v8815_v6 = vpop.permute.xlu1 %6283  ;;  %v6351_v57 = vunpack.i.h.bf16 %v6349_v62  ;;  %v6350_v29 = vunpack.i.l.bf16 %v6349_v62 }
 0xd60   : > { %v6286_v17 = vunpack.i.h.bf16 %v8815_v6  ;;  %v6285_v45 = vunpack.i.l.bf16 %v8815_v6 }
 0xd61   : > { %v3683_v4 = vsel %vm2961_vm8, %v6326_v63, %v6275_v42  ;;  %v3688_v59 = vsel %vm2961_vm8, %v6321_v50, %v6325_v22  ;;  %v3584_v61 = vsel %vm770_vm2, %v6350_v29, %v6351_v57 }
 0xd62   : > { %3747 = vmatpush.msrb.mxu3 %v3683_v4  ;;  %3792 = vmatpush.msra.mxu2 %v3688_v59  ;;  %v3612_v43 = vsel %vm2884_vm9, %v6285_v45, %v6286_v17 }
 0xd64   : > { %3748 = vmatpush.msrb.mxu3 %v3651_v2  ;;  %3793 = vmatpush.msra.mxu2 %v3684_v56 }
 0xd66   : > { %v8825_v5 = vpop.permute.xlu0 %6333  ;;  %v6359_v31 = vpop.permute.xlu2 %6358 }
 0xd67   : > { %v6336_v58 = vunpack.i.h.bf16 %v8825_v5  ;;  %v6335_v34 = vunpack.i.l.bf16 %v8825_v5  ;;  %v8831_v10 = vpop.permute.xlu1 %6288  ;;  %v6361_v50 = vunpack.i.h.bf16 %v6359_v31  ;;  %v6360_v41 = vunpack.i.l.bf16 %v6359_v31 }
 0xd68   : > { %v6291_v33 = vunpack.i.h.bf16 %v8831_v10  ;;  %v6295_v31 = vunpack.i.l.bf16 %v8796_v48 }
 0xd69   : > { %v3647_v28 = vsel %vm799_vm7, %v6336_v58, %v6280_v60  ;;  %v3652_v44 = vsel %vm799_vm7, %v6331_v53, %v6335_v34  ;;  %v6290_v53 = vunpack.i.l.bf16 %v8831_v10  ;;  %v3554_v59 = vsel %vm664_vm1, %v6360_v41, %v6361_v50 }
 0xd6a   : > { %3749 = vmatpush.msrb.mxu3 %v3647_v28  ;;  %3794 = vmatpush.msra.mxu2 %v3652_v44 }
 0xd6b   : > { %v3582_v2 = vsel %vm770_vm2, %v6290_v53, %v6291_v33 }
 0xd6c   : > { %3750 = vmatpush.msrb.mxu3 %v3614_v21  ;;  %3795 = vmatpush.msra.mxu2 %v3648_v13 }
 0xd6e   : > { %v8841_v19 = vpop.permute.xlu0 %6343  ;;  %v8843_v47 = vpop.permute.xlu2 %6378 }
 0xd6f   : > { %v6346_v1 = vunpack.i.h.bf16 %v8841_v19  ;;  %v6345_v30 = vunpack.i.l.bf16 %v8841_v19  ;;  %v8849_v36 = vpop.permute.xlu1 %6303  ;;  %v6381_v13 = vunpack.i.h.bf16 %v8843_v47 }
 0xd71   : > { %v3611_v0 = vsel %vm2884_vm9, %v6346_v1, %v6285_v45  ;;  %v3615_v24 = vsel %vm2884_vm9, %v6341_v18, %v6345_v30  ;;  %v6380_v1 = vunpack.i.l.bf16 %v8843_v47 }
 0xd72   : > { %3751 = vmatpush.msrb.mxu3 %v3611_v0  ;;  %3796 = vmatpush.msra.mxu2 %v3615_v24  ;;  %v6306_v0 = vunpack.i.h.bf16 %v8849_v36 }
 0xd74   : > { %3752 = vmatpush.msrb.mxu3 %v3584_v61  ;;  %3797 = vmatpush.msra.mxu2 %v3612_v43  ;;  %v3552_v61 = vsel %vm664_vm1, %v6295_v31, %v6296_v37 }
 0xd76   : > { %v8859_v7 = vpop.permute.xlu0 %6353  ;;  %v8861_v52 = vpop.permute.xlu2 %6398 }
 0xd77   : > { %v6356_v15 = vunpack.i.h.bf16 %v8859_v7  ;;  %v6355_v62 = vunpack.i.l.bf16 %v8859_v7  ;;  %v8867_v42 = vpop.permute.xlu1 %6368  ;;  %v6401_v12 = vunpack.i.h.bf16 %v8861_v52 }
 0xd79   : > { %v3581_v63 = vsel %vm770_vm2, %v6356_v15, %v6290_v53  ;;  %v3585_v4 = vsel %vm770_vm2, %v6351_v57, %v6355_v62  ;;  %v6305_v57 = vunpack.i.l.bf16 %v8849_v36 }
 0xd7a   : > { %3753 = vmatpush.msrb.mxu3 %v3581_v63  ;;  %3798 = vmatpush.msra.mxu2 %v3585_v4  ;;  %v6316_v4 = vunpack.i.h.bf16 %v8805_v11 }
 0xd7b   : > { %v3521_v43 = vsel %vm2769_vm10, %v6381_v13, %v6305_v57  ;;  %v3522_v63 = vsel %vm2769_vm10, %v6305_v57, %v6306_v0 }
 0xd7c   : > { %3754 = vmatpush.msrb.mxu3 %v3554_v59  ;;  %3799 = vmatpush.msra.mxu2 %v3582_v2  ;;  %v6315_v59 = vunpack.i.l.bf16 %v8805_v11 }
 0xd7e   : > { %v8877_v56 = vpop.permute.xlu0 %6363  ;;  %v8879_v18 = vpop.permute.xlu2 %6408 }
 0xd7f   : > { %v6366_v60 = vunpack.i.h.bf16 %v8877_v56  ;;  %v6365_v58 = vunpack.i.l.bf16 %v8877_v56  ;;  %v6374_v28 = vpop.permute.xlu1 %6373  ;;  %v6410_v19 = vunpack.i.l.bf16 %v8879_v18 }
 0xd80   : > { %v6376_v44 = vunpack.i.h.bf16 %v6374_v28  ;;  %v6375_v21 = vunpack.i.l.bf16 %v6374_v28 }
 0xd81   : > { %v3551_v29 = vsel %vm664_vm1, %v6366_v60, %v6295_v31  ;;  %v3555_v45 = vsel %vm664_vm1, %v6361_v50, %v6365_v58 }
 0xd82   : > { %3755 = vmatpush.msrb.mxu3 %v3551_v29  ;;  %3800 = vmatpush.msra.mxu2 %v3555_v45  ;;  %v3524_v24 = vsel %vm2769_vm10, %v6375_v21, %v6376_v44  ;;  %v3525_v50 = vsel %vm2769_vm10, %v6376_v44, %v6380_v1  ;;  %v6371_v45 = vunpack.i.h.bf16 %v8867_v42 }
 0xd84   : > { %3756 = vmatpush.msrb.mxu3 %v3524_v24  ;;  %3801 = vmatpush.msra.mxu2 %v3552_v61  ;;  %v6370_v24 = vunpack.i.l.bf16 %v8867_v42 }
 0xd86   : > { %v8901_v41 = vpop.permute.xlu0 %6383  ;;  %3757 = vmatpush.msrb.mxu3 %v3521_v43  ;;  %3802 = vmatpush.msra.mxu2 %v3525_v50  ;;  %v8903_v53 = vpop.permute.xlu2 %6413  ;;  %v3492_v43 = vsel %vm470_vm6, %v6315_v59, %v6316_v4 }
 0xd87   : > { %v8905_v15 = vpop.permute.xlu1 %6393  ;;  %v6416_v42 = vunpack.i.h.bf16 %v8903_v53  ;;  %v6386_v55 = vunpack.i.h.bf16 %v8901_v41 }
 0xd88   : > { %3803 = vmatpush.msra.mxu2 %v3522_v63  ;;  %v6396_v31 = vunpack.i.h.bf16 %v8905_v15  ;;  %v6395_v60 = vunpack.i.l.bf16 %v8905_v15  ;;  %v3933_v15 = vperm.slane %v5396_v27, 0 }
 0xd8a   : > { %v3491_v61 = vsel %vm470_vm6, %v6396_v31, %v6315_v59 }
 0xd8e   : > { %v6389_v2 = vpop.permute.xlu0 %6388  ;;  %v6439_v13 = vpop.permute.xlu2 %6438 }
 0xd8f   : > { %v6391_v28 = vunpack.i.h.bf16 %v6389_v2  ;;  %v6390_v44 = vunpack.i.l.bf16 %v6389_v2  ;;  %v8914_v21 = vpop.permute.xlu1 %6403  ;;  %v6441_v50 = vunpack.i.h.bf16 %v6439_v13  ;;  %v6440_v63 = vunpack.i.l.bf16 %v6439_v13 }
 0xd90   : > { %v6301_v2 = vunpack.i.h.bf16 %v8801_v16  ;;  %v3690_v13 = vsel %vm2961_vm8, %v6370_v24, %v6371_v45 }
 0xd91   : > { %v3494_v29 = vsel %vm470_vm6, %v6390_v44, %v6391_v28  ;;  %v3495_v57 = vsel %vm470_vm6, %v6391_v28, %v6395_v60  ;;  %v6300_v28 = vunpack.i.l.bf16 %v8801_v16  ;;  %v3726_v25 = vsel %vm3000_vm5, %v6440_v63, %v6441_v50  ;;  %v3737_v50 = vld [vmem:[#allocation2 + $0x88] sm:$0xff] }
 0xd92   : > { %3758 = vmatpush.msrb.mxu3 %v3494_v29  ;;  %3804 = vmatpush.msra.mxu2 %v3495_v57  ;;  %v8934_v57 = vld [vmem:[#allocation2 + $0x80] sm:$0xff] }
 0xd94   : > { %3759 = vmatpush.msrb.mxu3 %v3491_v61  ;;  %3805 = vmatpush.msra.mxu2 %v3492_v43  ;;  %v6415_v61 = vunpack.i.l.bf16 %v8903_v53 }
 0xd96   : > { %v6419_v44 = vpop.permute.xlu0 %6418  ;;  %3760 = vmatpush.msrb.mxu3 %v3462_v9  ;;  %3806 = vmatpush.msra.mxu2 %v3463_v51  ;;  %v6385_v9 = vunpack.i.l.bf16 %v8901_v41  ;;  %v3689_v41 = vsel %vm2961_vm8, %v6325_v22, %v6370_v24  ;;  %v6400_v22 = vunpack.i.l.bf16 %v8861_v52  ;;  %v6406_v52 = vunpack.i.h.bf16 %v8914_v21 }
 0xd97   : > { %v6421_v31 = vunpack.i.h.bf16 %v6419_v44  ;;  %v6420_v29 = vunpack.i.l.bf16 %v6419_v44  ;;  %v6424_v59 = vpop.permute.xlu1 %6423  ;;  %v3686_v44 = vsel %vm2961_vm8, %v6300_v28, %v6301_v2 }
 0xd98   : > { %v6426_v43 = vunpack.i.h.bf16 %v6424_v59  ;;  %v6425_v16 = vunpack.i.l.bf16 %v6424_v59  ;;  %3761 = vmatpush.msrb.mxu3 %v3457_v32  ;;  %3807 = vmatpush.msra.mxu2 %v3458_v26  ;;  %v6310_v26 = vunpack.i.l.bf16 %v8798_v46  ;;  %v3720_v32 = vsel %vm3000_vm5, %v6415_v61, %v6416_v42 }
 0xd99   : > { %v3723_v51 = vsel %vm3000_vm5, %v6420_v29, %v6421_v31  ;;  %3762 = vmatmul.f32.vlgmr.msrb.gmra.mxu3 %v8934_v57  ;;  %3808 = vmatmul.f32.vlgmr.msra.gmra.mxu2 %v8934_v57  ;;  %v3654_v2 = vsel %vm799_vm7, %v6385_v9, %v6386_v55  ;;  %v3685_v29 = vsel %vm2961_vm8, %v6276_v40, %v6300_v28  ;;  %v6405_v28 = vunpack.i.l.bf16 %v8914_v21 }
 0xd9a   : > { %3884 = vmatpush.msra.mxu3 %v3690_v13  ;;  %3921 = vmatpush.msrb.mxu2 %v3726_v25  ;;  %v3724_v45 = vsel %vm3000_vm5, %v6421_v31, %v6425_v16  ;;  %v3719_v38 = vsel %vm3000_vm5, %v6426_v43, %v6415_v61  ;;  %v3725_v46 = vsel %vm3000_vm5, %v6425_v16, %v6440_v63  ;;  %v8970_v63 = vld [vmem:[#allocation2 + $0x90] sm:$0xff]  ;;  %v6411_v21 = vunpack.i.h.bf16 %v8879_v18 }
 0xd9b   : > { %3783 = vmatpush.msrb.mxu0 %v3723_v51  ;;  %3829 = vmatpush.msra.mxu1 %v3724_v45  ;;  %v3650_v3 = vsel %vm799_vm7, %v6310_v26, %v6311_v14  ;;  %v3653_v24 = vsel %vm799_vm7, %v6335_v34, %v6385_v9  ;;  %v3649_v40 = vsel %vm799_vm7, %v6281_v35, %v6310_v26  ;;  %v3739_v34 = vld [vmem:[#allocation2 + $0x98] sm:$0xff] }
 0xd9c   : > { %3885 = vmatpush.msra.mxu3 %v3686_v44  ;;  %v3616_v5 = vsel %vm2884_vm9, %v6345_v30, %v6400_v22  ;;  %v3613_v35 = vsel %vm2884_vm9, %v6286_v17, %v6401_v12  ;;  %v3586_v30 = vsel %vm770_vm2, %v6355_v62, %v6405_v28  ;;  %v3583_v61 = vsel %vm770_vm2, %v6291_v33, %v6406_v52 }
 0xd9d   : > { %3784 = vmatpush.msrb.mxu0 %v3719_v38  ;;  %3830 = vmatpush.msra.mxu1 %v3720_v32  ;;  %v3556_v62 = vsel %vm664_vm1, %v6365_v58, %v6410_v19  ;;  %v3553_v10 = vsel %vm664_vm1, %v6296_v37, %v6411_v21  ;;  %v3936_v44 = vperm.slane %v5396_v27, 3  ;;  %vm3951_vm2 = vcmask 187392  }
 0xd9e   : > { %3886 = vmatpush.msra.mxu3 %v3654_v2  ;;  %v6429_v31 = vpop.permute.xlu0 %6428  ;;  %5390 = vmatmul.msk.f32.vlgmr.msra.gmra.mxu1 %vm799_vm7, %v3737_v50 }
 0xd9f   : > { %3838 = vmatpush.msra.mxu0 %v3689_v41  ;;  %3875 = vmatpush.msrb.mxu1 %v3725_v46  ;;  %v6430_v7 = vunpack.i.l.bf16 %v6429_v31  ;;  %v6434_v53 = vpop.permute.xlu1 %6433 }
 0xda0   : > { %3887 = vmatpush.msra.mxu3 %v3650_v3  ;;  %5388 = vmatmul.msk.f32.vlgmr.msrb.gmra.mxu0 %vm799_vm7, %v3737_v50  ;;  %v6435_v33 = vunpack.i.l.bf16 %v6434_v53  ;;  %v6436_v18 = vunpack.i.h.bf16 %v6434_v53 }
 0xda1   : > { %3839 = vmatpush.msra.mxu0 %v3685_v29  ;;  %3765 = vmatmul.f32.gmra.mxu3 %v8970_v63  ;;  %v3526_v56 = vsel %vm2769_vm10, %v6380_v1, %v6430_v7 }
 0xda2   : > { %3888 = vmatpush.msra.mxu3 %v6400_v22  ;;  %3811 = vmatmul.f32.gmra.mxu2 %v8970_v63  ;;  %v3496_v48 = vsel %vm470_vm6, %v6395_v60, %v6435_v33  ;;  %v3493_v47 = vsel %vm470_vm6, %v6316_v4, %v6436_v18  ;;  %v3934_v60 = vperm.slane %v5396_v27, 1 }
 0xda3   : > { %3840 = vmatpush.msra.mxu0 %v3653_v24 }
 0xda4   : > { %3889 = vmatpush.msra.mxu3 %v6401_v12 }
 0xda5   : > { %3841 = vmatpush.msra.mxu0 %v3649_v40 }
 0xda6   : > { %3890 = vmatpush.msra.mxu3 %v6405_v28  ;;  %v6444_v23 = vpop.permute.xlu0 %6443  ;;  %5391 = vmatmul.msk.f32.gmra.mxu1 %vm799_vm7, %v3739_v34 }
 0xda7   : > { %3842 = vmatpush.msra.mxu0 %v3616_v5  ;;  %v6446_v59 = vunpack.i.h.bf16 %v6444_v23  ;;  %v6445_v13 = vunpack.i.l.bf16 %v6444_v23 }
 0xda8   : > { %3891 = vmatpush.msra.mxu3 %v6406_v52  ;;  %5389 = vmatmul.msk.f32.gmra.mxu0 %vm799_vm7, %v3739_v34 }
 0xda9   : > { %3843 = vmatpush.msra.mxu0 %v3613_v35  ;;  %v3721_v6 = vsel %vm3000_vm5, %v6416_v42, %v6445_v13  ;;  %v3722_v17 = vsel %vm3000_vm5, %v6445_v13, %v6446_v59  ;;  %v6431_v42 = vunpack.i.h.bf16 %v6429_v31 }
 0xdaa   : > { %3892 = vmatpush.msra.mxu3 %v6410_v19  ;;  %3876 = vmatpush.msrb.mxu1 %v3721_v6 }
 0xdab   : > { %3844 = vmatpush.msra.mxu0 %v3586_v30  ;;  %3922 = vmatpush.msrb.mxu2 %v3722_v17  ;;  %v3523_v58 = vsel %vm2769_vm10, %v6306_v0, %v6431_v42 }
 0xdac   : > { %3893 = vmatpush.msra.mxu3 %v6411_v21  ;;  %5394 = vmatmul.msk.f32.vlgmr.msrb.gmra.mxu2 %vm799_vm7, %v3737_v50 }
 0xdad   : > { %3845 = vmatpush.msra.mxu0 %v3583_v61 }
 0xdae   : > { %3894 = vmatpush.msra.mxu3 %v6430_v7  ;;  %5392 = vmatmul.msk.f32.vlgmr.msrb.gmra.mxu1 %vm799_vm7, %v3737_v50 }
 0xdaf   : > { %3846 = vmatpush.msra.mxu0 %v3556_v62 }
 0xdb0   : > { %3895 = vmatpush.msra.mxu3 %v6431_v42 }
 0xdb1   : > { %3847 = vmatpush.msra.mxu0 %v3553_v10 }
 0xdb2   : > { %3896 = vmatpush.msra.mxu3 %v6435_v33 }
 0xdb3   : > { %3848 = vmatpush.msra.mxu0 %v3526_v56 }
 0xdb4   : > { %3897 = vmatpush.msra.mxu3 %v6436_v18  ;;  %5395 = vmatmul.msk.f32.gmra.mxu2 %vm799_vm7, %v3739_v34 }
 0xdb5   : > { %3849 = vmatpush.msra.mxu0 %v3523_v58 }
 0xdb6   : > { %3898 = vmatpush.msra.mxu3 %v8771_v20  ;;  %5393 = vmatmul.msk.f32.gmra.mxu1 %vm799_vm7, %v3739_v34 }
 0xdb7   : > { %3850 = vmatpush.msra.mxu0 %v3496_v48 }
 0xdb8   : > { %3899 = vmatpush.msra.mxu3 %v8723_v49 }
 0xdb9   : > { %3851 = vmatpush.msra.mxu0 %v3493_v47  ;;  %3900 = vmatmul.f32.vlgmr.msra.gmra.mxu3 %v8934_v57  ;;  %v3983_v47 = vld [vmem:[#allocation6 + $0x40] sm:$0xff] }
 0xdbb   : > { %3852 = vmatpush.msra.mxu0 %v3464_v8 }
 0xdbd   : > { %3853 = vmatpush.msra.mxu0 %v3459_v54 }
 0xdbe   : > { %3854 = vmatmul.f32.vlgmr.msra.gmra.mxu0 %v8934_v57  ;;  %v3935_v57 = vperm.slane %v5396_v27, 2 }
 0xdc1   : > { %3903 = vmatmul.f32.gmra.mxu3 %v8970_v63 }
 0xdc6   : > { %3857 = vmatmul.f32.gmra.mxu0 %v8970_v63 }
 0xe1b   : > { %v3832_v20 = vpop.f32.mrf.mxu1 }
 0xe1c   : > { %v3809_v36 = vpop.f32.mrf.mxu2  ;;  %v3763_v37 = vpop.f32.mrf.mxu3 }
 0xe1d   : > { %v3786_v11 = vpop.f32.mrf.mxu0  ;;  %v9037_v4 = vadd.f32 %v3832_v20, %v3809_v36  ;;  %v3984_v36 = vld [vmem:[#allocation6 + $0x48] sm:$0xff] }
 0xe1e   : > { %v9035_v54 = vadd.f32 %v3786_v11, %v3763_v37 }
 0xe1f   : > { %v3942_v9 = vmul.f32 %v3934_v60, %v9037_v4 }
 0xe20   : > { %v3941_v55 = vmul.f32 %v3933_v15, %v9035_v54 }
 0xe21   : > { %v3963_v3 = vmul.f32 %v3942_v9, %v9037_v4 }
 0xe22   : > { %v3949_v14 = vadd.f32 %v3942_v9, %v3941_v55  ;;  %v3962_v29 = vmul.f32 %v3941_v55, %v9035_v54 }
 0xe23   : > { %v3835_v1 = vpop.f32.mrf.mxu1 }
 0xe24   : > { %v3766_v8 = vpop.f32.mrf.mxu3  ;;  %v3970_v23 = vadd.f32 %v3963_v3, %v3962_v29 }
 0xe25   : > { %v3789_v49 = vpop.f32.mrf.mxu0  ;;  %v3812_v0 = vpop.f32.mrf.mxu2 }
 0xe26   : > { %v9039_v16 = vadd.f32 %v3789_v49, %v3766_v8  ;;  %v9043_v51 = vadd.f32 %v3835_v1, %v3812_v0 }
 0xe28   : > { %v3945_v32 = vmul.f32 %v3933_v15, %v9039_v16  ;;  %v3946_v50 = vmul.f32 %v3934_v60, %v9043_v51 }
 0xe2a   : > { %v3966_v22 = vmul.f32 %v3945_v32, %v9039_v16  ;;  %v3967_v12 = vmul.f32 %v3946_v50, %v9043_v51  ;;  %v3956_v35 = vadd.f32 %v3946_v50, %v3945_v32 }
 0xe2b   : > { %v3878_v39 = vpop.f32.mrf.mxu1 }
 0xe2c   : > { %v3976_v30 = vadd.f32 %v3967_v12, %v3966_v22 }
 0xe2f   : > { %v3924_v43 = vpop.f32.mrf.mxu2 }
 0xe33   : > { %v3881_v31 = vpop.f32.mrf.mxu1 }
 0xe37   : > { %v3927_v5 = vpop.f32.mrf.mxu2 }
 0xe3b   : > { %v3855_v25 = vpop.f32.mrf.mxu0 }
 0xe3c   : > { %v9045_v45 = vadd.f32 %v3878_v39, %v3855_v25  ;;  %v3901_v38 = vpop.f32.mrf.mxu3 }
 0xe3d   : > { %v9049_v41 = vadd.f32 %v3924_v43, %v3901_v38 }
 0xe3e   : > { %v3943_v26 = vmul.f32 %v3935_v57, %v9045_v45 }
 0xe3f   : > { %v3944_v2 = vmul.f32 %v3936_v44, %v9049_v41 }
 0xe40   : > { %v3950_v46 = vadd.f32 %v3949_v14, %v3943_v26  ;;  %v3964_v40 = vmul.f32 %v3943_v26, %v9045_v45 }
 0xe41   : > { %v3952_v63 = vsel %vm3951_vm2, %v3944_v2, 0.0  ;;  %v3965_v52 = vmul.f32 %v3944_v2, %v9049_v41 }
 0xe42   : > { %v3953_v34 = vadd.f32 %v3952_v63, %v3950_v46  ;;  %v3971_v17 = vadd.f32 %v3970_v23, %v3964_v40  ;;  %v4066_v46 = vld [vmem:[#allocation4 + $0x80] sm:$0xff]  ;;  %v4067_v63 = vld [vmem:[#allocation4 + $0x88] sm:$0xff] }
 0xe43   : > { %v3858_v24 = vpop.f32.mrf.mxu0  ;;  %v3972_v7 = vsel %vm3951_vm2, %v3965_v52, 0.0 }
 0xe44   : > { %v9059_v28 = vadd.f32 %v3881_v31, %v3858_v24  ;;  %3954 = vadd.xlane.f32.xlu2 %v3953_v34  ;;  %v3904_v13 = vpop.f32.mrf.mxu3  ;;  %v3973_v10 = vadd.f32 %v3972_v7, %v3971_v17 }
 0xe45   : > { %v9063_v19 = vadd.f32 %v3927_v5, %v3904_v13  ;;  %v4072_v5 = vld [vmem:[#allocation4 + $0x98] sm:$0xff] }
 0xe46   : > { %v3947_v59 = vmul.f32 %v3935_v57, %v9059_v28 }
 0xe47   : > { %v3948_v61 = vmul.f32 %v3936_v44, %v9063_v19 }
 0xe48   : > { %v3968_v6 = vmul.f32 %v3947_v59, %v9059_v28  ;;  %v3957_v21 = vadd.f32 %v3956_v35, %v3947_v59  ;;  %v4071_v35 = vld [vmem:[#allocation4 + $0x90] sm:$0xff] }
 0xe49   : > { %v3969_v53 = vmul.f32 %v3948_v61, %v9063_v19  ;;  %v3958_v42 = vsel %vm3951_vm2, %v3948_v61, 0.0 }
 0xe4a   : > { %v3977_v62 = vadd.f32 %v3976_v30, %v3968_v6  ;;  %v3959_v33 = vadd.f32 %v3958_v42, %v3957_v21 }
 0xe4b   : > { %v3978_v56 = vsel %vm3951_vm2, %v3969_v53, 0.0 }
 0xe4c   : > { %3974 = vadd.xlane.f32.xlu2 %v3973_v10  ;;  %3960 = vadd.xlane.f32.xlu1 %v3959_v33  ;;  %v3979_v18 = vadd.f32 %v3978_v56, %v3977_v62 }
 0xe4e   : > { %3980 = vadd.xlane.f32.xlu0 %v3979_v18 }
 0xeb7   : > { %v3955_v58 = vpop.xlane.xlu2 %3954 }
 0xebf   : > { %v3961_v48 = vpop.xlane.xlu1 %3960  ;;  %v3975_v11 = vpop.xlane.xlu2 %3974 }
 0xec0   : > { %4005 = vmatpush.msra.mxu1 %v3961_v48 }
 0xec1   : > { %v3981_v20 = vpop.xlane.xlu0 %3980 }
 0xec2   : > { %4006 = vmatpush.msra.mxu1 %v3955_v58  ;;  %4028 = vmatpush.msrb.mxu0 %v3981_v20 }
 0xec3   : > { %5397 = vmatmul.msk.f32.vlgmr.msra.gmra.mxu1 %vm799_vm7, %v3983_v47 }
 0xec4   : > { %4029 = vmatpush.msrb.mxu0 %v3975_v11 }
 0xec5   : > { %5399 = vmatmul.msk.f32.vlgmr.msrb.gmra.mxu0 %vm799_vm7, %v3983_v47 }
 0xecb   : > { %5398 = vmatmul.msk.f32.gmra.mxu1 %vm799_vm7, %v3984_v36 }
 0xecd   : > { %5400 = vmatmul.msk.f32.gmra.mxu0 %vm799_vm7, %v3984_v36 }
 0xf40   : > { %v4008_v37 = vpop.f32.mrf.mxu1 }
 0xf41   : > { %v4037_v1 = vmul.f32 %v4008_v37, %v4008_v37 }
 0xf42   : > { %v4031_v49 = vpop.f32.mrf.mxu0 }
 0xf43   : > { %v4039_v0 = vsub.f32 %v4031_v49, %v4037_v1  ;;  %v5409_v49 = vld [vmem:[%s9425_s4 + $0x1e] sm:$0x3f] }
 0xf45   : > { %v4041_v27 = vmax.f32 %v4039_v0, 0.0 }
 0xf47   : > { %v4043_v8 = vadd.f32 1e-05, %v4041_v27 }
 0xf48   : > { %v4011_v39 = vpop.f32.mrf.mxu1 }
 0xf49   : > { %6563 = vrsqrt.f32 %v4043_v8  ;;  %v4038_v15 = vmul.f32 %v4011_v39, %v4011_v39  ;;  %vm4051_vm5 = vweird.f32 %v4043_v8 }
 0xf4a   : > { %v4034_v60 = vpop.f32.mrf.mxu0 }
 0xf4b   : > { %v4040_v57 = vsub.f32 %v4034_v60, %v4038_v15  ;;  %v4228_v15 = vperm.slane %v5409_v49, 3  ;;  %v4227_v60 = vperm.slane %v5409_v49, 2 }
 0xf4d   : > { %v4042_v43 = vmax.f32 %v4040_v57, 0.0 }
 0xf4f   : > { %v6564_v25 = vpop.eup %6563  ;;  %v4044_v55 = vadd.f32 1e-05, %v4042_v43 }
 0xf50   : > { %v4046_v9 = vmul.f32 %v6564_v25, %v4043_v8  ;;  %vm4052_vm4 = vweird.f32 %v6564_v25  ;;  %v4226_v8 = vperm.slane %v5409_v49, 1 }
 0xf51   : > { %6565 = vrsqrt.f32 %v4044_v55  ;;  %vm4053_vm8 = vmor %vm4051_vm5, %vm4052_vm4  ;;  %vm4061_vm10 = vweird.f32 %v4044_v55 }
 0xf52   : > { %v4047_v44 = vmul.f32 %v6564_v25, %v4046_v9 }
 0xf54   : > { %v4048_v14 = vmul.f32 0.5, %v4047_v44 }
 0xf56   : > { %v4049_v26 = vsub.f32 1.5, %v4048_v14 }
 0xf57   : > { %v6566_v38 = vpop.eup %6565 }
 0xf58   : > { %v4050_v32 = vmul.f32 %v6564_v25, %v4049_v26  ;;  %v4056_v50 = vmul.f32 %v6566_v38, %v4044_v55  ;;  %vm4062_vm9 = vweird.f32 %v6566_v38 }
 0xf59   : > { %vm4063_vm11 = vmor %vm4061_vm10, %vm4062_vm9 }
 0xf5a   : > { %v4057_v2 = vmul.f32 %v6566_v38, %v4056_v50  ;;  %v4054_v31 = vsel %vm4053_vm8, %v6564_v25, %v4050_v32 }
 0xf5b   : > { %v4068_v29 = vmul.f32 %v4066_v46, %v4054_v31 }
 0xf5c   : > { %v4058_v3 = vmul.f32 0.5, %v4057_v2 }
 0xf5d   : > { %4079 = vperm.xlu2 %5771, %v4068_v29   ;;  %v4073_v23 = vmul.f32 %v4068_v29, %v4008_v37 }
 0xf5e   : > { %v4059_v22 = vsub.f32 1.5, %v4058_v3 }
 0xf5f   : > { %v4075_v59 = vsub.f32 %v4071_v35, %v4073_v23 }
 0xf60   : > { %v4060_v24 = vmul.f32 %v6566_v38, %v4059_v22 }
 0xf62   : > { %v4064_v12 = vsel %vm4063_vm11, %v6566_v38, %v4060_v24 }
 0xf63   : > { %v4069_v40 = vmul.f32 %v4067_v63, %v4064_v12 }
 0xf65   : > { %4084 = vperm.xlu1 %5769, %v4069_v40   ;;  %v4074_v34 = vmul.f32 %v4069_v40, %v4011_v39  ;;  %v4225_v39 = vperm.slane %v5409_v49, 0 }
 0xf67   : > { %v4076_v52 = vsub.f32 %v4072_v5, %v4074_v34 }
 0xf69   : > { %4102 = vperm.xlu0 %5770, %v4076_v52  }
 0xf6d   : > { %4097 = vperm.xlu1 %5769, %v4075_v59  }
 0xfb7   : > { %v4080_v30 = vpop.permute.xlu2 %4079 }
 0xfb8   : > { %v4087_v33 = vmul.f32 %v4080_v30, %v9035_v54  ;;  %v4088_v56 = vmul.f32 %v4080_v30, %v9037_v4  ;;  %v4089_v18 = vmul.f32 %v4080_v30, %v9045_v45  ;;  %v4122_v45 = vld [vmem:[#allocation2 + $0xa0] sm:$0xff] }
 0xfd7   : > { %v4085_v13 = vpop.permute.xlu1 %4084 }
 0xfd8   : > { %v4091_v6 = vmul.f32 %v4085_v13, %v9039_v16  ;;  %v4092_v17 = vmul.f32 %v4085_v13, %v9043_v51  ;;  %v4093_v21 = vmul.f32 %v4085_v13, %v9059_v28  ;;  %v4094_v61 = vmul.f32 %v4085_v13, %v9063_v19 }
 0xfd9   : > { %v4090_v51 = vmul.f32 %v4080_v30, %v9049_v41  ;;  %v4123_v41 = vld [vmem:[#allocation2 + $0xb0] sm:$0xff] }
 0xfdb   : > { %v4103_v7 = vpop.permute.xlu0 %4102 }
 0xfdc   : > { %v4109_v62 = vadd.f32 %v4103_v7, %v4091_v6  ;;  %v4110_v53 = vadd.f32 %v4103_v7, %v4092_v17  ;;  %v4111_v42 = vadd.f32 %v4103_v7, %v4093_v21  ;;  %v4112_v10 = vadd.f32 %v4103_v7, %v4094_v61 }
 0xfde   : > { %v4117_v58 = vmax.f32 %v4109_v62, 0.0  ;;  %v4118_v48 = vmax.f32 %v4110_v53, 0.0  ;;  %v4119_v16 = vmax.f32 %v4111_v42, 0.0  ;;  %v4120_v47 = vmax.f32 %v4112_v10, 0.0 }
 0xfdf   : > { %v4098_v28 = vpop.permute.xlu1 %4097 }
 0xfe0   : > { %4144 = vmatpush.msra.mxu2 %v4117_v58  ;;  %4167 = vmatpush.msrb.mxu1 %v4118_v48  ;;  %v4105_v19 = vadd.f32 %v4098_v28, %v4087_v33  ;;  %v4106_v20 = vadd.f32 %v4098_v28, %v4088_v56  ;;  %v4107_v11 = vadd.f32 %v4098_v28, %v4089_v18  ;;  %v4274_v56 = vld [vmem:[#allocation6 + $0x50] sm:$0xff] }
 0xfe1   : > { %4190 = vmatpush.msrb.mxu3 %v4119_v16  ;;  %4213 = vmatpush.msra.mxu0 %v4120_v47  ;;  %v4108_v36 = vadd.f32 %v4098_v28, %v4090_v51  ;;  %v4275_v16 = vld [vmem:[#allocation6 + $0x58] sm:$0xff] }
 0xfe2   : > { %v4113_v54 = vmax.f32 %v4105_v19, 0.0  ;;  %v4114_v37 = vmax.f32 %v4106_v20, 0.0  ;;  %v4115_v4 = vmax.f32 %v4107_v11, 0.0 }
 0xfe3   : > { %v4116_v1 = vmax.f32 %v4108_v36, 0.0 }
 0xfe4   : > { %4145 = vmatpush.msra.mxu2 %v4113_v54  ;;  %4168 = vmatpush.msrb.mxu1 %v4114_v37 }
 0xfe5   : > { %4191 = vmatpush.msrb.mxu3 %v4115_v4  ;;  %4214 = vmatpush.msra.mxu0 %v4116_v1 }
 0xfe6   : > { %5401 = vmatmul.msk.f32.vlgmr.msra.gmra.mxu2 %vm799_vm7, %v4122_v45  ;;  %5405 = vmatmul.msk.f32.vlgmr.msrb.gmra.mxu3 %vm799_vm7, %v4122_v45 }
 0xfe7   : > { %5403 = vmatmul.msk.f32.vlgmr.msrb.gmra.mxu1 %vm799_vm7, %v4122_v45  ;;  %5407 = vmatmul.msk.f32.vlgmr.msra.gmra.mxu0 %vm799_vm7, %v4122_v45 }
 0xfee   : > { %5402 = vmatmul.msk.f32.gmra.mxu2 %vm799_vm7, %v4123_v41  ;;  %5406 = vmatmul.msk.f32.gmra.mxu3 %vm799_vm7, %v4123_v41 }
 0xfef   : > { %5404 = vmatmul.msk.f32.gmra.mxu1 %vm799_vm7, %v4123_v41  ;;  %5408 = vmatmul.msk.f32.gmra.mxu0 %vm799_vm7, %v4123_v41 }
0x1064   : > { %v9094_v0 = vpop.f32.mrf.mxu1  ;;  %v9096_v27 = vpop.f32.mrf.mxu0 }
0x1065   : > { %v4234_v25 = vmul.f32 %v4226_v8, %v9094_v0  ;;  %v4236_v9 = vmul.f32 %v4228_v15, %v9096_v27 }
0x1067   : > { %v4243_v38 = vsel %vm3951_vm2, %v4236_v9, 0.0  ;;  %v4254_v23 = vmul.f32 %v4234_v25, %v9094_v0  ;;  %v4256_v62 = vmul.f32 %v4236_v9, %v9096_v27  ;;  %v4357_v9 = vld [vmem:[#allocation4 + $0xa0] sm:$0xff] }
0x1069   : > { %v9098_v57 = vpop.f32.mrf.mxu2  ;;  %v9100_v43 = vpop.f32.mrf.mxu3  ;;  %v4263_v42 = vsel %vm3951_vm2, %v4256_v62, 0.0 }
0x106a   : > { %v4233_v55 = vmul.f32 %v4225_v39, %v9098_v57  ;;  %v4235_v14 = vmul.f32 %v4227_v60, %v9100_v43 }
0x106c   : > { %v4241_v44 = vadd.f32 %v4234_v25, %v4233_v55  ;;  %v9106_v26 = vpop.f32.mrf.mxu1  ;;  %v9109_v50 = vpop.f32.mrf.mxu0  ;;  %v4253_v63 = vmul.f32 %v4233_v55, %v9098_v57  ;;  %v4255_v61 = vmul.f32 %v4235_v14, %v9100_v43 }
0x106d   : > { %v4238_v46 = vmul.f32 %v4226_v8, %v9106_v26  ;;  %v4240_v3 = vmul.f32 %v4228_v15, %v9109_v50 }
0x106e   : > { %v4242_v32 = vadd.f32 %v4241_v44, %v4235_v14  ;;  %v4261_v30 = vadd.f32 %v4254_v23, %v4253_v63  ;;  %v4358_v63 = vld [vmem:[#allocation4 + $0xa8] sm:$0xff] }
0x106f   : > { %v4258_v12 = vmul.f32 %v4238_v46, %v9106_v26  ;;  %v4260_v34 = vmul.f32 %v4240_v3, %v9109_v50  ;;  %v4249_v52 = vsel %vm3951_vm2, %v4240_v3, 0.0 }
0x1070   : > { %v4244_v2 = vadd.f32 %v4243_v38, %v4242_v32  ;;  %v4262_v53 = vadd.f32 %v4261_v30, %v4255_v61 }
0x1071   : > { %v9112_v31 = vpop.f32.mrf.mxu2  ;;  %v9114_v29 = vpop.f32.mrf.mxu3  ;;  %v4269_v21 = vsel %vm3951_vm2, %v4260_v34, 0.0  ;;  %vm4548_vm2 = vcmask 760832  }
0x1072   : > { %v4237_v22 = vmul.f32 %v4225_v39, %v9112_v31  ;;  %v4239_v24 = vmul.f32 %v4227_v60, %v9114_v29  ;;  %4245 = vadd.xlane.f32.xlu2 %v4244_v2  ;;  %v4264_v10 = vadd.f32 %v4263_v42, %v4262_v53 }
0x1074   : > { %v4247_v40 = vadd.f32 %v4238_v46, %v4237_v22  ;;  %v4257_v5 = vmul.f32 %v4237_v22, %v9112_v31  ;;  %v4259_v13 = vmul.f32 %v4239_v24, %v9114_v29  ;;  %v4362_v46 = vld [vmem:[#allocation4 + $0xb0] sm:$0xff] }
0x1076   : > { %v4267_v35 = vadd.f32 %v4258_v12, %v4257_v5  ;;  %v4248_v59 = vadd.f32 %v4247_v40, %v4239_v24  ;;  %v4363_v5 = vld [vmem:[#allocation4 + $0xb8] sm:$0xff] }
0x1078   : > { %v4268_v6 = vadd.f32 %v4267_v35, %v4259_v13  ;;  %v4250_v17 = vadd.f32 %v4249_v52, %v4248_v59 }
0x107a   : > { %4251 = vadd.xlane.f32.xlu0 %v4250_v17  ;;  %v4270_v7 = vadd.f32 %v4269_v21, %v4268_v6 }
0x107c   : > { %4271 = vadd.xlane.f32.xlu1 %v4270_v7 }
0x1082   : > { %4265 = vadd.xlane.f32.xlu0 %v4264_v10 }
0x10e5   : > { %v4246_v18 = vpop.xlane.xlu2 %4245 }
0x10ed   : > { %v4252_v33 = vpop.xlane.xlu0 %4251 }
0x10ee   : > { %4296 = vmatpush.msrb.mxu2 %v4252_v33 }
0x10ef   : > { %v4272_v58 = vpop.xlane.xlu1 %4271 }
0x10f0   : > { %4297 = vmatpush.msrb.mxu2 %v4246_v18  ;;  %4319 = vmatpush.msra.mxu1 %v4272_v58 }
0x10f1   : > { %5410 = vmatmul.msk.f32.vlgmr.msrb.gmra.mxu2 %vm799_vm7, %v4274_v56 }
0x10f5   : > { %v4266_v48 = vpop.xlane.xlu0 %4265 }
0x10f6   : > { %4320 = vmatpush.msra.mxu1 %v4266_v48 }
0x10f7   : > { %5412 = vmatmul.msk.f32.vlgmr.msra.gmra.mxu1 %vm799_vm7, %v4274_v56 }
0x10f9   : > { %5411 = vmatmul.msk.f32.gmra.mxu2 %vm799_vm7, %v4275_v16 }
0x10ff   : > { %5413 = vmatmul.msk.f32.gmra.mxu1 %vm799_vm7, %v4275_v16 }
0x1174   : > { %v4299_v47 = vpop.f32.mrf.mxu2  ;;  %v4322_v51 = vpop.f32.mrf.mxu1 }
0x1175   : > { %v4328_v28 = vmul.f32 %v4299_v47, %v4299_v47 }
0x1177   : > { %v4330_v19 = vsub.f32 %v4322_v51, %v4328_v28 }
0x1179   : > { %v4332_v20 = vmax.f32 %v4330_v19, 0.0 }
0x117b   : > { %v4334_v11 = vadd.f32 1e-05, %v4332_v20 }
0x117c   : > { %v4302_v36 = vpop.f32.mrf.mxu2  ;;  %v4325_v54 = vpop.f32.mrf.mxu1 }
0x117d   : > { %6567 = vrsqrt.f32 %v4334_v11  ;;  %v4329_v37 = vmul.f32 %v4302_v36, %v4302_v36  ;;  %vm4342_vm13 = vweird.f32 %v4334_v11 }
0x117f   : > { %v4331_v4 = vsub.f32 %v4325_v54, %v4329_v37 }
0x1181   : > { %v4333_v1 = vmax.f32 %v4331_v4, 0.0 }
0x1183   : > { %v6568_v45 = vpop.eup %6567  ;;  %v4335_v41 = vadd.f32 1e-05, %v4333_v1 }
0x1184   : > { %v4337_v49 = vmul.f32 %v6568_v45, %v4334_v11  ;;  %vm4343_vm12 = vweird.f32 %v6568_v45 }
0x1185   : > { %6569 = vrsqrt.f32 %v4335_v41  ;;  %vm4344_vm14 = vmor %vm4342_vm13, %vm4343_vm12  ;;  %vm4352_vm0 = vweird.f32 %v4335_v41  ;;  %vm4887_vm12 = vcmask 1045504  }
0x1186   : > { %v4338_v8 = vmul.f32 %v6568_v45, %v4337_v49 }
0x1188   : > { %v4339_v39 = vmul.f32 0.5, %v4338_v8 }
0x118a   : > { %v4340_v15 = vsub.f32 1.5, %v4339_v39 }
0x118b   : > { %v6570_v60 = vpop.eup %6569 }
0x118c   : > { %v4341_v25 = vmul.f32 %v6568_v45, %v4340_v15  ;;  %v4347_v55 = vmul.f32 %v6570_v60, %v4335_v41  ;;  %vm4353_vm15 = vweird.f32 %v6570_v60 }
0x118d   : > { %vm4354_vm3 = vmor %vm4352_vm0, %vm4353_vm15 }
0x118e   : > { %v4348_v44 = vmul.f32 %v6570_v60, %v4347_v55  ;;  %v4345_v14 = vsel %vm4344_vm14, %v6568_v45, %v4341_v25 }
0x118f   : > { %v4359_v38 = vmul.f32 %v4357_v9, %v4345_v14 }
0x1190   : > { %v4349_v32 = vmul.f32 0.5, %v4348_v44 }
0x1191   : > { %4370 = vperm.xlu2 %5771, %v4359_v38   ;;  %v4364_v2 = vmul.f32 %v4359_v38, %v4299_v47 }
0x1192   : > { %v4350_v3 = vsub.f32 1.5, %v4349_v32 }
0x1193   : > { %v4366_v22 = vsub.f32 %v4362_v46, %v4364_v2 }
0x1194   : > { %v4351_v24 = vmul.f32 %v6570_v60, %v4350_v3 }
0x1195   : > { %4388 = vperm.xlu1 %5769, %v4366_v22   ;;  %v4519_v22 = vld [vmem:[%s9426_s5 + $0x78] sm:$0xff] }
0x1196   : > { %v4355_v12 = vsel %vm4354_vm3, %v6570_v60, %v4351_v24  ;;  %v4535_v24 = vld [vmem:[%s9426_s5 + $0xf8] sm:$0xff]  ;;  %4559 = vmatpush.msra.mxu3 %v4519_v22 }
0x1197   : > { %v4360_v40 = vmul.f32 %v4358_v63, %v4355_v12  ;;  %v4547_v63 = vld [vmem:[%s9426_s5 + $0x158] sm:$0x1f]  ;;  %4582 = vmatpush.msrb.mxu0 %v4535_v24  ;;  %v4518_v12 = vld [vmem:[%s9426_s5 + $0x70] sm:$0xff] }
0x1198   : > { %4560 = vmatpush.msra.mxu3 %v4518_v12 }
0x1199   : > { %4375 = vperm.xlu0 %5770, %v4360_v40   ;;  %v4365_v34 = vmul.f32 %v4360_v40, %v4302_v36  ;;  %v4534_v40 = vld [vmem:[%s9426_s5 + $0xf0] sm:$0xff] }
0x119a   : > { %4583 = vmatpush.msrb.mxu0 %v4534_v40 }
0x119b   : > { %v4367_v52 = vsub.f32 %v4363_v5, %v4365_v34  ;;  %v4546_v5 = vld [vmem:[%s9426_s5 + $0x150] sm:$0xff]  ;;  %v4517_v34 = vld [vmem:[%s9426_s5 + $0x68] sm:$0xff] }
0x119c   : > { %4561 = vmatpush.msra.mxu3 %v4517_v34 }
0x119d   : > { %4393 = vperm.xlu2 %5771, %v4367_v52   ;;  %v4533_v52 = vld [vmem:[%s9426_s5 + $0xe8] sm:$0xff] }
0x119e   : > { %4584 = vmatpush.msrb.mxu0 %v4533_v52 }
0x11eb   : > { %v4371_v23 = vpop.permute.xlu2 %4370 }
0x11ec   : > { %v4378_v35 = vmul.f32 %v4371_v23, %v9098_v57  ;;  %v4379_v59 = vmul.f32 %v4371_v23, %v9094_v0  ;;  %v4380_v13 = vmul.f32 %v4371_v23, %v9100_v43  ;;  %v4381_v30 = vmul.f32 %v4371_v23, %v9096_v27  ;;  %v4545_v23 = vld [vmem:[%s9426_s5 + $0x148] sm:$0xff] }
0x11f7   : > { %v4394_v27 = vpop.permute.xlu2 %4393 }
0x1207   : > { %v4389_v6 = vpop.permute.xlu1 %4388 }
0x1208   : > { %v4396_v17 = vadd.f32 %v4389_v6, %v4378_v35  ;;  %v4397_v21 = vadd.f32 %v4389_v6, %v4379_v59  ;;  %v4398_v61 = vadd.f32 %v4389_v6, %v4380_v13  ;;  %v4399_v7 = vadd.f32 %v4389_v6, %v4381_v30  ;;  %v4516_v35 = vld [vmem:[%s9426_s5 + $0x60] sm:$0xff]  ;;  %v4515_v30 = vld [vmem:[%s9426_s5 + $0x58] sm:$0xff] }
0x1209   : > { %v4532_v59 = vld [vmem:[%s9426_s5 + $0xe0] sm:$0xff]  ;;  %v4531_v6 = vld [vmem:[%s9426_s5 + $0xd8] sm:$0xff]  ;;  %4562 = vmatpush.msra.mxu3 %v4516_v35 }
0x120a   : > { %v4404_v62 = vmax.f32 %v4396_v17, 0.0  ;;  %v4405_v53 = vmax.f32 %v4397_v21, 0.0  ;;  %v9138_v42 = vmax.f32 %v4398_v61, 0.0  ;;  %v4407_v10 = vmax.f32 %v4399_v7, 0.0  ;;  %v4544_v13 = vld [vmem:[%s9426_s5 + $0x140] sm:$0xff]  ;;  %4585 = vmatpush.msrb.mxu0 %v4532_v59  ;;  %v4543_v17 = vld [vmem:[%s9426_s5 + $0x138] sm:$0xff] }
0x120b   : > { %v4376_v33 = vpop.permute.xlu0 %4375  ;;  %v4514_v21 = vld [vmem:[%s9426_s5 + $0x50] sm:$0xff]  ;;  %4563 = vmatpush.msra.mxu3 %v4515_v30 }
0x120c   : > { %v4382_v56 = vmul.f32 %v4376_v33, %v9112_v31  ;;  %v4383_v57 = vmul.f32 %v4376_v33, %v9106_v26  ;;  %v4384_v0 = vmul.f32 %v4376_v33, %v9114_v29  ;;  %v4385_v43 = vmul.f32 %v4376_v33, %v9109_v50  ;;  %4422 = vrot.lane.b32.xlu1 %v9138_v42, %s6733_s23  ;;  %v4530_v61 = vld [vmem:[%s9426_s5 + $0xd0] sm:$0xff]  ;;  %v4512_v33 = vld [vmem:[%s9426_s5 + $0x40] sm:$0xff] }
0x120d   : > { %4448 = vrot.lane.b32.xlu2 %v4407_v10, %s6733_s23  ;;  %v6447_v18 = vpack.i.bf16 %v4405_v53, %v4404_v62  ;;  %4586 = vmatpush.msrb.mxu0 %v4531_v6  ;;  %v4542_v7 = vld [vmem:[%s9426_s5 + $0x130] sm:$0xff] }
0x120e   : > { %v4400_v58 = vadd.f32 %v4394_v27, %v4382_v56  ;;  %v4401_v48 = vadd.f32 %v4394_v27, %v4383_v57  ;;  %v4402_v16 = vadd.f32 %v4394_v27, %v4384_v0  ;;  %v4403_v47 = vadd.f32 %v4394_v27, %v4385_v43  ;;  %4564 = vmatpush.msra.mxu3 %v4514_v21  ;;  %v4528_v56 = vld [vmem:[%s9426_s5 + $0xc0] sm:$0xff]  ;;  %v4511_v0 = vld [vmem:[%s9426_s5 + $0x38] sm:$0xff] }
0x120f   : > { %6448 = vrot.lane.b32.xlu0 %v6447_v18, %s6733_s23  ;;  %4587 = vmatpush.msrb.mxu0 %v4530_v61  ;;  %v4540_v57 = vld [vmem:[%s9426_s5 + $0x120] sm:$0xff]  ;;  %v4527_v43 = vld [vmem:[%s9426_s5 + $0xb8] sm:$0xff]  ;;  %v4510_v18 = vld [vmem:[%s9426_s5 + $0x30] sm:$0xff] }
0x1210   : > { %v4408_v31 = vmax.f32 %v4400_v58, 0.0  ;;  %v4409_v51 = vmax.f32 %v4401_v48, 0.0  ;;  %v9148_v26 = vmax.f32 %v4402_v16, 0.0  ;;  %v4411_v29 = vmax.f32 %v4403_v47, 0.0  ;;  %v4539_v27 = vld [vmem:[%s9426_s5 + $0x118] sm:$0xff]  ;;  %v4526_v58 = vld [vmem:[%s9426_s5 + $0xb0] sm:$0xff] }
0x1211   : > { %v4538_v48 = vld [vmem:[%s9426_s5 + $0x110] sm:$0xff]  ;;  %v4509_v16 = vld [vmem:[%s9426_s5 + $0x28] sm:$0xff] }
0x1212   : > { %v6452_v50 = vpack.i.bf16 %v4409_v51, %v4408_v31  ;;  %v4525_v47 = vld [vmem:[%s9426_s5 + $0xa8] sm:$0xff] }
0x1214   : > { %4428 = vrot.lane.b32.xlu1 %v9148_v26, %s6733_s23 }
0x1215   : > { %4450 = vrot.lane.b32.xlu2 %v4411_v29, %s6733_s23 }
0x1217   : > { %6453 = vrot.lane.b32.xlu0 %v6452_v50, %s6733_s23  ;;  %v4536_v50 = vld [vmem:[%s9426_s5 + $0x100] sm:$0xff] }
0x1267   : > { %v4449_v28 = vpop.permute.xlu2 %4448 }
0x1268   : > { %v4459_v19 = vmax.f32 %v4407_v10, %v4449_v28  ;;  %v4541_v10 = vld [vmem:[%s9426_s5 + $0x128] sm:$0xff] }
0x126a   : > { %4476 = vrot.lane.b32.xlu2 %v4459_v19, %s6727_s17  ;;  %v4523_v19 = vld [vmem:[%s9426_s5 + $0x98] sm:$0xff] }
0x126f   : > { %v4451_v20 = vpop.permute.xlu2 %4450 }
0x1270   : > { %v4461_v11 = vmax.f32 %v4411_v29, %v4451_v20  ;;  %v4524_v29 = vld [vmem:[%s9426_s5 + $0xa0] sm:$0xff] }
0x1272   : > { %4484 = vrot.lane.b32.xlu2 %v4461_v11, %s6727_s17  ;;  %v4522_v11 = vld [vmem:[%s9426_s5 + $0x90] sm:$0xff] }
0x127e   : > { %v9156_v36 = vpop.permute.xlu1 %4422 }
0x127f   : > { %v4452_v54 = vsel %vm470_vm6, %v9156_v36, %v4449_v28  ;;  %v4507_v28 = vld [vmem:[%s9426_s5 + $0x18] sm:$0xff] }
0x1280   : > { %v4458_v37 = vmax.f32 %v9138_v42, %v4452_v54  ;;  %v4505_v54 = vld [vmem:[%s9426_s5 + $0x8] sm:$0xff] }
0x1281   : > { %v6449_v4 = vpop.permute.xlu0 %6448 }
0x1282   : > { %v6451_v1 = vunpack.i.h.bf16 %v6449_v4  ;;  %v6450_v45 = vunpack.i.l.bf16 %v6449_v4  ;;  %4474 = vrot.lane.b32.xlu1 %v4458_v37, %s6727_s17  ;;  %v4521_v37 = vld [vmem:[%s9426_s5 + $0x88] sm:$0xff]  ;;  %v4504_v4 = vld [vmem:[%s9426_s5] sm:$0xff] }
0x1284   : > { %v4431_v41 = vsel %vm470_vm6, %v6451_v1, %v9156_v36  ;;  %v4430_v49 = vsel %vm470_vm6, %v6450_v45, %v6451_v1  ;;  %v4520_v1 = vld [vmem:[%s9426_s5 + $0x80] sm:$0xff] }
0x1285   : > { %v9165_v8 = vmax.f32 %v4405_v53, %v4431_v41  ;;  %v9167_v39 = vmax.f32 %v4404_v62, %v4430_v49  ;;  %v4513_v62 = vld [vmem:[%s9426_s5 + $0x48] sm:$0xff]  ;;  %v4442_v41 = vmax.f32 %v9138_v42, %v9156_v36 }
0x1286   : > { %v9169_v15 = vpop.permute.xlu1 %4428  ;;  %v4529_v53 = vld [vmem:[%s9426_s5 + $0xc8] sm:$0xff]  ;;  %4565 = vmatpush.msra.mxu3 %v4513_v62 }
0x1287   : > { %v4453_v60 = vsel %vm470_vm6, %v9169_v15, %v4451_v20  ;;  %v6457_v25 = vpack.i.bf16 %v9165_v8, %v9167_v39  ;;  %4588 = vmatpush.msrb.mxu0 %v4529_v53  ;;  %v4506_v20 = vld [vmem:[%s9426_s5 + $0x10] sm:$0xff] }
0x1288   : > { %v4460_v55 = vmax.f32 %v9148_v26, %v4453_v60  ;;  %4566 = vmatpush.msra.mxu3 %v4512_v33 }
0x1289   : > { %6458 = vrot.lane.b32.xlu0 %v6457_v25, %s6727_s17  ;;  %v6454_v9 = vpop.permute.xlu0 %6453  ;;  %4589 = vmatpush.msrb.mxu0 %v4528_v56 }
0x128a   : > { %v6456_v44 = vunpack.i.h.bf16 %v6454_v9  ;;  %v6455_v14 = vunpack.i.l.bf16 %v6454_v9  ;;  %4482 = vrot.lane.b32.xlu1 %v4460_v55, %s6727_s17  ;;  %4567 = vmatpush.msra.mxu3 %v4511_v0  ;;  %v4445_v9 = vmax.f32 %v9148_v26, %v9169_v15 }
0x128b   : > { %4590 = vmatpush.msrb.mxu0 %v4527_v43 }
0x128c   : > { %v4433_v38 = vsel %vm470_vm6, %v6456_v44, %v9169_v15  ;;  %v4432_v32 = vsel %vm470_vm6, %v6455_v14, %v6456_v44  ;;  %vm4555_vm6 = vcmask 1044480   ;;  %4568 = vmatpush.msra.mxu3 %v4510_v18 }
0x128d   : > { %v9181_v46 = vmax.f32 %v4409_v51, %v4433_v38  ;;  %v9183_v2 = vmax.f32 %v4408_v31, %v4432_v32  ;;  %5414 = vmatpush.msk.msra.mxu2 %vm4555_vm6, %v4547_v63  ;;  %4591 = vmatpush.msrb.mxu0 %v4526_v58  ;;  %v4537_v31 = vld [vmem:[%s9426_s5 + $0x108] sm:$0xff]  ;;  %v4508_v51 = vld [vmem:[%s9426_s5 + $0x20] sm:$0xff] }
0x128e   : > { %4569 = vmatpush.msra.mxu3 %v4509_v16 }
0x128f   : > { %v6462_v3 = vpack.i.bf16 %v9181_v46, %v9183_v2  ;;  %4610 = vmatpush.msra.mxu2 %v4546_v5  ;;  %4592 = vmatpush.msrb.mxu0 %v4525_v47 }
0x1290   : > { %4570 = vmatpush.msra.mxu3 %v4508_v51 }
0x1291   : > { %6463 = vrot.lane.b32.xlu0 %v6462_v3, %s6727_s17  ;;  %4611 = vmatpush.msra.mxu2 %v4545_v23 }
0x1292   : > { %4593 = vmatpush.msrb.mxu0 %v4524_v29  ;;  %4571 = vmatpush.msra.mxu3 %v4507_v28  ;;  %v4680_v29 = vld [vmem:[#allocation2 + $0xc8] sm:$0xff] }
0x1293   : > { %4612 = vmatpush.msra.mxu2 %v4544_v13 }
0x1294   : > { %4594 = vmatpush.msrb.mxu0 %v4523_v19  ;;  %4572 = vmatpush.msra.mxu3 %v4506_v20 }
0x1295   : > { %4613 = vmatpush.msra.mxu2 %v4543_v17 }
0x1296   : > { %4595 = vmatpush.msrb.mxu0 %v4522_v11  ;;  %4573 = vmatpush.msra.mxu3 %v4505_v54  ;;  %v4682_v54 = vld [vmem:[#allocation2 + $0xd8] sm:$0xff] }
0x1297   : > { %4614 = vmatpush.msra.mxu2 %v4542_v7 }
0x1298   : > { %4596 = vmatpush.msrb.mxu0 %v4521_v37  ;;  %4574 = vmatpush.msra.mxu3 %v4504_v4  ;;  %v4679_v37 = vld [vmem:[#allocation2 + $0xc0] sm:$0xff]  ;;  %v4681_v4 = vld [vmem:[#allocation2 + $0xd0] sm:$0xff] }
0x1299   : > { %4615 = vmatpush.msra.mxu2 %v4541_v10 }
0x129a   : > { %4597 = vmatpush.msrb.mxu0 %v4520_v1 }
0x129b   : > { %4616 = vmatpush.msra.mxu2 %v4540_v57 }
0x129d   : > { %4617 = vmatpush.msra.mxu2 %v4539_v27 }
0x129f   : > { %4618 = vmatpush.msra.mxu2 %v4538_v48 }
0x12a1   : > { %4619 = vmatpush.msra.mxu2 %v4537_v31 }
0x12a3   : > { %4620 = vmatpush.msra.mxu2 %v4536_v50 }
0x12c4   : > { %v4477_v45 = vpop.permute.xlu2 %4476 }
0x12cc   : > { %v4485_v44 = vpop.permute.xlu2 %4484 }
0x12f4   : > { %v4475_v49 = vpop.permute.xlu1 %4474 }
0x12f5   : > { %v4488_v60 = vsel %vm664_vm1, %v4475_v49, %v4477_v45  ;;  %v5419_v45 = vld [vmem:[%s9425_s4 + $0x24] sm:$0x3f] }
0x12f6   : > { %v4500_v25 = vmax.f32 %v4442_v41, %v4488_v60  ;;  %v4738_v41 = vperm.slane %v5419_v45, 0 }
0x12f8   : > { %5415 = vmatmul.msk.f32.vlgmr.msra.gmra.mxu2 %vm4548_vm2, %v4500_v25 }
0x12fb   : > { %v6459_v55 = vpop.permute.xlu0 %6458 }
0x12fc   : > { %v6461_v14 = vunpack.i.h.bf16 %v6459_v55  ;;  %v6460_v38 = vunpack.i.l.bf16 %v6459_v55  ;;  %v4483_v32 = vpop.permute.xlu1 %4482 }
0x12fd   : > { %v4491_v3 = vsel %vm664_vm1, %v4483_v32, %v4485_v44 }
0x12fe   : > { %v4486_v22 = vsel %vm664_vm1, %v6460_v38, %v6461_v14  ;;  %v4487_v42 = vsel %vm664_vm1, %v6461_v14, %v4475_v49  ;;  %v4503_v36 = vmax.f32 %v4445_v9, %v4491_v3 }
0x12ff   : > { %v4498_v24 = vmax.f32 %v9167_v39, %v4486_v22  ;;  %v4499_v63 = vmax.f32 %v9165_v8, %v4487_v42 }
0x1300   : > { %5416 = vmatmul.msk.f32.gmra.mxu2 %vm4548_vm2, %v4503_v36  ;;  %vm5207_vm2 = vcmask 7168  }
0x1301   : > { %4575 = vmatmul.f32.vlgmr.msra.gmra.mxu3 %v4498_v24  ;;  %4598 = vmatmul.f32.vlgmr.msrb.gmra.mxu0 %v4499_v63  ;;  %v4758_v63 = vld [vmem:[#allocation6 + $0x60] sm:$0xff] }
0x1303   : > { %v6464_v12 = vpop.permute.xlu0 %6463 }
0x1304   : > { %v6466_v26 = vunpack.i.h.bf16 %v6464_v12  ;;  %v6465_v15 = vunpack.i.l.bf16 %v6464_v12 }
0x1306   : > { %v4489_v40 = vsel %vm664_vm1, %v6465_v15, %v6466_v26  ;;  %v4490_v5 = vsel %vm664_vm1, %v6466_v26, %v4483_v32  ;;  %vm4742_vm1 = vcmask 179200  }
0x1307   : > { %v4501_v34 = vmax.f32 %v9183_v2, %v4489_v40  ;;  %v4502_v52 = vmax.f32 %v9181_v46, %v4490_v5  ;;  %v4759_v40 = vld [vmem:[#allocation6 + $0x68] sm:$0xff] }
0x1309   : > { %4578 = vmatmul.f32.gmra.mxu3 %v4501_v34  ;;  %4601 = vmatmul.f32.gmra.mxu0 %v4502_v52 }
0x137b   : > { %v4622_v39 = vpop.f32.mrf.mxu2 }
0x137e   : > { %v4599_v23 = vpop.f32.mrf.mxu0 }
0x1383   : > { %v4625_v6 = vpop.f32.mrf.mxu2 }
0x1384   : > { %v4576_v35 = vpop.f32.mrf.mxu3 }
0x1385   : > { %v4600_v8 = vadd.f32 %v4599_v23, %v4576_v35 }
0x1386   : > { %v4602_v59 = vpop.f32.mrf.mxu0 }
0x1387   : > { %v4623_v17 = vadd.f32 %v4622_v39, %v4600_v8 }
0x138c   : > { %v4579_v13 = vpop.f32.mrf.mxu3 }
0x138d   : > { %v4603_v30 = vadd.f32 %v4602_v59, %v4579_v13 }
0x138f   : > { %v4626_v21 = vadd.f32 %v4625_v6, %v4603_v30 }
0x1391   : > { %v6477_v61 = vpack.i.bf16 %v4623_v17, %v4626_v21 }
0x1393   : > { %6478 = vrot.lane.b32.xlu2 %v6477_v61, %s6741_s21  ;;  %6473 = vrot.lane.b32.xlu1 %v6477_v61, %s6742_s22 }
0x1394   : > { %6468 = vrot.lane.b32.xlu0 %v6477_v61, %s6743_s25 }
0x139b   : > { %6493 = vrot.lane.b32.xlu2 %v6477_v61, %s6733_s23  ;;  %6488 = vrot.lane.b32.xlu1 %v6477_v61, %s6744_s26 }
0x139c   : > { %6483 = vrot.lane.b32.xlu0 %v6477_v61, %s6745_s28 }
0x13a3   : > { %6503 = vrot.lane.b32.xlu1 %v6477_v61, %s6734_s24 }
0x13a4   : > { %6498 = vrot.lane.b32.xlu0 %v6477_v61, %s6746_s29 }
0x13ed   : > { %v6479_v10 = vpop.permute.xlu2 %6478 }
0x13ee   : > { %v6480_v57 = vunpack.i.l.bf16 %v6479_v10  ;;  %v6481_v0 = vunpack.i.h.bf16 %v6479_v10 }
0x13f5   : > { %v6494_v47 = vpop.permute.xlu2 %6493 }
0x13f6   : > { %v6495_v50 = vunpack.i.l.bf16 %v6494_v47  ;;  %v6496_v19 = vunpack.i.h.bf16 %v6494_v47  ;;  %v4842_v47 = vld [vmem:[#allocation4 + $0xc8] sm:$0xff] }
0x1405   : > { %v6474_v7 = vpop.permute.xlu1 %6473 }
0x1406   : > { %v6469_v46 = vpop.permute.xlu0 %6468  ;;  %v6475_v53 = vunpack.i.l.bf16 %v6474_v7  ;;  %v6476_v33 = vunpack.i.h.bf16 %v6474_v7 }
0x1407   : > { %v6470_v2 = vunpack.i.l.bf16 %v6469_v46  ;;  %v6471_v62 = vunpack.i.h.bf16 %v6469_v46 }
0x1409   : > { %4689 = vmatpush.msrb.mxu1 %v6470_v2 }
0x140b   : > { %4690 = vmatpush.msrb.mxu1 %v6471_v62 }
0x140d   : > { %4691 = vmatpush.msrb.mxu1 %v6475_v53  ;;  %v6489_v43 = vpop.permute.xlu1 %6488 }
0x140e   : > { %v6484_v56 = vpop.permute.xlu0 %6483  ;;  %v6490_v48 = vunpack.i.l.bf16 %v6489_v43  ;;  %v6491_v31 = vunpack.i.h.bf16 %v6489_v43 }
0x140f   : > { %4692 = vmatpush.msrb.mxu1 %v6476_v33  ;;  %v6485_v27 = vunpack.i.l.bf16 %v6484_v56  ;;  %v6486_v18 = vunpack.i.h.bf16 %v6484_v56  ;;  %v4841_v33 = vld [vmem:[#allocation4 + $0xc0] sm:$0xff] }
0x1411   : > { %4693 = vmatpush.msrb.mxu1 %v6480_v57 }
0x1413   : > { %4694 = vmatpush.msrb.mxu1 %v6481_v0 }
0x1415   : > { %4695 = vmatpush.msrb.mxu1 %v6485_v27  ;;  %v6504_v28 = vpop.permute.xlu1 %6503  ;;  %v4846_v27 = vld [vmem:[#allocation4 + $0xd0] sm:$0xff] }
0x1416   : > { %v6499_v58 = vpop.permute.xlu0 %6498  ;;  %v6505_v20 = vunpack.i.l.bf16 %v6504_v28  ;;  %v6506_v11 = vunpack.i.h.bf16 %v6504_v28 }
0x1417   : > { %v6500_v16 = vunpack.i.l.bf16 %v6499_v58  ;;  %4696 = vmatpush.msrb.mxu1 %v6486_v18  ;;  %v6501_v51 = vunpack.i.h.bf16 %v6499_v58 }
0x1419   : > { %4697 = vmatpush.msrb.mxu1 %v6490_v48  ;;  %4726 = vmatpush.msrb.mxu3 %v6500_v16 }
0x141b   : > { %4698 = vmatpush.msrb.mxu1 %v6491_v31  ;;  %4727 = vmatpush.msrb.mxu3 %v6501_v51 }
0x141c   : > { %5417 = vmatmul.msk.f32.vlgmr.msrb.gmra.mxu3 %vm799_vm7, %v4680_v29  ;;  %v4847_v29 = vld [vmem:[#allocation4 + $0xd8] sm:$0xff] }
0x141d   : > { %4699 = vmatpush.msrb.mxu1 %v6495_v50 }
0x141f   : > { %4700 = vmatpush.msrb.mxu1 %v6496_v19  ;;  %v4880_v19 = vld [vmem:[%s9427_s6 + $0x10] sm:$0x3f] }
0x1421   : > { %4701 = vmatpush.msrb.mxu1 %v6505_v20  ;;  %v4879_v20 = vld [vmem:[%s9427_s6 + $0x8] sm:$0xff] }
0x1423   : > { %4702 = vmatpush.msrb.mxu1 %v6506_v11  ;;  %v4878_v11 = vld [vmem:[%s9427_s6] sm:$0xff] }
0x1424   : > { %5418 = vmatmul.msk.f32.gmra.mxu3 %vm799_vm7, %v4682_v54 }
0x1425   : > { %4703 = vmatpush.msrb.mxu1 %v4626_v21 }
0x1427   : > { %4704 = vmatpush.msrb.mxu1 %v4623_v17 }
0x1428   : > { %4705 = vmatmul.f32.vlgmr.msrb.gmra.mxu1 %v4679_v37 }
0x1429   : > { %5424 = vmatpush.msk.msra.mxu1 %vm4887_vm12, %v4880_v19 }
0x142b   : > { %4905 = vmatpush.msra.mxu1 %v4879_v20  ;;  %v5044_v20 = vld [vmem:[#allocation6 + $0x78] sm:$0xff] }
0x142d   : > { %4906 = vmatpush.msra.mxu1 %v4878_v11 }
0x1430   : > { %4708 = vmatmul.f32.gmra.mxu1 %v4681_v4 }
0x149f   : > { %v4729_v1 = vpop.f32.mrf.mxu3 }
0x14a5   : > { %v4706_v49 = vpop.f32.mrf.mxu1 }
0x14a6   : > { %v9347_v60 = vadd.f32 %v4729_v1, %v4706_v49 }
0x14a7   : > { %v4732_v9 = vpop.f32.mrf.mxu3 }
0x14a8   : > { %v4740_v25 = vmul.f32 %v4738_v41, %v9347_v60 }
0x14aa   : > { %v4743_v55 = vsel %vm4742_vm1, %v4740_v25, 0.0  ;;  %v4749_v42 = vmul.f32 %v4740_v25, %v9347_v60 }
0x14ab   : > { %4744 = vadd.xlane.f32.xlu0 %v4743_v55 }
0x14ac   : > { %v4751_v36 = vsel %vm4742_vm1, %v4749_v42, 0.0 }
0x14ad   : > { %v4709_v44 = vpop.f32.mrf.mxu1 }
0x14ae   : > { %v9351_v14 = vadd.f32 %v4732_v9, %v4709_v44 }
0x14b0   : > { %v4741_v38 = vmul.f32 %v4738_v41, %v9351_v14 }
0x14b2   : > { %v4746_v32 = vsel %vm4742_vm1, %v4741_v38, 0.0  ;;  %v4750_v3 = vmul.f32 %v4741_v38, %v9351_v14 }
0x14b3   : > { %4747 = vadd.xlane.f32.xlu2 %v4746_v32 }
0x14b4   : > { %v4754_v22 = vsel %vm4742_vm1, %v4750_v3, 0.0 }
0x14b5   : > { %4755 = vadd.xlane.f32.xlu1 %v4754_v22 }
0x14bb   : > { %4752 = vadd.xlane.f32.xlu2 %v4751_v36 }
0x151e   : > { %v4745_v12 = vpop.xlane.xlu0 %4744 }
0x1526   : > { %v4748_v24 = vpop.xlane.xlu2 %4747 }
0x1527   : > { %4780 = vmatpush.msrb.mxu2 %v4748_v24 }
0x1528   : > { %v4756_v26 = vpop.xlane.xlu1 %4755 }
0x1529   : > { %4781 = vmatpush.msrb.mxu2 %v4745_v12  ;;  %4803 = vmatpush.msra.mxu0 %v4756_v26 }
0x152a   : > { %5420 = vmatmul.msk.f32.vlgmr.msrb.gmra.mxu2 %vm799_vm7, %v4758_v63 }
0x152e   : > { %v4753_v15 = vpop.xlane.xlu2 %4752 }
0x152f   : > { %4804 = vmatpush.msra.mxu0 %v4753_v15 }
0x1530   : > { %5422 = vmatmul.msk.f32.vlgmr.msra.gmra.mxu0 %vm799_vm7, %v4758_v63 }
0x1532   : > { %5421 = vmatmul.msk.f32.gmra.mxu2 %vm799_vm7, %v4759_v40 }
0x1538   : > { %5423 = vmatmul.msk.f32.gmra.mxu0 %vm799_vm7, %v4759_v40 }
0x15ad   : > { %v4783_v5 = vpop.f32.mrf.mxu2  ;;  %v4806_v34 = vpop.f32.mrf.mxu0 }
0x15ae   : > { %v4812_v52 = vmul.f32 %v4783_v5, %v4783_v5 }
0x15b0   : > { %v4814_v23 = vsub.f32 %v4806_v34, %v4812_v52 }
0x15b2   : > { %v4816_v39 = vmax.f32 %v4814_v23, 0.0 }
0x15b4   : > { %v4818_v35 = vadd.f32 1e-05, %v4816_v39 }
0x15b5   : > { %v4786_v8 = vpop.f32.mrf.mxu2  ;;  %v4809_v59 = vpop.f32.mrf.mxu0 }
0x15b6   : > { %6571 = vrsqrt.f32 %v4818_v35  ;;  %v4813_v13 = vmul.f32 %v4786_v8, %v4786_v8  ;;  %vm4826_vm5 = vweird.f32 %v4818_v35 }
0x15b8   : > { %v4815_v30 = vsub.f32 %v4809_v59, %v4813_v13 }
0x15ba   : > { %v4817_v6 = vmax.f32 %v4815_v30, 0.0 }
0x15bc   : > { %v6572_v17 = vpop.eup %6571  ;;  %v4819_v21 = vadd.f32 1e-05, %v4817_v6 }
0x15bd   : > { %v4821_v61 = vmul.f32 %v6572_v17, %v4818_v35  ;;  %vm4827_vm4 = vweird.f32 %v6572_v17 }
0x15be   : > { %6573 = vrsqrt.f32 %v4819_v21  ;;  %vm4828_vm8 = vmor %vm4826_vm5, %vm4827_vm4  ;;  %vm4836_vm10 = vweird.f32 %v4819_v21 }
0x15bf   : > { %v4822_v46 = vmul.f32 %v6572_v17, %v4821_v61 }
0x15c1   : > { %v4823_v2 = vmul.f32 0.5, %v4822_v46  ;;  %v4965_v46 = vld [vmem:[#allocation2 + $0xe0] sm:$0xff] }
0x15c3   : > { %v4824_v7 = vsub.f32 1.5, %v4823_v2  ;;  %v4967_v2 = vld [vmem:[#allocation2 + $0xf0] sm:$0xff] }
0x15c4   : > { %v6574_v62 = vpop.eup %6573 }
0x15c5   : > { %v4825_v53 = vmul.f32 %v6572_v17, %v4824_v7  ;;  %v4831_v10 = vmul.f32 %v6574_v62, %v4819_v21  ;;  %vm4837_vm9 = vweird.f32 %v6574_v62  ;;  %v4968_v21 = vld [vmem:[#allocation2 + $0xf8] sm:$0xff] }
0x15c6   : > { %vm4838_vm11 = vmor %vm4836_vm10, %vm4837_vm9 }
0x15c7   : > { %v4832_v56 = vmul.f32 %v6574_v62, %v4831_v10  ;;  %v4829_v57 = vsel %vm4828_vm8, %v6572_v17, %v4825_v53 }
0x15c8   : > { %v4843_v0 = vmul.f32 %v4841_v33, %v4829_v57 }
0x15c9   : > { %v4833_v43 = vmul.f32 0.5, %v4832_v56 }
0x15ca   : > { %4854 = vperm.xlu0 %5770, %v4843_v0   ;;  %v4848_v18 = vmul.f32 %v4843_v0, %v4783_v5 }
0x15cb   : > { %v4834_v58 = vsub.f32 1.5, %v4833_v43 }
0x15cc   : > { %v4850_v48 = vsub.f32 %v4846_v27, %v4848_v18 }
0x15cd   : > { %v4835_v16 = vmul.f32 %v6574_v62, %v4834_v58 }
0x15ce   : > { %4866 = vperm.xlu1 %5769, %v4850_v48  }
0x15cf   : > { %v4839_v31 = vsel %vm4838_vm11, %v6574_v62, %v4835_v16  ;;  %v5429_v62 = vld [vmem:[%s9425_s4 + $0x2a] sm:$0x3f] }
0x15d0   : > { %v4844_v51 = vmul.f32 %v4842_v47, %v4839_v31  ;;  %v5024_v53 = vperm.slane %v5429_v62, 0 }
0x15d2   : > { %4859 = vperm.xlu2 %5771, %v4844_v51   ;;  %v4849_v50 = vmul.f32 %v4844_v51, %v4786_v8  ;;  %v4966_v8 = vld [vmem:[#allocation2 + $0xe8] sm:$0xff] }
0x15d4   : > { %v4851_v28 = vsub.f32 %v4847_v29, %v4849_v50  ;;  %v5043_v29 = vld [vmem:[#allocation6 + $0x70] sm:$0xff] }
0x15d6   : > { %4871 = vperm.xlu0 %5770, %v4851_v28  }
0x162c   : > { %v4860_v41 = vpop.permute.xlu2 %4859 }
0x162d   : > { %v4863_v49 = vmul.f32 %v4860_v41, %v9351_v14 }
0x163c   : > { %v4855_v54 = vpop.permute.xlu0 %4854 }
0x163d   : > { %v4862_v37 = vmul.f32 %v4855_v54, %v9347_v60 }
0x1640   : > { %v4867_v4 = vpop.permute.xlu1 %4866 }
0x1641   : > { %v4874_v1 = vadd.f32 %v4867_v4, %v4862_v37 }
0x1643   : > { %v4876_v45 = vmax.f32 %v4874_v1, 0.0 }
0x1645   : > { %5425 = vmatmul.msk.f32.vlgmr.msra.gmra.mxu1 %vm4742_vm1, %v4876_v45 }
0x1648   : > { %v4872_v25 = vpop.permute.xlu0 %4871 }
0x1649   : > { %v4875_v55 = vadd.f32 %v4872_v25, %v4863_v49 }
0x164b   : > { %v4877_v9 = vmax.f32 %v4875_v55, 0.0 }
0x164d   : > { %5426 = vmatmul.msk.f32.gmra.mxu1 %vm4742_vm1, %v4877_v9 }
0x16c2   : > { %v4908_v44 = vpop.f32.mrf.mxu1 }
0x16ca   : > { %v4911_v38 = vpop.f32.mrf.mxu1 }
0x16cb   : > { %v6517_v32 = vpack.i.bf16 %v4908_v44, %v4911_v38 }
0x16cd   : > { %6518 = vrot.lane.b32.xlu2 %v6517_v32, %s6741_s21  ;;  %6513 = vrot.lane.b32.xlu0 %v6517_v32, %s6742_s22  ;;  %s372_s22 = scalar_lea.vmem %s9429_s8, %s5439_s19 }
0x16ce   : > { %6508 = vrot.lane.b32.xlu1 %v6517_v32, %s6743_s25 }
0x16d5   : > { %6533 = vrot.lane.b32.xlu2 %v6517_v32, %s6733_s23  ;;  %6528 = vrot.lane.b32.xlu0 %v6517_v32, %s6744_s26 }
0x16d6   : > { %6523 = vrot.lane.b32.xlu1 %v6517_v32, %s6745_s28 }
0x16dd   : > { %6543 = vrot.lane.b32.xlu0 %v6517_v32, %s6746_s29 }
0x16de   : > { %6538 = vrot.lane.b32.xlu1 %v6517_v32, %s6734_s24 }
0x1727   : > { %v6519_v36 = vpop.permute.xlu2 %6518 }
0x1728   : > { %v6520_v12 = vunpack.i.l.bf16 %v6519_v36  ;;  %v6521_v15 = vunpack.i.h.bf16 %v6519_v36 }
0x172f   : > { %v6534_v39 = vpop.permute.xlu2 %6533 }
0x1730   : > { %v6535_v13 = vunpack.i.l.bf16 %v6534_v39  ;;  %v6536_v6 = vunpack.i.h.bf16 %v6534_v39 }
0x173f   : > { %v6514_v60 = vpop.permute.xlu0 %6513 }
0x1740   : > { %v6509_v14 = vpop.permute.xlu1 %6508  ;;  %v6515_v42 = vunpack.i.l.bf16 %v6514_v60  ;;  %v6516_v24 = vunpack.i.h.bf16 %v6514_v60 }
0x1741   : > { %v6510_v3 = vunpack.i.l.bf16 %v6509_v14  ;;  %v6511_v22 = vunpack.i.h.bf16 %v6509_v14 }
0x1743   : > { %4975 = vmatpush.msra.mxu3 %v6510_v3 }
0x1745   : > { %4976 = vmatpush.msra.mxu3 %v6511_v22 }
0x1747   : > { %4977 = vmatpush.msra.mxu3 %v6515_v42  ;;  %v6529_v63 = vpop.permute.xlu0 %6528 }
0x1748   : > { %v6524_v26 = vpop.permute.xlu1 %6523  ;;  %v6530_v23 = vunpack.i.l.bf16 %v6529_v63  ;;  %v6531_v59 = vunpack.i.h.bf16 %v6529_v63 }
0x1749   : > { %4978 = vmatpush.msra.mxu3 %v6516_v24  ;;  %v6525_v40 = vunpack.i.l.bf16 %v6524_v26  ;;  %v6526_v5 = vunpack.i.h.bf16 %v6524_v26  ;;  %v5126_v24 = vld [vmem:[#allocation4 + $0xe0] sm:$0xff] }
0x174b   : > { %4979 = vmatpush.msra.mxu3 %v6520_v12 }
0x174d   : > { %4980 = vmatpush.msra.mxu3 %v6521_v15 }
0x174f   : > { %4981 = vmatpush.msra.mxu3 %v6525_v40  ;;  %v6544_v34 = vpop.permute.xlu0 %6543 }
0x1750   : > { %v6545_v52 = vunpack.i.l.bf16 %v6544_v34  ;;  %v6546_v35 = vunpack.i.h.bf16 %v6544_v34  ;;  %v6539_v30 = vpop.permute.xlu1 %6538 }
0x1751   : > { %4982 = vmatpush.msra.mxu3 %v6526_v5  ;;  %v6540_v17 = vunpack.i.l.bf16 %v6539_v30  ;;  %v6541_v61 = vunpack.i.h.bf16 %v6539_v30 }
0x1752   : > { %5012 = vmatpush.msra.mxu2 %v6545_v52  ;;  %v5131_v52 = vld [vmem:[#allocation4 + $0xf0] sm:$0xff] }
0x1753   : > { %4983 = vmatpush.msra.mxu3 %v6530_v23  ;;  %v5127_v23 = vld [vmem:[#allocation4 + $0xe8] sm:$0xff] }
0x1754   : > { %5013 = vmatpush.msra.mxu2 %v6546_v35 }
0x1755   : > { %4984 = vmatpush.msra.mxu3 %v6531_v59  ;;  %5427 = vmatmul.msk.f32.vlgmr.msra.gmra.mxu2 %vm799_vm7, %v4966_v8  ;;  %v5132_v59 = vld [vmem:[#allocation4 + $0xf8] sm:$0xff] }
0x1757   : > { %4985 = vmatpush.msra.mxu3 %v6535_v13 }
0x1759   : > { %4986 = vmatpush.msra.mxu3 %v6536_v6 }
0x175b   : > { %4987 = vmatpush.msra.mxu3 %v6540_v17  ;;  %v5434_v17 = vld [vmem:[%s9425_s4 + $0x30] sm:$0x3f] }
0x175d   : > { %4988 = vmatpush.msra.mxu3 %v6541_v61  ;;  %5428 = vmatmul.msk.f32.gmra.mxu2 %vm799_vm7, %v4968_v21 }
0x175f   : > { %4989 = vmatpush.msra.mxu3 %v4911_v38 }
0x1761   : > { %4990 = vmatpush.msra.mxu3 %v4908_v44 }
0x1762   : > { %4991 = vmatmul.f32.vlgmr.msra.gmra.mxu3 %v4965_v46 }
0x176a   : > { %4994 = vmatmul.f32.gmra.mxu3 %v4967_v2  ;;  %v5166_v2 = vperm.slane %v5434_v17, 0 }
0x17d8   : > { %v5015_v7 = vpop.f32.mrf.mxu2 }
0x17e0   : > { %v5018_v0 = vpop.f32.mrf.mxu2 }
0x17e5   : > { %v4992_v10 = vpop.f32.mrf.mxu3 }
0x17e6   : > { %v9389_v33 = vadd.f32 %v5015_v7, %v4992_v10 }
0x17e8   : > { %v5026_v56 = vmul.f32 %v5024_v53, %v9389_v33 }
0x17ea   : > { %v5028_v57 = vsel %vm4742_vm1, %v5026_v56, 0.0  ;;  %v5034_v47 = vmul.f32 %v5026_v56, %v9389_v33 }
0x17eb   : > { %5029 = vadd.xlane.f32.xlu1 %v5028_v57 }
0x17ec   : > { %v5036_v31 = vsel %vm4742_vm1, %v5034_v47, 0.0 }
0x17ed   : > { %v4995_v43 = vpop.f32.mrf.mxu3 }
0x17ee   : > { %v9393_v27 = vadd.f32 %v5018_v0, %v4995_v43 }
0x17f0   : > { %v5027_v18 = vmul.f32 %v5024_v53, %v9393_v27 }
0x17f2   : > { %v5031_v58 = vsel %vm4742_vm1, %v5027_v18, 0.0  ;;  %v5035_v48 = vmul.f32 %v5027_v18, %v9393_v27 }
0x17f3   : > { %5032 = vadd.xlane.f32.xlu2 %v5031_v58 }
0x17f4   : > { %v5039_v16 = vsel %vm4742_vm1, %v5035_v48, 0.0  ;;  %v5176_v48 = vld [vmem:[#allocation7] sm:$0xff] }
0x17f5   : > { %5040 = vadd.xlane.f32.xlu0 %v5039_v16 }
0x17fb   : > { %5037 = vadd.xlane.f32.xlu2 %v5036_v31 }
0x185e   : > { %v5030_v50 = vpop.xlane.xlu1 %5029 }
0x1866   : > { %v5033_v51 = vpop.xlane.xlu2 %5032 }
0x1867   : > { %5065 = vmatpush.msrb.mxu0 %v5033_v51 }
0x1868   : > { %v5041_v28 = vpop.xlane.xlu0 %5040 }
0x1869   : > { %5066 = vmatpush.msrb.mxu0 %v5030_v50  ;;  %5088 = vmatpush.msrb.mxu1 %v5041_v28 }
0x186a   : > { %5430 = vmatmul.msk.f32.vlgmr.msrb.gmra.mxu0 %vm799_vm7, %v5043_v29 }
0x186e   : > { %v5038_v19 = vpop.xlane.xlu2 %5037 }
0x186f   : > { %5089 = vmatpush.msrb.mxu1 %v5038_v19 }
0x1870   : > { %5432 = vmatmul.msk.f32.vlgmr.msrb.gmra.mxu1 %vm799_vm7, %v5043_v29 }
0x1872   : > { %5431 = vmatmul.msk.f32.gmra.mxu0 %vm799_vm7, %v5044_v20 }
0x1878   : > { %5433 = vmatmul.msk.f32.gmra.mxu1 %vm799_vm7, %v5044_v20 }
0x18e7   : > { %v5068_v11 = vpop.f32.mrf.mxu0 }
0x18e8   : > { %v5097_v54 = vmul.f32 %v5068_v11, %v5068_v11 }
0x18ed   : > { %v5091_v37 = vpop.f32.mrf.mxu1 }
0x18ee   : > { %v5099_v4 = vsub.f32 %v5091_v37, %v5097_v54 }
0x18ef   : > { %v5071_v1 = vpop.f32.mrf.mxu0 }
0x18f0   : > { %v5101_v45 = vmax.f32 %v5099_v4, 0.0  ;;  %v5098_v49 = vmul.f32 %v5071_v1, %v5071_v1 }
0x18f2   : > { %v5103_v41 = vadd.f32 1e-05, %v5101_v45 }
0x18f4   : > { %6575 = vrsqrt.f32 %v5103_v41  ;;  %vm5111_vm14 = vweird.f32 %v5103_v41 }
0x18f5   : > { %v5094_v25 = vpop.f32.mrf.mxu1 }
0x18f6   : > { %v5100_v55 = vsub.f32 %v5094_v25, %v5098_v49 }
0x18f8   : > { %v5102_v9 = vmax.f32 %v5100_v55, 0.0 }
0x18fa   : > { %v6576_v44 = vpop.eup %6575  ;;  %v5104_v38 = vadd.f32 1e-05, %v5102_v9 }
0x18fb   : > { %v5106_v32 = vmul.f32 %v6576_v44, %v5103_v41  ;;  %vm5112_vm13 = vweird.f32 %v6576_v44 }
0x18fc   : > { %6577 = vrsqrt.f32 %v5104_v38  ;;  %vm5113_vm15 = vmor %vm5111_vm14, %vm5112_vm13  ;;  %vm5121_vm3 = vweird.f32 %v5104_v38 }
0x18fd   : > { %v5107_v60 = vmul.f32 %v6576_v44, %v5106_v32 }
0x18ff   : > { %v5108_v14 = vmul.f32 0.5, %v5107_v60 }
0x1901   : > { %v5109_v3 = vsub.f32 1.5, %v5108_v14 }
0x1902   : > { %v6578_v22 = vpop.eup %6577 }
0x1903   : > { %v5110_v42 = vmul.f32 %v6576_v44, %v5109_v3  ;;  %v5116_v36 = vmul.f32 %v6578_v22, %v5104_v38  ;;  %vm5122_vm0 = vweird.f32 %v6578_v22 }
0x1904   : > { %vm5123_vm6 = vmor %vm5121_vm3, %vm5122_vm0 }
0x1905   : > { %v5117_v63 = vmul.f32 %v6578_v22, %v5116_v36  ;;  %v5114_v12 = vsel %vm5113_vm15, %v6576_v44, %v5110_v42 }
0x1906   : > { %v5128_v26 = vmul.f32 %v5126_v24, %v5114_v12 }
0x1907   : > { %v5118_v15 = vmul.f32 0.5, %v5117_v63 }
0x1908   : > { %5139 = vperm.xlu0 %5770, %v5128_v26   ;;  %v5133_v5 = vmul.f32 %v5128_v26, %v5068_v11 }
0x1909   : > { %v5119_v40 = vsub.f32 1.5, %v5118_v15 }
0x190a   : > { %v5135_v35 = vsub.f32 %v5131_v52, %v5133_v5 }
0x190b   : > { %v5120_v34 = vmul.f32 %v6578_v22, %v5119_v40 }
0x190d   : > { %v5124_v39 = vsel %vm5123_vm6, %v6578_v22, %v5120_v34 }
0x190e   : > { %v5129_v8 = vmul.f32 %v5127_v23, %v5124_v39 }
0x1910   : > { %5151 = vperm.xlu0 %5770, %v5135_v35   ;;  %5144 = vperm.xlu1 %5769, %v5129_v8   ;;  %v5134_v13 = vmul.f32 %v5129_v8, %v5071_v1 }
0x1912   : > { %v5136_v30 = vsub.f32 %v5132_v59, %v5134_v13 }
0x1914   : > { %5156 = vperm.xlu2 %5771, %v5136_v30  }
0x196e   : > { %v5157_v53 = vpop.permute.xlu2 %5156 }
0x197a   : > { %v5140_v6 = vpop.permute.xlu0 %5139 }
0x197b   : > { %v5147_v21 = vmul.f32 %v5140_v6, %v9389_v33 }
0x1982   : > { %v5152_v61 = vpop.permute.xlu0 %5151  ;;  %v5145_v46 = vpop.permute.xlu1 %5144 }
0x1983   : > { %v5159_v7 = vadd.f32 %v5152_v61, %v5147_v21  ;;  %v5148_v62 = vmul.f32 %v5145_v46, %v9393_v27  ;;  %v5177_v27 = vld [vmem:[#allocation7 + $0x8] sm:$0x3] }
0x1985   : > { %v5161_v10 = vmax.f32 %v5159_v7, 0.0  ;;  %v5160_v56 = vadd.f32 %v5157_v53, %v5148_v62 }
0x1987   : > { %v5168_v57 = vmul.f32 %v5166_v2, %v5161_v10  ;;  %v5162_v0 = vmax.f32 %v5160_v56, 0.0 }
0x1989   : > { %v5170_v43 = vsel %vm4742_vm1, %v5168_v57, 0.0  ;;  %v5169_v18 = vmul.f32 %v5166_v2, %v5162_v0 }
0x198a   : > { %5171 = vadd.xlane.f32.xlu2 %v5170_v43 }
0x198b   : > { %v5173_v58 = vsel %vm4742_vm1, %v5169_v18, 0.0  ;;  %vm5209_vm1 = vcmask 1024  }
0x198c   : > { %5174 = vadd.xlane.f32.xlu1 %v5173_v58 }
0x19fd   : > { %v5172_v16 = vpop.xlane.xlu2 %5171 }
0x19ff   : > { %v5175_v33 = vpop.xlane.xlu1 %5174 }
0x1a00   : > { %5198 = vmatpush.msrb.mxu2 %v5175_v33 }
0x1a02   : > { %5199 = vmatpush.msrb.mxu2 %v5172_v16 }
0x1a03   : > { %5435 = vmatmul.msk.f32.vlgmr.msrb.gmra.mxu2 %vm799_vm7, %v5176_v48 }
0x1a0b   : > { %5436 = vmatmul.msk.f32.gmra.mxu2 %vm799_vm7, %v5177_v27 }
0x1a86   : > { %v5201_v47 = vpop.f32.mrf.mxu2 }
0x1a87   : > { %5208 = vst.msk [vmem:[%s372_s22] sm:$0xff] %vm5207_vm2, %v5201_v47 }
0x1a8e   : > { %v5204_v31 = vpop.f32.mrf.mxu2 }
0x1a8f   : > { %5210 = vst.msk [vmem:[%s372_s22 + $0x8] sm:$0x3] %vm5209_vm1, %v5204_v31 }
0x1a90 PF: > { %s21_s27 = sadd.s32 1, %s6717_s27  }
0x1a91   : > { %p18_p7 = scmp.ge.s32.totalorder %s21_s27, 4  }
0x1a93   :  { %20 = sbr.rel (!%p18_p7) target bundleno = 3 (0x3), region = 136 }
0x1a98   :  { %5232 = vsyncpa [#allocation3], 1 }
0x1a99   :  { %5234 = vsyncpa [#allocation3 + $0x1], 1 }
0x1a9a   :  { %5235 = vsyncpa [#allocation5], 1 }
0x1a9b   :  { %5236 = vsyncpa [#allocation8], 1 }

</bundles_post_ra>
